<compile_context>
chip_gen: v6e
topology: v6e:2x2x1
jax: 0.10.0
libtpu: 0.0.40
codegen_flags: <defaults>
</compile_context>

<pallas_src>
import functools

import jax
import jax.numpy as jnp
from jax import lax
from jax.experimental import pallas as pl
from jax.experimental.pallas import tpu as pltpu

EPS = 1e-5                       # nn.BatchNorm2d default eps
MATMUL_DTYPE = jnp.float32       # TODO(synk): flip to bf16 on v6e/v7x (~2x MXU/DMA); needs looser check tol.
_VMEM_LIMIT = 48 * 1024 * 1024   # row-tile footprints stay far below v7x's 64 MiB physical VMEM


# --------------------------------------------------------------------------- kernels
def _conv_stats_kernel(win_ref, w_ref, scale_ref, shift_ref, y_ref, stats_ref,
                       *, th, w_out, preact):
    """One (batch, row-block) tile: [optional fused BN+ReLU pre-act] -> 3x3 conv -> stats.

    win_ref  : (th+2, W+2, Cin)  zero-padded input row window incl. 1-row halo
    w_ref    : (9*Cin, Cout)     conv weight with (dy, dx, cin) flattened on axis 0
    scale_ref: (1, Cin)          previous layer's BN scale   (used iff preact)
    shift_ref: (1, Cin)          previous layer's BN shift   (used iff preact)
    y_ref    : (th, W, Cout)     raw (un-normalized) conv output tile
    stats_ref: (2, Cout)         per-tile [sum, sum_of_squares] over pixels
    """
    x = win_ref[...]

    if preact:
        # Fused BN+ReLU of the previous layer, applied once to the (th+2, W+2) window,
        # then re-zero the spatial padding ring (padding happens AFTER ReLU in the module).
        x = jnp.maximum(x * scale_ref[...] + shift_ref[...], 0.0)
        h_tile = pl.program_id(1)
        h_total = pl.num_programs(1) * th
        row = lax.broadcasted_iota(jnp.int32, (th + 2, w_out + 2, 1), 0) + h_tile * th
        col = lax.broadcasted_iota(jnp.int32, (th + 2, w_out + 2, 1), 1)
        interior = (row >= 1) & (row <= h_total) & (col >= 1) & (col <= w_out)
        x = jnp.where(interior, x, 0.0)

    # im2col inside the tile: one MXU matmul with K = 9*Cin.
    cols = []
    for dy in range(3):
        for dx in range(3):
            cols.append(x[dy:dy + th, dx:dx + w_out, :])
    patch = jnp.concatenate(cols, axis=-1)                      # (th, W, 9*Cin)
    patch = patch.reshape(th * w_out, patch.shape[-1])          # minor dim unchanged

    acc = jnp.dot(patch.astype(MATMUL_DTYPE), w_ref[...].astype(MATMUL_DTYPE),
                  preferred_element_type=jnp.float32)           # (th*W, Cout), f32 acc

    y_ref[...] = acc.reshape(th, w_out, y_ref.shape[-1])

    # One-pass partial BatchNorm statistics (sum and sum of squares).
    stats_ref[0:1, :] = jnp.sum(acc, axis=0, keepdims=True)
    stats_ref[1:2, :] = jnp.sum(acc * acc, axis=0, keepdims=True)


def _bn_relu_kernel(y_ref, scale_ref, shift_ref, o_ref):
    """Elementwise finalize: o = relu(y * scale + shift)."""
    o_ref[...] = jnp.maximum(y_ref[...] * scale_ref[...] + shift_ref[...], 0.0)


# --------------------------------------------------------------------------- wrappers
def _window_rows(xpad, th):
    """(N, H+2, W+2, C) -> (N, H//th, th+2, W+2, C): overlapping row windows with 1-row halo."""
    # TODO(synk): replace this wrapper-side gather with element-offset BlockSpecs or a manual
    # halo DMA so the input does not take an extra HBM pass.
    hp = xpad.shape[1]
    nht = (hp - 2) // th
    idx = (jnp.arange(nht) * th)[:, None] + jnp.arange(th + 2)[None, :]
    return jnp.take(xpad, idx, axis=1)


def _conv_with_stats(win, w2d, pre_scale, pre_shift, *, preact):
    n, nht, thp2, wp, cin = win.shape
    th, w = thp2 - 2, wp - 2
    cout = w2d.shape[-1]
    kernel = functools.partial(_conv_stats_kernel, th=th, w_out=w, preact=preact)
    return pl.pallas_call(
        kernel,
        grid=(n, nht),
        in_specs=(
            pl.BlockSpec((None, None, thp2, wp, cin), lambda i, j: (i, j, 0, 0, 0)),
            pl.BlockSpec((9 * cin, cout), lambda i, j: (0, 0)),
            pl.BlockSpec((1, cin), lambda i, j: (0, 0)),
            pl.BlockSpec((1, cin), lambda i, j: (0, 0)),
        ),
        out_specs=(
            pl.BlockSpec((None, th, w, cout), lambda i, j: (i, j, 0, 0)),
            pl.BlockSpec((None, None, 2, cout), lambda i, j: (i, j, 0, 0)),
        ),
        out_shape=(
            jax.ShapeDtypeStruct((n, nht * th, w, cout), jnp.float32),
            jax.ShapeDtypeStruct((n, nht, 2, cout), jnp.float32),
        ),
        compiler_params=pltpu.CompilerParams(
            dimension_semantics=("parallel", "parallel"),
            vmem_limit_bytes=_VMEM_LIMIT),
    )(win, w2d, pre_scale, pre_shift)


def _bn_relu(y, scale, shift, *, th):
    n, h, w, c = y.shape
    return pl.pallas_call(
        _bn_relu_kernel,
        grid=(n, h // th),
        in_specs=(
            pl.BlockSpec((None, th, w, c), lambda i, j: (i, j, 0, 0)),
            pl.BlockSpec((1, c), lambda i, j: (0, 0)),
            pl.BlockSpec((1, c), lambda i, j: (0, 0)),
        ),
        out_specs=pl.BlockSpec((None, th, w, c), lambda i, j: (i, j, 0, 0)),
        out_shape=jax.ShapeDtypeStruct((n, h, w, c), jnp.float32),
        compiler_params=pltpu.CompilerParams(
            dimension_semantics=("parallel", "parallel"),
            vmem_limit_bytes=_VMEM_LIMIT),
    )(y, scale, shift)


def _bn_affine(stats, gamma, beta, count):
    """Reduce per-tile [sum, sumsq] -> per-channel (scale, shift) for y*scale + shift."""
    s = jnp.sum(stats, axis=(0, 1))                 # (2, C)
    mean = s[0] / count
    var = s[1] / count - mean * mean                # biased variance (BN training normalization)
    scale = gamma * lax.rsqrt(var + EPS)
    shift = beta - mean * scale
    return scale[None, :], shift[None, :]


def _pick_tile_rows(h, target):
    th = min(target, h)
    while h % th:
        th -= 1
    return th


def double_conv(x_nchw, params, *, tile_rows=8):
    """DoubleConv.forward (training-mode BatchNorm): NCHW in, NCHW out."""
    x = jnp.transpose(x_nchw, (0, 2, 3, 1)).astype(jnp.float32)   # NHWC kept between stages
    n, h, w, cin = x.shape
    cout = params["w1"].shape[-1]
    th = _pick_tile_rows(h, tile_rows)
    count = n * h * w

    w1 = params["w1"].reshape(9 * cin, cout)
    w2 = params["w2"].reshape(9 * cout, cout)
    # Conv biases b1/b2 are intentionally dropped: train-mode BatchNorm subtracts the
    # per-channel batch mean, which cancels a per-channel bias exactly.

    # ---- layer 1: conv1 + per-tile stats ------------------------------------------
    win1 = _window_rows(jnp.pad(x, ((0, 0), (1, 1), (1, 1), (0, 0))), th)
    y1, st1 = _conv_with_stats(win1, w1,
                               jnp.ones((1, cin), jnp.float32),
                               jnp.zeros((1, cin), jnp.float32),
                               preact=False)
    scale1, shift1 = _bn_affine(st1, params["g1"], params["be1"], count)

    # ---- layer 2: (BN1 + ReLU1 fused) conv2 + per-tile stats ------------------------
    win2 = _window_rows(jnp.pad(y1, ((0, 0), (1, 1), (1, 1), (0, 0))), th)
    y2, st2 = _conv_with_stats(win2, w2, scale1, shift1, preact=True)
    scale2, shift2 = _bn_affine(st2, params["g2"], params["be2"], count)

    # ---- finalize: BN2 + ReLU2 ------------------------------------------------------
    z = _bn_relu(y2, scale2, shift2, th=th)
    return jnp.transpose(z, (0, 3, 1, 2))                          # NHWC -> NCHW


# --------------------------------------------------------------------------- reference
def _ref_conv_bn_relu(x_nhwc, w, b, gamma, beta):
    y = lax.conv_general_dilated(
        x_nhwc, w, window_strides=(1, 1), padding="SAME",
        dimension_numbers=("NHWC", "HWIO", "NHWC")) + b
    mean = jnp.mean(y, axis=(0, 1, 2), keepdims=True)
    var = jnp.mean((y - mean) ** 2, axis=(0, 1, 2), keepdims=True)
    y = (y - mean) * lax.rsqrt(var + EPS) * gamma + beta
    return jnp.maximum(y, 0.0)


def _ref_double_conv(x_nchw, p):
    x = jnp.transpose(x_nchw, (0, 2, 3, 1)).astype(jnp.float32)
    x = _ref_conv_bn_relu(x, p["w1"], p["b1"], p["g1"], p["be1"])
    x = _ref_conv_bn_relu(x, p["w2"], p["b2"], p["g2"], p["be2"])
    return jnp.transpose(x, (0, 3, 1, 2))


if __name__ == "__main__":
    N, C_IN, C_OUT, H, W = 2, 4, 8, 16, 16

    key = jax.random.PRNGKey(0)
    kx, kw1, kb1, kw2, kb2 = jax.random.split(key, 5)

    x = jax.random.normal(kx, (N, C_IN, H, W), dtype=jnp.float32)

    # PyTorch shapes: conv weight (Cout, Cin, 3, 3) is stored here as (3, 3, Cin, Cout);
    # BN gamma=1, beta=0 (fresh nn.BatchNorm2d).
    params = {
        "w1": 0.1 * jax.random.normal(kw1, (3, 3, C_IN, C_OUT), jnp.float32),
        "b1": 0.1 * jax.random.normal(kb1, (C_OUT,), jnp.float32),
        "g1": jnp.ones((C_OUT,), jnp.float32),
        "be1": jnp.zeros((C_OUT,), jnp.float32),
        "w2": 0.1 * jax.random.normal(kw2, (3, 3, C_OUT, C_OUT), jnp.float32),
        "b2": 0.1 * jax.random.normal(kb2, (C_OUT,), jnp.float32),
        "g2": jnp.ones((C_OUT,), jnp.float32),
        "be2": jnp.zeros((C_OUT,), jnp.float32),
    }

    out = jax.block_until_ready(jax.jit(double_conv)(x, params))
    ref = jax.block_until_ready(_ref_double_conv(x, params))

    assert out.shape == (N, C_OUT, H, W), out.shape
    assert jnp.allclose(out, ref, atol=1e-4, rtol=1e-4), float(
        jnp.max(jnp.abs(out - ref)))
    print("KERNEL_OK")
</pallas_src>

<mosaic_0001>
module attributes {stable_mosaic.version = 11 : i64} {
  func.func @_conv_stats_kernel(%arg0: i32, %arg1: i32, %arg2: memref<1x1x10x18x4xf32, #tpu.memory_space<vmem>>, %arg3: memref<36x8xf32, #tpu.memory_space<vmem>>, %arg4: memref<1x4xf32, #tpu.memory_space<vmem>>, %arg5: memref<1x4xf32, #tpu.memory_space<vmem>>, %arg6: memref<1x8x16x8xf32, #tpu.memory_space<vmem>>, %arg7: memref<1x1x2x8xf32, #tpu.memory_space<vmem>>) attributes {dimension_semantics = [#tpu.dimension_semantics<parallel>, #tpu.dimension_semantics<parallel>], iteration_bounds = array<i64: 2, 2>, scalar_prefetch = 0 : i64, scratch_operands = 0 : i64, tpu.core_type = #tpu.core_type<tc>, window_params = [{transform_indices = @transform_0, window_bounds = array<i64: 1, 1, 10, 18, 4>}, {pipeline_mode = #tpu.pipeline_mode<synchronous>, transform_indices = @transform_1, window_bounds = array<i64: 36, 8>}, {pipeline_mode = #tpu.pipeline_mode<synchronous>, transform_indices = @transform_2, window_bounds = array<i64: 1, 4>}, {pipeline_mode = #tpu.pipeline_mode<synchronous>, transform_indices = @transform_3, window_bounds = array<i64: 1, 4>}, {transform_indices = @transform_4, window_bounds = array<i64: 1, 8, 16, 8>}, {transform_indices = @transform_5, window_bounds = array<i64: 1, 1, 2, 8>}]} {
    %c0 = arith.constant 0 : index
    %c0_0 = arith.constant 0 : index
    %c0_1 = arith.constant 0 : index
    %c0_2 = arith.constant 0 : index
    %c0_3 = arith.constant 0 : index
    %0 = vector.load %arg2[%c0, %c0_0, %c0_1, %c0_2, %c0_3] : memref<1x1x10x18x4xf32, #tpu.memory_space<vmem>>, vector<1x1x10x18x4xf32>
    %1 = vector.shape_cast %0 : vector<1x1x10x18x4xf32> to vector<10x18x4xf32>
    %2 = vector.extract_strided_slice %1 {offsets = [0, 0, 0], sizes = [8, 16, 4], strides = [1, 1, 1]} : vector<10x18x4xf32> to vector<8x16x4xf32>
    %3 = vector.extract_strided_slice %1 {offsets = [0, 1, 0], sizes = [8, 16, 4], strides = [1, 1, 1]} : vector<10x18x4xf32> to vector<8x16x4xf32>
    %4 = vector.extract_strided_slice %1 {offsets = [0, 2, 0], sizes = [8, 16, 4], strides = [1, 1, 1]} : vector<10x18x4xf32> to vector<8x16x4xf32>
    %5 = vector.extract_strided_slice %1 {offsets = [1, 0, 0], sizes = [8, 16, 4], strides = [1, 1, 1]} : vector<10x18x4xf32> to vector<8x16x4xf32>
    %6 = vector.extract_strided_slice %1 {offsets = [1, 1, 0], sizes = [8, 16, 4], strides = [1, 1, 1]} : vector<10x18x4xf32> to vector<8x16x4xf32>
    %7 = vector.extract_strided_slice %1 {offsets = [1, 2, 0], sizes = [8, 16, 4], strides = [1, 1, 1]} : vector<10x18x4xf32> to vector<8x16x4xf32>
    %8 = vector.extract_strided_slice %1 {offsets = [2, 0, 0], sizes = [8, 16, 4], strides = [1, 1, 1]} : vector<10x18x4xf32> to vector<8x16x4xf32>
    %9 = vector.extract_strided_slice %1 {offsets = [2, 1, 0], sizes = [8, 16, 4], strides = [1, 1, 1]} : vector<10x18x4xf32> to vector<8x16x4xf32>
    %10 = vector.extract_strided_slice %1 {offsets = [2, 2, 0], sizes = [8, 16, 4], strides = [1, 1, 1]} : vector<10x18x4xf32> to vector<8x16x4xf32>
    %11 = tpu.concatenate %2, %3, %4, %5, %6, %7, %8, %9, %10 in 2 : vector<8x16x4xf32>, vector<8x16x4xf32>, vector<8x16x4xf32>, vector<8x16x4xf32>, vector<8x16x4xf32>, vector<8x16x4xf32>, vector<8x16x4xf32>, vector<8x16x4xf32>, vector<8x16x4xf32> -> vector<8x16x36xf32>
    %12 = vector.shape_cast %11 : vector<8x16x36xf32> to vector<128x36xf32>
    %c0_4 = arith.constant 0 : index
    %c0_5 = arith.constant 0 : index
    %13 = vector.load %arg3[%c0_4, %c0_5] : memref<36x8xf32, #tpu.memory_space<vmem>>, vector<36x8xf32>
    %cst = arith.constant dense<0.000000e+00> : vector<128x8xf32>
    %14 = tpu.matmul %12, %13, %cst {dimension_numbers = #tpu.dot_dimension_numbers<[1], [0], [0], [1], [0, 0, 1, 1], [], []>} : vector<128x36xf32>, vector<36x8xf32>, vector<128x8xf32> -> vector<128x8xf32>
    %15 = vector.shape_cast %14 : vector<128x8xf32> to vector<8x16x8xf32>
    %c0_6 = arith.constant 0 : index
    %c0_7 = arith.constant 0 : index
    %c0_8 = arith.constant 0 : index
    %c0_9 = arith.constant 0 : index
    %16 = vector.load %arg6[%c0_6, %c0_7, %c0_8, %c0_9] : memref<1x8x16x8xf32, #tpu.memory_space<vmem>>, vector<1x8x16x8xf32>
    %17 = vector.shape_cast %16 : vector<1x8x16x8xf32> to vector<8x16x8xf32>
    %18 = vector.shape_cast %15 : vector<8x16x8xf32> to vector<1x8x16x8xf32>
    tpu.vector_store %arg6[%c0_6, %c0_7, %c0_8, %c0_9], %18 {strides = array<i32>} : memref<1x8x16x8xf32, #tpu.memory_space<vmem>>, vector<1x8x16x8xf32>,
    %cst_10 = arith.constant dense<0.000000e+00> : vector<8xf32>
    %19 = vector.multi_reduction <add>, %14, %cst_10 [0] : vector<128x8xf32> to vector<8xf32>
    %20 = vector.shape_cast %19 : vector<8xf32> to vector<1x8xf32>
    %c0_11 = arith.constant 0 : index
    %c0_12 = arith.constant 0 : index
    %c0_13 = arith.constant 0 : index
    %c0_14 = arith.constant 0 : index
    %21 = vector.load %arg7[%c0_11, %c0_12, %c0_13, %c0_14] : memref<1x1x2x8xf32, #tpu.memory_space<vmem>>, vector<1x1x1x8xf32>
    %22 = vector.shape_cast %21 : vector<1x1x1x8xf32> to vector<1x8xf32>
    %23 = vector.shape_cast %20 : vector<1x8xf32> to vector<1x1x1x8xf32>
    tpu.vector_store %arg7[%c0_11, %c0_12, %c0_13, %c0_14], %23 {strides = array<i32>} : memref<1x1x2x8xf32, #tpu.memory_space<vmem>>, vector<1x1x1x8xf32>,
    %24 = arith.mulf %14, %14 : vector<128x8xf32>
    %cst_15 = arith.constant dense<0.000000e+00> : vector<8xf32>
    %25 = vector.multi_reduction <add>, %24, %cst_15 [0] : vector<128x8xf32> to vector<8xf32>
    %26 = vector.shape_cast %25 : vector<8xf32> to vector<1x8xf32>
    %c0_16 = arith.constant 0 : index
    %c0_17 = arith.constant 0 : index
    %c1 = arith.constant 1 : index
    %c0_18 = arith.constant 0 : index
    %27 = vector.load %arg7[%c0_16, %c0_17, %c1, %c0_18] : memref<1x1x2x8xf32, #tpu.memory_space<vmem>>, vector<1x1x1x8xf32>
    %28 = vector.shape_cast %27 : vector<1x1x1x8xf32> to vector<1x8xf32>
    %29 = vector.shape_cast %26 : vector<1x8xf32> to vector<1x1x1x8xf32>
    tpu.vector_store %arg7[%c0_16, %c0_17, %c1, %c0_18], %29 {strides = array<i32>} : memref<1x1x2x8xf32, #tpu.memory_space<vmem>>, vector<1x1x1x8xf32>,
    return
  }
  func.func @transform_0(%arg0: i32, %arg1: i32) -> (i32, i32, i32, i32, i32) {
    %c0_i32 = arith.constant 0 : i32
    %c0_i32_0 = arith.constant 0 : i32
    %c0_i32_1 = arith.constant 0 : i32
    %c0_i32_2 = arith.constant 0 : i32
    return %arg0, %arg1, %c0_i32, %c0_i32_0, %c0_i32_1 : i32, i32, i32, i32, i32
  }
  func.func @transform_1(%arg0: i32, %arg1: i32) -> (i32, i32) {
    %c0_i32 = arith.constant 0 : i32
    %c0_i32_0 = arith.constant 0 : i32
    %c0_i32_1 = arith.constant 0 : i32
    return %c0_i32, %c0_i32_0 : i32, i32
  }
  func.func @transform_2(%arg0: i32, %arg1: i32) -> (i32, i32) {
    %c0_i32 = arith.constant 0 : i32
    %c0_i32_0 = arith.constant 0 : i32
    %c0_i32_1 = arith.constant 0 : i32
    return %c0_i32, %c0_i32_0 : i32, i32
  }
  func.func @transform_3(%arg0: i32, %arg1: i32) -> (i32, i32) {
    %c0_i32 = arith.constant 0 : i32
    %c0_i32_0 = arith.constant 0 : i32
    %c0_i32_1 = arith.constant 0 : i32
    return %c0_i32, %c0_i32_0 : i32, i32
  }
  func.func @transform_4(%arg0: i32, %arg1: i32) -> (i32, i32, i32, i32) {
    %c0_i32 = arith.constant 0 : i32
    %c0_i32_0 = arith.constant 0 : i32
    %c0_i32_1 = arith.constant 0 : i32
    return %arg0, %arg1, %c0_i32, %c0_i32_0 : i32, i32, i32, i32
  }
  func.func @transform_5(%arg0: i32, %arg1: i32) -> (i32, i32, i32, i32) {
    %c0_i32 = arith.constant 0 : i32
    %c0_i32_0 = arith.constant 0 : i32
    %c0_i32_1 = arith.constant 0 : i32
    return %arg0, %arg1, %c0_i32, %c0_i32_0 : i32, i32, i32, i32
  }
}

module attributes {stable_mosaic.version = 11 : i64} {
  func.func @_bn_relu_kernel(%arg0: i32, %arg1: i32, %arg2: memref<1x8x16x8xf32, #tpu.memory_space<vmem>>, %arg3: memref<1x8xf32, #tpu.memory_space<vmem>>, %arg4: memref<1x8xf32, #tpu.memory_space<vmem>>, %arg5: memref<1x8x16x8xf32, #tpu.memory_space<vmem>>) attributes {dimension_semantics = [#tpu.dimension_semantics<parallel>, #tpu.dimension_semantics<parallel>], iteration_bounds = array<i64: 2, 2>, scalar_prefetch = 0 : i64, scratch_operands = 0 : i64, tpu.core_type = #tpu.core_type<tc>, window_params = [{transform_indices = @transform_0, window_bounds = array<i64: 1, 8, 16, 8>}, {pipeline_mode = #tpu.pipeline_mode<synchronous>, transform_indices = @transform_1, window_bounds = array<i64: 1, 8>}, {pipeline_mode = #tpu.pipeline_mode<synchronous>, transform_indices = @transform_2, window_bounds = array<i64: 1, 8>}, {transform_indices = @transform_3, window_bounds = array<i64: 1, 8, 16, 8>}]} {
    %c0 = arith.constant 0 : index
    %c0_0 = arith.constant 0 : index
    %c0_1 = arith.constant 0 : index
    %c0_2 = arith.constant 0 : index
    %0 = vector.load %arg2[%c0, %c0_0, %c0_1, %c0_2] : memref<1x8x16x8xf32, #tpu.memory_space<vmem>>, vector<1x8x16x8xf32>
    %1 = vector.shape_cast %0 : vector<1x8x16x8xf32> to vector<8x16x8xf32>
    %c0_3 = arith.constant 0 : index
    %c0_4 = arith.constant 0 : index
    %2 = vector.load %arg3[%c0_3, %c0_4] : memref<1x8xf32, #tpu.memory_space<vmem>>, vector<1x8xf32>
    %3 = vector.shape_cast %2 : vector<1x8xf32> to vector<1x1x8xf32>
    %4 = vector.broadcast %3 : vector<1x1x8xf32> to vector<8x16x8xf32>
    %5 = arith.mulf %1, %4 : vector<8x16x8xf32>
    %c0_5 = arith.constant 0 : index
    %c0_6 = arith.constant 0 : index
    %6 = vector.load %arg4[%c0_5, %c0_6] : memref<1x8xf32, #tpu.memory_space<vmem>>, vector<1x8xf32>
    %7 = vector.shape_cast %6 : vector<1x8xf32> to vector<1x1x8xf32>
    %8 = vector.broadcast %7 : vector<1x1x8xf32> to vector<8x16x8xf32>
    %9 = arith.addf %5, %8 : vector<8x16x8xf32>
    %cst = arith.constant 0.000000e+00 : f32
    %10 = vector.broadcast %cst : f32 to vector<8x16x8xf32>
    %11 = arith.maximumf %9, %10 : vector<8x16x8xf32>
    %c0_7 = arith.constant 0 : index
    %c0_8 = arith.constant 0 : index
    %c0_9 = arith.constant 0 : index
    %c0_10 = arith.constant 0 : index
    %12 = vector.load %arg5[%c0_7, %c0_8, %c0_9, %c0_10] : memref<1x8x16x8xf32, #tpu.memory_space<vmem>>, vector<1x8x16x8xf32>
    %13 = vector.shape_cast %12 : vector<1x8x16x8xf32> to vector<8x16x8xf32>
    %14 = vector.shape_cast %11 : vector<8x16x8xf32> to vector<1x8x16x8xf32>
    tpu.vector_store %arg5[%c0_7, %c0_8, %c0_9, %c0_10], %14 {strides = array<i32>} : memref<1x8x16x8xf32, #tpu.memory_space<vmem>>, vector<1x8x16x8xf32>,
    return
  }
  func.func @transform_0(%arg0: i32, %arg1: i32) -> (i32, i32, i32, i32) {
    %c0_i32 = arith.constant 0 : i32
    %c0_i32_0 = arith.constant 0 : i32
    %c0_i32_1 = arith.constant 0 : i32
    return %arg0, %arg1, %c0_i32, %c0_i32_0 : i32, i32, i32, i32
  }
  func.func @transform_1(%arg0: i32, %arg1: i32) -> (i32, i32) {
    %c0_i32 = arith.constant 0 : i32
    %c0_i32_0 = arith.constant 0 : i32
    %c0_i32_1 = arith.constant 0 : i32
    return %c0_i32, %c0_i32_0 : i32, i32
  }
  func.func @transform_2(%arg0: i32, %arg1: i32) -> (i32, i32) {
    %c0_i32 = arith.constant 0 : i32
    %c0_i32_0 = arith.constant 0 : i32
    %c0_i32_1 = arith.constant 0 : i32
    return %c0_i32, %c0_i32_0 : i32, i32
  }
  func.func @transform_3(%arg0: i32, %arg1: i32) -> (i32, i32, i32, i32) {
    %c0_i32 = arith.constant 0 : i32
    %c0_i32_0 = arith.constant 0 : i32
    %c0_i32_1 = arith.constant 0 : i32
    return %arg0, %arg1, %c0_i32, %c0_i32_0 : i32, i32, i32, i32
  }
}

module attributes {stable_mosaic.version = 11 : i64} {
  func.func @_conv_stats_kernel(%arg0: i32, %arg1: i32, %arg2: memref<1x1x10x18x8xf32, #tpu.memory_space<vmem>>, %arg3: memref<72x8xf32, #tpu.memory_space<vmem>>, %arg4: memref<1x8xf32, #tpu.memory_space<vmem>>, %arg5: memref<1x8xf32, #tpu.memory_space<vmem>>, %arg6: memref<1x8x16x8xf32, #tpu.memory_space<vmem>>, %arg7: memref<1x1x2x8xf32, #tpu.memory_space<vmem>>) attributes {dimension_semantics = [#tpu.dimension_semantics<parallel>, #tpu.dimension_semantics<parallel>], iteration_bounds = array<i64: 2, 2>, scalar_prefetch = 0 : i64, scratch_operands = 0 : i64, tpu.core_type = #tpu.core_type<tc>, window_params = [{transform_indices = @transform_0, window_bounds = array<i64: 1, 1, 10, 18, 8>}, {pipeline_mode = #tpu.pipeline_mode<synchronous>, transform_indices = @transform_1, window_bounds = array<i64: 72, 8>}, {pipeline_mode = #tpu.pipeline_mode<synchronous>, transform_indices = @transform_2, window_bounds = array<i64: 1, 8>}, {pipeline_mode = #tpu.pipeline_mode<synchronous>, transform_indices = @transform_3, window_bounds = array<i64: 1, 8>}, {transform_indices = @transform_4, window_bounds = array<i64: 1, 8, 16, 8>}, {transform_indices = @transform_5, window_bounds = array<i64: 1, 1, 2, 8>}]} {
    %c0 = arith.constant 0 : index
    %c0_0 = arith.constant 0 : index
    %c0_1 = arith.constant 0 : index
    %c0_2 = arith.constant 0 : index
    %c0_3 = arith.constant 0 : index
    %0 = vector.load %arg2[%c0, %c0_0, %c0_1, %c0_2, %c0_3] : memref<1x1x10x18x8xf32, #tpu.memory_space<vmem>>, vector<1x1x10x18x8xf32>
    %1 = vector.shape_cast %0 : vector<1x1x10x18x8xf32> to vector<10x18x8xf32>
    %c0_4 = arith.constant 0 : index
    %c0_5 = arith.constant 0 : index
    %2 = vector.load %arg4[%c0_4, %c0_5] : memref<1x8xf32, #tpu.memory_space<vmem>>, vector<1x8xf32>
    %3 = vector.shape_cast %2 : vector<1x8xf32> to vector<1x1x8xf32>
    %4 = vector.broadcast %3 : vector<1x1x8xf32> to vector<10x18x8xf32>
    %5 = arith.mulf %1, %4 : vector<10x18x8xf32>
    %c0_6 = arith.constant 0 : index
    %c0_7 = arith.constant 0 : index
    %6 = vector.load %arg5[%c0_6, %c0_7] : memref<1x8xf32, #tpu.memory_space<vmem>>, vector<1x8xf32>
    %7 = vector.shape_cast %6 : vector<1x8xf32> to vector<1x1x8xf32>
    %8 = vector.broadcast %7 : vector<1x1x8xf32> to vector<10x18x8xf32>
    %9 = arith.addf %5, %8 : vector<10x18x8xf32>
    %cst = arith.constant 0.000000e+00 : f32
    %10 = vector.broadcast %cst : f32 to vector<10x18x8xf32>
    %11 = arith.maximumf %9, %10 : vector<10x18x8xf32>
    %12 = tpu.iota {dimensions = array<i32: 0>} : vector<10x18x1xi32>
    %c8_i32 = arith.constant 8 : i32
    %13 = arith.muli %arg1, %c8_i32 : i32
    %14 = vector.broadcast %13 : i32 to vector<10x18x1xi32>
    %15 = arith.addi %12, %14 : vector<10x18x1xi32>
    %16 = tpu.iota {dimensions = array<i32: 1>} : vector<10x18x1xi32>
    %c1_i32 = arith.constant 1 : i32
    %17 = vector.broadcast %c1_i32 : i32 to vector<10x18x1xi32>
    %18 = arith.cmpi sge, %15, %17 : vector<10x18x1xi32>
    %c16_i32 = arith.constant 16 : i32
    %19 = vector.broadcast %c16_i32 : i32 to vector<10x18x1xi32>
    %20 = arith.cmpi sle, %15, %19 : vector<10x18x1xi32>
    %21 = arith.andi %18, %20 : vector<10x18x1xi1>
    %c1_i32_8 = arith.constant 1 : i32
    %22 = vector.broadcast %c1_i32_8 : i32 to vector<10x18x1xi32>
    %23 = arith.cmpi sge, %16, %22 : vector<10x18x1xi32>
    %24 = arith.andi %21, %23 : vector<10x18x1xi1>
    %c16_i32_9 = arith.constant 16 : i32
    %25 = vector.broadcast %c16_i32_9 : i32 to vector<10x18x1xi32>
    %26 = arith.cmpi sle, %16, %25 : vector<10x18x1xi32>
    %27 = arith.andi %24, %26 : vector<10x18x1xi1>
    %cst_10 = arith.constant 0.000000e+00 : f32
    %28 = vector.shape_cast %27 : vector<10x18x1xi1> to vector<10x18x1xi1>
    %29 = vector.broadcast %28 : vector<10x18x1xi1> to vector<10x18x8xi1>
    %30 = vector.broadcast %cst_10 : f32 to vector<10x18x8xf32>
    %31 = arith.select %29, %11, %30 : vector<10x18x8xi1>, vector<10x18x8xf32>
    %32 = vector.extract_strided_slice %31 {offsets = [0, 0, 0], sizes = [8, 16, 8], strides = [1, 1, 1]} : vector<10x18x8xf32> to vector<8x16x8xf32>
    %33 = vector.extract_strided_slice %31 {offsets = [0, 1, 0], sizes = [8, 16, 8], strides = [1, 1, 1]} : vector<10x18x8xf32> to vector<8x16x8xf32>
    %34 = vector.extract_strided_slice %31 {offsets = [0, 2, 0], sizes = [8, 16, 8], strides = [1, 1, 1]} : vector<10x18x8xf32> to vector<8x16x8xf32>
    %35 = vector.extract_strided_slice %31 {offsets = [1, 0, 0], sizes = [8, 16, 8], strides = [1, 1, 1]} : vector<10x18x8xf32> to vector<8x16x8xf32>
    %36 = vector.extract_strided_slice %31 {offsets = [1, 1, 0], sizes = [8, 16, 8], strides = [1, 1, 1]} : vector<10x18x8xf32> to vector<8x16x8xf32>
    %37 = vector.extract_strided_slice %31 {offsets = [1, 2, 0], sizes = [8, 16, 8], strides = [1, 1, 1]} : vector<10x18x8xf32> to vector<8x16x8xf32>
    %38 = vector.extract_strided_slice %31 {offsets = [2, 0, 0], sizes = [8, 16, 8], strides = [1, 1, 1]} : vector<10x18x8xf32> to vector<8x16x8xf32>
    %39 = vector.extract_strided_slice %31 {offsets = [2, 1, 0], sizes = [8, 16, 8], strides = [1, 1, 1]} : vector<10x18x8xf32> to vector<8x16x8xf32>
    %40 = vector.extract_strided_slice %31 {offsets = [2, 2, 0], sizes = [8, 16, 8], strides = [1, 1, 1]} : vector<10x18x8xf32> to vector<8x16x8xf32>
    %41 = tpu.concatenate %32, %33, %34, %35, %36, %37, %38, %39, %40 in 2 : vector<8x16x8xf32>, vector<8x16x8xf32>, vector<8x16x8xf32>, vector<8x16x8xf32>, vector<8x16x8xf32>, vector<8x16x8xf32>, vector<8x16x8xf32>, vector<8x16x8xf32>, vector<8x16x8xf32> -> vector<8x16x72xf32>
    %42 = vector.shape_cast %41 : vector<8x16x72xf32> to vector<128x72xf32>
    %c0_11 = arith.constant 0 : index
    %c0_12 = arith.constant 0 : index
    %43 = vector.load %arg3[%c0_11, %c0_12] : memref<72x8xf32, #tpu.memory_space<vmem>>, vector<72x8xf32>
    %cst_13 = arith.constant dense<0.000000e+00> : vector<128x8xf32>
    %44 = tpu.matmul %42, %43, %cst_13 {dimension_numbers = #tpu.dot_dimension_numbers<[1], [0], [0], [1], [0, 0, 1, 1], [], []>} : vector<128x72xf32>, vector<72x8xf32>, vector<128x8xf32> -> vector<128x8xf32>
    %45 = vector.shape_cast %44 : vector<128x8xf32> to vector<8x16x8xf32>
    %c0_14 = arith.constant 0 : index
    %c0_15 = arith.constant 0 : index
    %c0_16 = arith.constant 0 : index
    %c0_17 = arith.constant 0 : index
    %46 = vector.load %arg6[%c0_14, %c0_15, %c0_16, %c0_17] : memref<1x8x16x8xf32, #tpu.memory_space<vmem>>, vector<1x8x16x8xf32>
    %47 = vector.shape_cast %46 : vector<1x8x16x8xf32> to vector<8x16x8xf32>
    %48 = vector.shape_cast %45 : vector<8x16x8xf32> to vector<1x8x16x8xf32>
    tpu.vector_store %arg6[%c0_14, %c0_15, %c0_16, %c0_17], %48 {strides = array<i32>} : memref<1x8x16x8xf32, #tpu.memory_space<vmem>>, vector<1x8x16x8xf32>,
    %cst_18 = arith.constant dense<0.000000e+00> : vector<8xf32>
    %49 = vector.multi_reduction <add>, %44, %cst_18 [0] : vector<128x8xf32> to vector<8xf32>
    %50 = vector.shape_cast %49 : vector<8xf32> to vector<1x8xf32>
    %c0_19 = arith.constant 0 : index
    %c0_20 = arith.constant 0 : index
    %c0_21 = arith.constant 0 : index
    %c0_22 = arith.constant 0 : index
    %51 = vector.load %arg7[%c0_19, %c0_20, %c0_21, %c0_22] : memref<1x1x2x8xf32, #tpu.memory_space<vmem>>, vector<1x1x1x8xf32>
    %52 = vector.shape_cast %51 : vector<1x1x1x8xf32> to vector<1x8xf32>
    %53 = vector.shape_cast %50 : vector<1x8xf32> to vector<1x1x1x8xf32>
    tpu.vector_store %arg7[%c0_19, %c0_20, %c0_21, %c0_22], %53 {strides = array<i32>} : memref<1x1x2x8xf32, #tpu.memory_space<vmem>>, vector<1x1x1x8xf32>,
    %54 = arith.mulf %44, %44 : vector<128x8xf32>
    %cst_23 = arith.constant dense<0.000000e+00> : vector<8xf32>
    %55 = vector.multi_reduction <add>, %54, %cst_23 [0] : vector<128x8xf32> to vector<8xf32>
    %56 = vector.shape_cast %55 : vector<8xf32> to vector<1x8xf32>
    %c0_24 = arith.constant 0 : index
    %c0_25 = arith.constant 0 : index
    %c1 = arith.constant 1 : index
    %c0_26 = arith.constant 0 : index
    %57 = vector.load %arg7[%c0_24, %c0_25, %c1, %c0_26] : memref<1x1x2x8xf32, #tpu.memory_space<vmem>>, vector<1x1x1x8xf32>
    %58 = vector.shape_cast %57 : vector<1x1x1x8xf32> to vector<1x8xf32>
    %59 = vector.shape_cast %56 : vector<1x8xf32> to vector<1x1x1x8xf32>
    tpu.vector_store %arg7[%c0_24, %c0_25, %c1, %c0_26], %59 {strides = array<i32>} : memref<1x1x2x8xf32, #tpu.memory_space<vmem>>, vector<1x1x1x8xf32>,
    return
  }
  func.func @transform_0(%arg0: i32, %arg1: i32) -> (i32, i32, i32, i32, i32) {
    %c0_i32 = arith.constant 0 : i32
    %c0_i32_0 = arith.constant 0 : i32
    %c0_i32_1 = arith.constant 0 : i32
    %c0_i32_2 = arith.constant 0 : i32
    return %arg0, %arg1, %c0_i32, %c0_i32_0, %c0_i32_1 : i32, i32, i32, i32, i32
  }
  func.func @transform_1(%arg0: i32, %arg1: i32) -> (i32, i32) {
    %c0_i32 = arith.constant 0 : i32
    %c0_i32_0 = arith.constant 0 : i32
    %c0_i32_1 = arith.constant 0 : i32
    return %c0_i32, %c0_i32_0 : i32, i32
  }
  func.func @transform_2(%arg0: i32, %arg1: i32) -> (i32, i32) {
    %c0_i32 = arith.constant 0 : i32
    %c0_i32_0 = arith.constant 0 : i32
    %c0_i32_1 = arith.constant 0 : i32
    return %c0_i32, %c0_i32_0 : i32, i32
  }
  func.func @transform_3(%arg0: i32, %arg1: i32) -> (i32, i32) {
    %c0_i32 = arith.constant 0 : i32
    %c0_i32_0 = arith.constant 0 : i32
    %c0_i32_1 = arith.constant 0 : i32
    return %c0_i32, %c0_i32_0 : i32, i32
  }
  func.func @transform_4(%arg0: i32, %arg1: i32) -> (i32, i32, i32, i32) {
    %c0_i32 = arith.constant 0 : i32
    %c0_i32_0 = arith.constant 0 : i32
    %c0_i32_1 = arith.constant 0 : i32
    return %arg0, %arg1, %c0_i32, %c0_i32_0 : i32, i32, i32, i32
  }
  func.func @transform_5(%arg0: i32, %arg1: i32) -> (i32, i32, i32, i32) {
    %c0_i32 = arith.constant 0 : i32
    %c0_i32_0 = arith.constant 0 : i32
    %c0_i32_1 = arith.constant 0 : i32
    return %arg0, %arg1, %c0_i32, %c0_i32_0 : i32, i32, i32, i32
  }
}

</mosaic_0001>

<bundles_post_ra>
// kernel: double_conv.5
= control target key start
LH: loop header
LB: loop body
LE: loop exit
PB: predicated region body
PF: predicated region fallthrough
CT: control target
= control target key end

     0   :  { %s526_s12 = smov 0   ;;  %s528_s13 = smov 0   ;;  %s671_s0 = inlined_call_operand.vmem [shape: f32[2,16,16,8], index: 0, kind: input, shape index: {}]   ;;  %s672_s1 = inlined_call_operand.vmem [shape: f32[1,8], index: 1, kind: input, shape index: {}]   ;;  %s673_s2 = inlined_call_operand.vmem [shape: f32[1,8], index: 2, kind: input, shape index: {}]   ;;  %s674_s3 = inlined_call_operand.vmem [shape: f32[2,16,16,8], index: 3, kind: output, shape index: {}]  }
   0x1   :  { %s530_s14 = smov 0   ;;  %s532_s15 = smov 0  }
   0x2   :  { %s534_s16 = smov 0  }
   0x3 LB: > { %s22_s17 = sadd.s32 1, %s496_s14  ;;  %s25_s18 = sadd.s32 1, %s500_s15  ;;  %s504_s16 = sphi %s534_s16, %s13_s16   ;;  %s500_s15 = sphi %s532_s15, %s678_s15   ;;  %s496_s14 = sphi %s530_s14, %s677_s14   ;;  %s492_s13 = sphi %s528_s13, %s676_s13   ;;  %s488_s12 = sphi %s526_s12, %s675_s12  }
   0x4   : > { %p23_p0 = scmp.ge.s32.totalorder %s22_s17, 2  ;;  %p413_p1 = scmp.ge.s32.totalorder %s504_s16, 1 }
   0x5   : > { %p159_p2 = scmp.lt.s32.totalorder %s504_s16, 5 }
   0x6   : > { %s680_s17 = smov (%p23_p0, %s22_s17), 0  ;;  %s682_s18 = smov (!%p23_p0, %s25_s18), %s500_s15 }
   0x7   : > { %p160_p3 = pnand %p413_p1, %p159_p2  ;;  %p27_p4 = scmp.ge.s32.totalorder %s682_s18, 2 }
   0x8   : > { %s414_s19 = sshll.u32 (!%p160_p3), %s488_s12, 3  ;;  %p194_p5 = scmp.lt.s32.totalorder (!%p160_p3), %s492_s13, 1 }
   0x9   : > { %s684_s18 = smov (%p27_p4, %s682_s18), 0  ;;  %163 = sbr.rel (%p160_p3) target bundleno = 37 (0x25), region = 32 }
   0xa   : > { %p196_p6 = scmp.lt.s32.totalorder (!%p160_p3), %s414_s19, 15 }
   0xe   : > { %s686_s13 = smov (!%p194_p5, %s492_s13), 1  ;;  %s688_s19 = smov (!%p196_p6, %s414_s19), 15  ;;  %v559_v0 = vld [vmem:[%s672_s1] ss:$0 sm:$0xff]  ;;  %vm293_vm0 = vcmask 64512  }
   0xf   : > { %s416_s20 = sshll.u32 %s686_s13, 5  ;;  %s415_s21 = sshll.u32 %s688_s19, 1  ;;  %v569_v1 = vld [vmem:[%s673_s2] ss:$0 sm:$0xff] }
  0x10   : > { %s200_s22 = sadd.s32 %s416_s20, %s415_s21 }
  0x11   : > { %s417_s23 = sshll.u32 %s200_s22, 3 }
  0x12   : > { %s564_s28 = scalar_lea.vmem %s671_s0, %s417_s23  ;;  %s592_s6 = scalar_lea.vmem %s674_s3, %s417_s23 }
  0x13   : > { %v215_v2 = vld [vmem:[%s564_s28] sm:$0xff]  ;;  %v216_v3 = vld [vmem:[%s564_s28 + $0x8] sm:$0xff]  ;;  %v217_v4 = vld [vmem:[%s564_s28 + $0x10] sm:$0xff] }
  0x14   : > { %v238_v5 = vmul.f32 %v559_v0, %v215_v2  ;;  %v239_v6 = vmul.f32 %v559_v0, %v216_v3  ;;  %v240_v7 = vmul.f32 %v559_v0, %v217_v4  ;;  %v218_v8 = vld [vmem:[%s564_s28 + $0x18] sm:$0xff]  ;;  %v219_v9 = vld [vmem:[%s564_s28 + $0x20] sm:$0xff]  ;;  %v220_v10 = vld [vmem:[%s564_s28 + $0x28] sm:$0xff] }
  0x15   : > { %v241_v11 = vmul.f32 %v559_v0, %v218_v8  ;;  %v242_v12 = vmul.f32 %v559_v0, %v219_v9  ;;  %v243_v13 = vmul.f32 %v559_v0, %v220_v10  ;;  %v221_v14 = vld [vmem:[%s564_s28 + $0x30] sm:$0xff]  ;;  %v222_v15 = vld [vmem:[%s564_s28 + $0x38] sm:$0xff]  ;;  %v223_v24 = vld [vmem:[%s564_s28 + $0x40] sm:$0xff] }
  0x16   : > { %v261_v16 = vadd.f32 %v569_v1, %v238_v5  ;;  %v262_v17 = vadd.f32 %v569_v1, %v239_v6  ;;  %v263_v18 = vadd.f32 %v569_v1, %v240_v7  ;;  %v244_v19 = vmul.f32 %v559_v0, %v221_v14  ;;  %v224_v25 = vld [vmem:[%s564_s28 + $0x48] sm:$0xff]  ;;  %v225_v26 = vld [vmem:[%s564_s28 + $0x50] sm:$0xff]  ;;  %v226_v31 = vld [vmem:[%s564_s28 + $0x58] sm:$0xff] }
  0x17   : > { %v264_v20 = vadd.f32 %v569_v1, %v241_v11  ;;  %v265_v21 = vadd.f32 %v569_v1, %v242_v12  ;;  %v266_v22 = vadd.f32 %v569_v1, %v243_v13  ;;  %v245_v23 = vmul.f32 %v559_v0, %v222_v15  ;;  %v227_v32 = vld [vmem:[%s564_s28 + $0x60] sm:$0xff]  ;;  %v228_v33 = vld [vmem:[%s564_s28 + $0x68] sm:$0xff]  ;;  %v229_v38 = vld [vmem:[%s564_s28 + $0x70] sm:$0xff] }
  0x18   : > { %v277_v27 = vmax.f32 %v261_v16, 0.0  ;;  %v278_v28 = vmax.f32 %v262_v17, 0.0  ;;  %v279_v29 = vmax.f32 %v263_v18, 0.0  ;;  %v267_v30 = vadd.f32 %v569_v1, %v244_v19  ;;  %v230_v43 = vld [vmem:[%s564_s28 + $0x78] sm:$0xff] }
  0x19   : > { %v280_v34 = vmax.f32 %v264_v20, 0.0  ;;  %v281_v35 = vmax.f32 %v265_v21, 0.0  ;;  %v282_v36 = vmax.f32 %v266_v22, 0.0  ;;  %v268_v37 = vadd.f32 %v569_v1, %v245_v23 }
  0x1a   : > { %294 = vst.msk [vmem:[%s592_s6] sm:$0xff] %vm293_vm0, %v277_v27  ;;  %295 = vst.msk [vmem:[%s592_s6 + $0x8] sm:$0xff] %vm293_vm0, %v278_v28  ;;  %v283_v39 = vmax.f32 %v267_v30, 0.0  ;;  %v246_v40 = vmul.f32 %v559_v0, %v223_v24  ;;  %v247_v41 = vmul.f32 %v559_v0, %v224_v25  ;;  %v248_v42 = vmul.f32 %v559_v0, %v225_v26 }
  0x1b   : > { %296 = vst.msk [vmem:[%s592_s6 + $0x10] sm:$0xff] %vm293_vm0, %v279_v29  ;;  %297 = vst.msk [vmem:[%s592_s6 + $0x18] sm:$0xff] %vm293_vm0, %v280_v34  ;;  %v284_v44 = vmax.f32 %v268_v37, 0.0  ;;  %v249_v45 = vmul.f32 %v559_v0, %v226_v31  ;;  %v250_v46 = vmul.f32 %v559_v0, %v227_v32  ;;  %v251_v47 = vmul.f32 %v559_v0, %v228_v33 }
  0x1c   : > { %298 = vst.msk [vmem:[%s592_s6 + $0x20] sm:$0xff] %vm293_vm0, %v281_v35  ;;  %299 = vst.msk [vmem:[%s592_s6 + $0x28] sm:$0xff] %vm293_vm0, %v282_v36  ;;  %v269_v48 = vadd.f32 %v569_v1, %v246_v40  ;;  %v270_v49 = vadd.f32 %v569_v1, %v247_v41  ;;  %v271_v50 = vadd.f32 %v569_v1, %v248_v42 }
  0x1d   : > { %300 = vst.msk [vmem:[%s592_s6 + $0x30] sm:$0xff] %vm293_vm0, %v283_v39  ;;  %v252_v51 = vmul.f32 %v559_v0, %v229_v38  ;;  %301 = vst.msk [vmem:[%s592_s6 + $0x38] sm:$0xff] %vm293_vm0, %v284_v44  ;;  %v272_v52 = vadd.f32 %v569_v1, %v249_v45  ;;  %v273_v53 = vadd.f32 %v569_v1, %v250_v46 }
  0x1e   : > { %v274_v54 = vadd.f32 %v569_v1, %v251_v47  ;;  %v253_v55 = vmul.f32 %v559_v0, %v230_v43  ;;  %v285_v56 = vmax.f32 %v269_v48, 0.0  ;;  %v286_v57 = vmax.f32 %v270_v49, 0.0 }
  0x1f   : > { %v287_v58 = vmax.f32 %v271_v50, 0.0  ;;  %v275_v59 = vadd.f32 %v569_v1, %v252_v51  ;;  %v288_v60 = vmax.f32 %v272_v52, 0.0  ;;  %v289_v61 = vmax.f32 %v273_v53, 0.0 }
  0x20   : > { %v290_v62 = vmax.f32 %v274_v54, 0.0  ;;  %v276_v63 = vadd.f32 %v569_v1, %v253_v55  ;;  %302 = vst.msk [vmem:[%s592_s6 + $0x40] sm:$0xff] %vm293_vm0, %v285_v56  ;;  %303 = vst.msk [vmem:[%s592_s6 + $0x48] sm:$0xff] %vm293_vm0, %v286_v57 }
  0x21   : > { %304 = vst.msk [vmem:[%s592_s6 + $0x50] sm:$0xff] %vm293_vm0, %v287_v58  ;;  %v291_v2 = vmax.f32 %v275_v59, 0.0  ;;  %305 = vst.msk [vmem:[%s592_s6 + $0x58] sm:$0xff] %vm293_vm0, %v288_v60 }
  0x22   : > { %306 = vst.msk [vmem:[%s592_s6 + $0x60] sm:$0xff] %vm293_vm0, %v289_v61  ;;  %307 = vst.msk [vmem:[%s592_s6 + $0x68] sm:$0xff] %vm293_vm0, %v290_v62  ;;  %v292_v0 = vmax.f32 %v276_v63, 0.0 }
  0x23   : > { %308 = vst.msk [vmem:[%s592_s6 + $0x70] sm:$0xff] %vm293_vm0, %v291_v2 }
  0x24   : > { %309 = vst.msk [vmem:[%s592_s6 + $0x78] sm:$0xff] %vm293_vm0, %v292_v0 }
  0x25 PF: > { %s13_s16 = sadd.s32 1, %s504_s16   ;;  %s675_s12 = smov %s496_s14 }
  0x26   : > { %p10_p7 = scmp.ge.s32.totalorder %s13_s16, 6   ;;  %s676_s13 = smov %s500_s15 }
  0x27   : > { %s677_s14 = smov %s680_s17  ;;  %s678_s15 = smov %s684_s18 }
  0x28   :  { %12 = sbr.rel (!%p10_p7) target bundleno = 3 (0x3), region = 62 }

// kernel: double_conv.3
= control target key start
LH: loop header
LB: loop body
LE: loop exit
PB: predicated region body
PF: predicated region fallthrough
CT: control target
= control target key end

     0   :  { %s1649_s18 = smov 0   ;;  %s1651_s19 = smov 0   ;;  %s2338_s0 = inlined_call_operand.vmem [shape: f32[2,2,10,18,4], index: 0, kind: input, shape index: {}]   ;;  %s2339_s1 = inlined_call_operand.vmem [shape: f32[36,8], index: 1, kind: input, shape index: {}]   ;;  %s2340_s2 = inlined_call_operand.vmem [shape: f32[1,4], index: 2, kind: input, shape index: {}]   ;;  %s2341_s3 = inlined_call_operand.vmem [shape: f32[1,4], index: 3, kind: input, shape index: {}]   ;;  %s2342_s4 = inlined_call_operand.vmem [shape: f32[2,16,16,8], index: 4, kind: output, shape index: {0}]   ;;  %s2343_s5 = inlined_call_operand.vmem [shape: f32[2,2,2,8], index: 5, kind: output, shape index: {1}]  }
   0x1   :  { %s1653_s20 = smov 0   ;;  %s1655_s21 = smov 0  }
   0x2   :  { %s1657_s22 = smov 0  }
   0x3 LB: > { %s25_s2 = sadd.s32 1, %s1601_s20  ;;  %s28_s3 = sadd.s32 1, %s1605_s21  ;;  %s1609_s22 = sphi %s1657_s22, %s16_s22   ;;  %s1605_s21 = sphi %s1655_s21, %s2347_s21   ;;  %s1601_s20 = sphi %s1653_s20, %s2346_s20   ;;  %s1597_s19 = sphi %s1651_s19, %s2345_s19   ;;  %s1593_s18 = sphi %s1649_s18, %s2344_s18  }
   0x4   : > { %p26_p0 = scmp.ge.s32.totalorder %s25_s2, 2  ;;  %p1429_p1 = scmp.ge.s32.totalorder %s1609_s22, 1 }
   0x5   : > { %p212_p2 = scmp.lt.s32.totalorder %s1609_s22, 5 }
   0x6   : > { %s2349_s2 = smov (%p26_p0, %s25_s2), 0  ;;  %s2351_s3 = smov (!%p26_p0, %s28_s3), %s1605_s21 }
   0x7   : > { %p213_p3 = pnand %p1429_p1, %p212_p2  ;;  %p30_p4 = scmp.ge.s32.totalorder %s2351_s3, 2 }
   0x8   : > { %p257_p5 = scmp.lt.s32.totalorder (!%p213_p3), %s1597_s19, 1  ;;  %p259_p6 = scmp.lt.s32.totalorder (!%p213_p3), %s1593_s18, 1 }
   0x9   : > { %s2353_s3 = smov (%p30_p4, %s2351_s3), 0  ;;  %216 = sbr.rel (%p213_p3) target bundleno = 607 (0x25f), region = 36 }
   0xa   : > { %s1611_s6 = smov (!%p213_p3), 12   ;;  %s1612_s7 = smov (!%p213_p3), 8  }
   0xb   : > { %s1613_s8 = smov (!%p213_p3), 4   ;;  %s1614_s9 = smov (!%p213_p3), 16  }
   0xc   : > { %s1615_s10 = smov (!%p213_p3), 20   ;;  %s1616_s11 = smov (!%p213_p3), 24  }
   0xd   : > { %s1618_s29 = smov (!%p213_p3), 32  }
   0xe   : > { %s2355_s19 = smov (!%p257_p5, %s1597_s19), 1  ;;  %vm428_vm0 = vcmask 1045504   ;;  %vm339_vm1 = vcmask 1046528   ;;  %v971_v28 = vld [vmem:[%s2339_s1 + $0x20] sm:$0xf]  ;;  %vm1021_vm2 = vcmask 1043456  }
   0xf   : > { %s1685_s23 = scalar_select %p259_p6, %s1593_s18, 1  ;;  %1477 = vmatprep.subr.msk.mxu0 %vm1021_vm2, %v971_v28  ;;  %1511 = vmatprep.subr.msk.mxu1 %vm1021_vm2, %v971_v28  ;;  %v970_v31 = vld [vmem:[%s2339_s1 + $0x18] sm:$0xff]  ;;  %v969_v33 = vld [vmem:[%s2339_s1 + $0x10] sm:$0xff]  ;;  %v968_v35 = vld [vmem:[%s2339_s1 + $0x8] sm:$0xff]  ;;  %vm831_vm3 = vcmask 31744   ;;  %vm848_vm4 = vcmask 64512  }
  0x10   : > { %s1522_s24 = smul.u32 60, %s2355_s19  ;;  %1478 = vmatpush3.msk.msra.mxu0 %vm1021_vm2, %v971_v28  ;;  %1516 = vmatpush3.msk.msra.mxu1 %vm1021_vm2, %v971_v28  ;;  %v967_v39 = vld [vmem:[%s2339_s1] sm:$0xff]  ;;  %vm865_vm5 = vcmask 97280   ;;  %vm882_vm6 = vcmask 130048   ;;  %vm899_vm7 = vcmask 162816   ;;  %vm916_vm8 = vcmask 195584  }
  0x11   : > { %s1521_s25 = smul.u32 30, %s1685_s23  ;;  %1479 = vmatprep.subr.mxu0 %v970_v31  ;;  %1512 = vmatprep.subr.mxu1 %v970_v31  ;;  %vm933_vm9 = vcmask 228352   ;;  %vm950_vm10 = vcmask 261120   ;;  %vm972_vm11 = vcmask 293888   ;;  %s1435_s12 = sshll.u32 %s2355_s19, 1  ;;  %vm1223_vm12 = vcmask 57344  }
  0x12   : > { %1480 = vmatpush3.msra.mxu0 %v970_v31  ;;  %1517 = vmatpush3.msra.mxu1 %v970_v31  ;;  %s282_s13 = sadd.s32 %s1435_s12, %s1685_s23 }
  0x13   : > { %s263_s26 = sadd.s32 %s1522_s24, %s1521_s25  ;;  %1481 = vmatprep.subr.mxu0 %v969_v33  ;;  %1513 = vmatprep.subr.mxu1 %v969_v33  ;;  %s1436_s14 = sshll.u32 %s282_s13, 1 }
  0x14   : > { %s1430_s27 = sshll.u32 %s263_s26, 3  ;;  %s1617_s26 = smov 28   ;;  %1482 = vmatpush3.msra.mxu0 %v969_v33  ;;  %1518 = vmatpush3.msra.mxu1 %v969_v33 }
  0x15   : > { %s1692_s30 = scalar_lea.vmem %s2338_s0, %s1430_s27  ;;  %1483 = vmatprep.subr.mxu0 %v968_v35  ;;  %1514 = vmatprep.subr.mxu1 %v968_v35  ;;  %s284_s17 = scalar_lea.vmem %s2343_s5, %s1436_s14 }
  0x16   : > { %v1695_v0 = vld [vmem:[%s1692_s30 + $0x20] sm:$0xff]  ;;  %v1698_v1 = vld [vmem:[%s1692_s30 + $0x18] sm:$0xff]  ;;  %v1708_v3 = vld [vmem:[%s1692_s30 + $0x8] sm:$0xff]  ;;  %1484 = vmatpush3.msra.mxu0 %v968_v35  ;;  %1519 = vmatpush3.msra.mxu1 %v968_v35 }
  0x17   : > { %v1701_v2 = vld [vmem:[%s1692_s30] sm:$0xff]  ;;  %521 = vrot.lane.b32.xlu1 %v1695_v0, %s1611_s6  ;;  %519 = vrot.lane.b32.xlu0 %v1698_v1, %s1611_s6  ;;  %v287_v6 = vld [vmem:[%s1692_s30 + $0x10] sm:$0x3]  ;;  %v430_v7 = vrot.slane %v1708_v3, 2  ;;  %v341_v8 = vrot.slane %v1708_v3, 1  ;;  %v345_v15 = vrot.slane %v1698_v1, 1 }
  0x18   : > { %v429_v4 = vrot.slane %v1701_v2, 2  ;;  %v340_v5 = vrot.slane %v1701_v2, 1  ;;  %v432_v9 = vrot.slane %v287_v6, 2  ;;  %v343_v10 = vrot.slane %v287_v6, 1  ;;  %v290_v17 = vld [vmem:[%s1692_s30 + $0x28] sm:$0x3]  ;;  %1485 = vmatprep.subr.mxu0 %v967_v39  ;;  %1515 = vmatprep.subr.mxu1 %v967_v39 }
  0x19   : > { %v346_v16 = vrot.slane %v1695_v0, 1  ;;  %v434_v19 = vrot.slane %v1698_v1, 2  ;;  %v435_v20 = vrot.slane %v1695_v0, 2  ;;  %v348_v21 = vrot.slane %v290_v17, 1  ;;  %v1738_v25 = vld [vmem:[%s1692_s30 + $0x30] sm:$0xff]  ;;  %v1742_v27 = vld [vmem:[%s1692_s30 + $0x38] sm:$0xff]  ;;  %1486 = vmatpush3.msra.mxu0 %v967_v39  ;;  %1520 = vmatpush3.msra.mxu1 %v967_v39 }
  0x1a   : > { %v431_v11 = vsel %vm428_vm0, %v429_v4, %v430_v7  ;;  %v342_v12 = vsel %vm339_vm1, %v340_v5, %v341_v8  ;;  %v433_v13 = vsel %vm428_vm0, %v430_v7, %v432_v9  ;;  %v344_v14 = vsel %vm339_vm1, %v341_v8, %v343_v10  ;;  %v293_v34 = vld [vmem:[%s1692_s30 + $0x40] sm:$0x3]  ;;  %v1789_v44 = vld [vmem:[%s1692_s30 + $0x48] sm:$0xff]  ;;  %v1792_v45 = vld [vmem:[%s1692_s30 + $0x50] sm:$0xff] }
  0x1b   : > { %469 = vrot.lane.b32.xlu1 %v431_v11, %s1612_s7  ;;  %380 = vrot.lane.b32.xlu0 %v342_v12, %s1613_s8  ;;  %v347_v18 = vsel %vm339_vm1, %v345_v15, %v346_v16  ;;  %v436_v22 = vsel %vm428_vm0, %v434_v19, %v435_v20  ;;  %v349_v23 = vsel %vm339_vm1, %v346_v16, %v348_v21  ;;  %v437_v24 = vrot.slane %v290_v17, 2  ;;  %v296_v49 = vld [vmem:[%s1692_s30 + $0x58] sm:$0x3]  ;;  %v1824_v57 = vld [vmem:[%s1692_s30 + $0x60] sm:$0xff] }
  0x1c   : > { %v350_v29 = vrot.slane %v1738_v25, 1  ;;  %v351_v30 = vrot.slane %v1742_v27, 1  ;;  %v439_v36 = vrot.slane %v1738_v25, 2  ;;  %v440_v37 = vrot.slane %v1742_v27, 2  ;;  %v1827_v58 = vld [vmem:[%s1692_s30 + $0x68] sm:$0xff]  ;;  %v1861_v12 = vld [vmem:[%s1692_s30 + $0x78] sm:$0xff] }
  0x1d   : > { %v438_v26 = vsel %vm428_vm0, %v435_v20, %v437_v24  ;;  %v353_v38 = vrot.slane %v293_v34, 1  ;;  %v442_v42 = vrot.slane %v293_v34, 2  ;;  %v355_v46 = vrot.slane %v1789_v44, 1  ;;  %v299_v62 = vld [vmem:[%s1692_s30 + $0x70] sm:$0x3]  ;;  %v1864_v15 = vld [vmem:[%s1692_s30 + $0x80] sm:$0xff] }
  0x1e   : > { %v352_v32 = vsel %vm339_vm1, %v350_v29, %v351_v30  ;;  %v441_v40 = vsel %vm428_vm0, %v439_v36, %v440_v37  ;;  %v356_v47 = vrot.slane %v1792_v45, 1  ;;  %v444_v50 = vrot.slane %v1789_v44, 2 }
  0x1f   : > { %471 = vrot.lane.b32.xlu1 %v433_v13, %s1612_s7  ;;  %382 = vrot.lane.b32.xlu0 %v344_v14, %s1613_s8  ;;  %v354_v41 = vsel %vm339_vm1, %v351_v30, %v353_v38  ;;  %v443_v43 = vsel %vm428_vm0, %v440_v37, %v442_v42  ;;  %v445_v51 = vrot.slane %v1792_v45, 2  ;;  %v358_v52 = vrot.slane %v296_v49, 1 }
  0x20   : > { %v357_v48 = vsel %vm339_vm1, %v355_v46, %v356_v47  ;;  %v447_v55 = vrot.slane %v296_v49, 2  ;;  %v360_v59 = vrot.slane %v1824_v57, 1  ;;  %v361_v60 = vrot.slane %v1827_v58, 1 }
  0x21   : > { %v446_v53 = vsel %vm428_vm0, %v444_v50, %v445_v51  ;;  %v359_v54 = vsel %vm339_vm1, %v356_v47, %v358_v52  ;;  %v449_v63 = vrot.slane %v1824_v57, 2  ;;  %v450_v4 = vrot.slane %v1827_v58, 2  ;;  %v1911_v47 = vld [vmem:[%s1692_s30 + $0x90] sm:$0xff]  ;;  %v1919_v50 = vld [vmem:[%s1692_s30 + $0x98] sm:$0xff] }
  0x22   : > { %v448_v56 = vsel %vm428_vm0, %v445_v51, %v447_v55  ;;  %v362_v61 = vsel %vm339_vm1, %v360_v59, %v361_v60  ;;  %v363_v5 = vrot.slane %v299_v62, 1  ;;  %v452_v8 = vrot.slane %v299_v62, 2 }
  0x23   : > { %384 = vrot.lane.b32.xlu1 %v347_v18, %s1613_s8  ;;  %573 = vrot.lane.b32.xlu0 %v347_v18, %s1614_s9  ;;  %v451_v6 = vsel %vm428_vm0, %v449_v63, %v450_v4  ;;  %v365_v16 = vrot.slane %v1861_v12, 1  ;;  %v366_v17 = vrot.slane %v1864_v15, 1  ;;  %v454_v24 = vrot.slane %v1861_v12, 2 }
  0x24   : > { %v364_v7 = vsel %vm339_vm1, %v361_v60, %v363_v5  ;;  %v453_v9 = vsel %vm428_vm0, %v450_v4, %v452_v8  ;;  %v370_v55 = vrot.slane %v1911_v47, 1 }
  0x25   : > { %v367_v20 = vsel %vm339_vm1, %v365_v16, %v366_v17 }
  0x27   : > { %626 = vrot.lane.b32.xlu1 %v436_v22, %s1615_s10  ;;  %575 = vrot.lane.b32.xlu0 %v349_v23, %s1614_s9 }
  0x2b   : > { %473 = vrot.lane.b32.xlu1 %v436_v22, %s1612_s7  ;;  %386 = vrot.lane.b32.xlu0 %v349_v23, %s1613_s8  ;;  %v302_v23 = vld [vmem:[%s1692_s30 + $0x88] sm:$0x3] }
  0x2c   : > { %v368_v28 = vrot.slane %v302_v23, 1  ;;  %v457_v35 = vrot.slane %v302_v23, 2 }
  0x2f   : > { %676 = vrot.lane.b32.xlu1 %v1738_v25, %s1616_s11  ;;  %628 = vrot.lane.b32.xlu0 %v438_v26, %s1615_s10 }
  0x33   : > { %523 = vrot.lane.b32.xlu1 %v1738_v25, %s1611_s6  ;;  %475 = vrot.lane.b32.xlu0 %v438_v26, %s1612_s7  ;;  %v455_v26 = vrot.slane %v1864_v15, 2 }
  0x35   : > { %v456_v31 = vsel %vm428_vm0, %v454_v24, %v455_v26  ;;  %v458_v38 = vsel %vm428_vm0, %v455_v26, %v457_v35 }
  0x37   : > { %730 = vrot.lane.b32.xlu1 %v352_v32, %s1617_s26  ;;  %678 = vrot.lane.b32.xlu0 %v1742_v27, %s1616_s11 }
  0x3b   : > { %577 = vrot.lane.b32.xlu1 %v352_v32, %s1614_s9  ;;  %525 = vrot.lane.b32.xlu0 %v1742_v27, %s1611_s6 }
  0x3f   : > { %783 = vrot.lane.b32.xlu1 %v441_v40, %s1618_s29  ;;  %732 = vrot.lane.b32.xlu0 %v354_v41, %s1617_s26 }
  0x43   : > { %579 = vrot.lane.b32.xlu1 %v354_v41, %s1614_s9  ;;  %388 = vrot.lane.b32.xlu0 %v352_v32, %s1613_s8  ;;  %v369_v32 = vsel %vm339_vm1, %v366_v17, %v368_v28 }
  0x47   : > { %785 = vrot.lane.b32.xlu1 %v443_v43, %s1618_s29  ;;  %630 = vrot.lane.b32.xlu0 %v441_v40, %s1615_s10 }
  0x4b   : > { %477 = vrot.lane.b32.xlu1 %v441_v40, %s1612_s7  ;;  %390 = vrot.lane.b32.xlu0 %v354_v41, %s1613_s8 }
  0x4f   : > { %680 = vrot.lane.b32.xlu1 %v1789_v44, %s1616_s11  ;;  %632 = vrot.lane.b32.xlu0 %v443_v43, %s1615_s10 }
  0x53   : > { %527 = vrot.lane.b32.xlu1 %v1789_v44, %s1611_s6  ;;  %479 = vrot.lane.b32.xlu0 %v443_v43, %s1612_s7 }
  0x57   : > { %734 = vrot.lane.b32.xlu1 %v357_v48, %s1617_s26  ;;  %682 = vrot.lane.b32.xlu0 %v1792_v45, %s1616_s11 }
  0x5b   : > { %581 = vrot.lane.b32.xlu1 %v357_v48, %s1614_s9  ;;  %529 = vrot.lane.b32.xlu0 %v1792_v45, %s1611_s6 }
  0x5f   : > { %787 = vrot.lane.b32.xlu1 %v446_v53, %s1618_s29  ;;  %736 = vrot.lane.b32.xlu0 %v359_v54, %s1617_s26 }
  0x63   : > { %583 = vrot.lane.b32.xlu1 %v359_v54, %s1614_s9  ;;  %392 = vrot.lane.b32.xlu0 %v357_v48, %s1613_s8 }
  0x67   : > { %789 = vrot.lane.b32.xlu1 %v448_v56, %s1618_s29  ;;  %634 = vrot.lane.b32.xlu0 %v446_v53, %s1615_s10 }
  0x6b   : > { %481 = vrot.lane.b32.xlu1 %v446_v53, %s1612_s7  ;;  %394 = vrot.lane.b32.xlu0 %v359_v54, %s1613_s8 }
  0x6f   : > { %684 = vrot.lane.b32.xlu1 %v1824_v57, %s1616_s11  ;;  %636 = vrot.lane.b32.xlu0 %v448_v56, %s1615_s10 }
  0x73   : > { %531 = vrot.lane.b32.xlu1 %v1824_v57, %s1611_s6  ;;  %483 = vrot.lane.b32.xlu0 %v448_v56, %s1612_s7  ;;  %v371_v56 = vrot.slane %v1919_v50, 1 }
  0x75   : > { %v372_v63 = vsel %vm339_vm1, %v370_v55, %v371_v56 }
  0x77   : > { %738 = vrot.lane.b32.xlu1 %v362_v61, %s1617_s26  ;;  %686 = vrot.lane.b32.xlu0 %v1827_v58, %s1616_s11 }
  0x7b   : > { %585 = vrot.lane.b32.xlu1 %v362_v61, %s1614_s9  ;;  %533 = vrot.lane.b32.xlu0 %v1827_v58, %s1611_s6 }
  0x7f   : > { %791 = vrot.lane.b32.xlu1 %v451_v6, %s1618_s29  ;;  %740 = vrot.lane.b32.xlu0 %v364_v7, %s1617_s26 }
  0x83   : > { %587 = vrot.lane.b32.xlu1 %v364_v7, %s1614_s9  ;;  %396 = vrot.lane.b32.xlu0 %v362_v61, %s1613_s8 }
  0x87   : > { %793 = vrot.lane.b32.xlu1 %v453_v9, %s1618_s29  ;;  %638 = vrot.lane.b32.xlu0 %v451_v6, %s1615_s10 }
  0x89   : > { %v1856_v10 = vpop.permute.xlu1 %521  ;;  %v520_v11 = vpop.permute.xlu0 %519 }
  0x8b   : > { %485 = vrot.lane.b32.xlu1 %v451_v6, %s1612_s7  ;;  %398 = vrot.lane.b32.xlu0 %v364_v7, %s1613_s8  ;;  %v305_v7 = vld [vmem:[%s1692_s30 + $0xa0] sm:$0x3] }
  0x8c   : > { %v462_v26 = vrot.slane %v305_v7, 2 }
  0x8d   : > { %v470_v13 = vpop.permute.xlu1 %469  ;;  %v381_v14 = vpop.permute.xlu0 %380 }
  0x8e   : > { %v832_v41 = vsel %vm831_vm3, %v1701_v2, %v381_v14  ;;  %v373_v14 = vrot.slane %v305_v7, 1 }
  0x8f   : > { %688 = vrot.lane.b32.xlu1 %v1861_v12, %s1616_s11  ;;  %640 = vrot.lane.b32.xlu0 %v453_v9, %s1615_s10  ;;  %v849_v46 = vsel %vm848_vm4, %v832_v41, %v470_v13  ;;  %v459_v13 = vrot.slane %v1911_v47, 2  ;;  %v1986_v41 = vld [vmem:[%s1692_s30 + $0xa8] sm:$0xff] }
  0x90   : > { %v866_v2 = vsel %vm865_vm5, %v849_v46, %v520_v11 }
  0x91   : > { %v1871_v18 = vpop.permute.xlu1 %471  ;;  %v383_v19 = vpop.permute.xlu0 %382 }
  0x92   : > { %v833_v52 = vsel %vm831_vm3, %v1708_v3, %v383_v19 }
  0x93   : > { %535 = vrot.lane.b32.xlu1 %v1861_v12, %s1611_s6  ;;  %487 = vrot.lane.b32.xlu0 %v453_v9, %s1612_s7  ;;  %v850_v3 = vsel %vm848_vm4, %v833_v52, %v1871_v18 }
  0x94   : > { %v867_v4 = vsel %vm865_vm5, %v850_v3, %v1856_v10  ;;  %v460_v10 = vrot.slane %v1919_v50, 2 }
  0x95   : > { %v1877_v21 = vpop.permute.xlu1 %384  ;;  %v574_v22 = vpop.permute.xlu0 %573 }
  0x96   : > { %v883_v51 = vsel %vm882_vm6, %v866_v2, %v574_v22  ;;  %v374_v22 = vsel %vm339_vm1, %v371_v56, %v373_v14  ;;  %v1995_v2 = vld [vmem:[%s1692_s30 + $0xb0] sm:$0xff] }
  0x97   : > { %742 = vrot.lane.b32.xlu1 %v367_v20, %s1617_s26  ;;  %690 = vrot.lane.b32.xlu0 %v1864_v15, %s1616_s11 }
  0x99   : > { %v627_v29 = vpop.permute.xlu1 %626  ;;  %v576_v30 = vpop.permute.xlu0 %575 }
  0x9a   : > { %v900_v53 = vsel %vm899_vm7, %v883_v51, %v627_v29  ;;  %v884_v8 = vsel %vm882_vm6, %v867_v4, %v576_v30  ;;  %v463_v30 = vsel %vm428_vm0, %v460_v10, %v462_v26  ;;  %v376_v51 = vrot.slane %v1995_v2, 1 }
  0x9b   : > { %589 = vrot.lane.b32.xlu1 %v367_v20, %s1614_s9  ;;  %537 = vrot.lane.b32.xlu0 %v1864_v15, %s1611_s6 }
  0x9d   : > { %v1890_v33 = vpop.permute.xlu1 %473  ;;  %v1892_v34 = vpop.permute.xlu0 %386 }
  0x9e   : > { %v835_v55 = vsel %vm831_vm3, %v1695_v0, %v1892_v34  ;;  %v308_v0 = vld [vmem:[%s1692_s30 + $0xb8] sm:$0x3] }
  0x9f   : > { %795 = vrot.lane.b32.xlu1 %v456_v31, %s1618_s29  ;;  %744 = vrot.lane.b32.xlu0 %v369_v32, %s1617_s26  ;;  %v378_v4 = vrot.slane %v308_v0, 1 }
  0xa1   : > { %v677_v36 = vpop.permute.xlu1 %676  ;;  %v629_v37 = vpop.permute.xlu0 %628 }
  0xa2   : > { %v917_v54 = vsel %vm916_vm8, %v900_v53, %v677_v36  ;;  %v901_v9 = vsel %vm899_vm7, %v884_v8, %v629_v37  ;;  %v834_v37 = vsel %vm831_vm3, %v1698_v1, %v1877_v21 }
  0xa3   : > { %591 = vrot.lane.b32.xlu1 %v369_v32, %s1614_s9  ;;  %400 = vrot.lane.b32.xlu0 %v367_v20, %s1613_s8  ;;  %v461_v20 = vsel %vm428_vm0, %v459_v13, %v460_v10  ;;  %v379_v13 = vsel %vm339_vm1, %v376_v51, %v378_v4 }
  0xa5   : > { %v1899_v39 = vpop.permute.xlu1 %523  ;;  %v1901_v40 = vpop.permute.xlu0 %475 }
  0xa6   : > { %v852_v56 = vsel %vm848_vm4, %v835_v55, %v1901_v40 }
  0xa7   : > { %797 = vrot.lane.b32.xlu1 %v458_v38, %s1618_s29  ;;  %642 = vrot.lane.b32.xlu0 %v456_v31, %s1615_s10 }
  0xa9   : > { %v731_v42 = vpop.permute.xlu1 %730  ;;  %v679_v43 = vpop.permute.xlu0 %678 }
  0xaa   : > { %v934_v59 = vsel %vm933_vm9, %v917_v54, %v731_v42  ;;  %v918_v11 = vsel %vm916_vm8, %v901_v9, %v679_v43 }
  0xab   : > { %489 = vrot.lane.b32.xlu1 %v456_v31, %s1612_s7  ;;  %402 = vrot.lane.b32.xlu0 %v369_v32, %s1613_s8 }
  0xad   : > { %v1914_v48 = vpop.permute.xlu1 %577  ;;  %v1916_v49 = vpop.permute.xlu0 %525 }
  0xaf   : > { %692 = vrot.lane.b32.xlu1 %v1911_v47, %s1616_s11  ;;  %644 = vrot.lane.b32.xlu0 %v458_v38, %s1615_s10 }
  0xb1   : > { %v784_v60 = vpop.permute.xlu1 %783  ;;  %v733_v61 = vpop.permute.xlu0 %732 }
  0xb2   : > { %v951_v62 = vsel %vm950_vm10, %v934_v59, %v784_v60  ;;  %v935_v16 = vsel %vm933_vm9, %v918_v11, %v733_v61  ;;  %v869_v60 = vsel %vm865_vm5, %v852_v56, %v1916_v49  ;;  %v465_v49 = vrot.slane %v1995_v2, 2  ;;  %v311_v56 = vld [vmem:[%s1692_s30 + $0xd0] sm:$0x3] }
  0xb3   : > { %539 = vrot.lane.b32.xlu1 %v1911_v47, %s1611_s6  ;;  %491 = vrot.lane.b32.xlu0 %v458_v38, %s1612_s7  ;;  %v851_v38 = vsel %vm848_vm4, %v834_v37, %v1890_v33 }
  0xb4   : > { %1487 = vmatprep.mubr.msk.f32.mxu0 %vm972_vm11, %v951_v62  ;;  %v868_v42 = vsel %vm865_vm5, %v851_v38, %v1899_v39  ;;  %v375_v39 = vrot.slane %v1986_v41, 1 }
  0xb5   : > { %v1942_v5 = vpop.permute.xlu1 %579  ;;  %v1944_v6 = vpop.permute.xlu0 %388  ;;  %v885_v1 = vsel %vm882_vm6, %v868_v42, %v1914_v48  ;;  %v310_v42 = vld [vmem:[%s1692_s30 + $0xc8] sm:$0xff] }
  0xb6   : > { %v377_v59 = vsel %vm339_vm1, %v375_v39, %v376_v51  ;;  %v886_v34 = vsel %vm882_vm6, %v869_v60, %v1942_v5  ;;  %v622_v60 = vrot.slane %v310_v42, 2 }
  0xb7   : > { %746 = vrot.lane.b32.xlu1 %v372_v63, %s1617_s26  ;;  %694 = vrot.lane.b32.xlu0 %v1919_v50, %s1616_s11 }
  0xb9   : > { %v786_v17 = vpop.permute.xlu1 %785  ;;  %v631_v18 = vpop.permute.xlu0 %630 }
  0xba   : > { %v952_v19 = vsel %vm950_vm10, %v935_v16, %v786_v17  ;;  %v902_v21 = vsel %vm899_vm7, %v885_v1, %v631_v18  ;;  %v467_v16 = vrot.slane %v308_v0, 2  ;;  %v571_v0 = vrot.slane %v311_v56, 1 }
  0xbb   : > { %593 = vrot.lane.b32.xlu1 %v372_v63, %s1614_s9  ;;  %541 = vrot.lane.b32.xlu0 %v1919_v50, %s1611_s6 }
  0xbc   : > { %1488 = vmatmul.mubr.msk.f32.vlgmr.msra.gmra.mxu0 %vm972_vm11, %v952_v19  ;;  %v468_v19 = vsel %vm428_vm0, %v465_v49, %v467_v16  ;;  %v313_v16 = vld [vmem:[%s1692_s30 + $0xe0] sm:$0xff] }
  0xbd   : > { %v1963_v23 = vpop.permute.xlu1 %477  ;;  %v1965_v24 = vpop.permute.xlu0 %390 }
  0xbf   : > { %799 = vrot.lane.b32.xlu1 %v461_v20, %s1618_s29  ;;  %748 = vrot.lane.b32.xlu0 %v374_v22, %s1617_s26 }
  0xc1   : > { %v681_v28 = vpop.permute.xlu1 %680  ;;  %v633_v29 = vpop.permute.xlu0 %632 }
  0xc2   : > { %v919_v33 = vsel %vm916_vm8, %v902_v21, %v681_v28  ;;  %v903_v62 = vsel %vm899_vm7, %v886_v34, %v633_v29  ;;  %v836_v29 = vsel %vm831_vm3, %v1738_v25, %v1944_v6  ;;  %v569_v21 = vrot.slane %v310_v42, 1 }
  0xc3   : > { %595 = vrot.lane.b32.xlu1 %v374_v22, %s1614_s9  ;;  %404 = vrot.lane.b32.xlu0 %v372_v63, %s1613_s8  ;;  %v464_v63 = vrot.slane %v1986_v41, 2 }
  0xc5   : > { %v1972_v31 = vpop.permute.xlu1 %527  ;;  %v1974_v32 = vpop.permute.xlu0 %479  ;;  %v466_v11 = vsel %vm428_vm0, %v464_v63, %v465_v49  ;;  %v572_v63 = vsel %vm339_vm1, %v569_v21, %v571_v0 }
  0xc7   : > { %801 = vrot.lane.b32.xlu1 %v463_v30, %s1618_s29  ;;  %646 = vrot.lane.b32.xlu0 %v461_v20, %s1615_s10 }
  0xc9   : > { %v735_v35 = vpop.permute.xlu1 %734  ;;  %v683_v36 = vpop.permute.xlu0 %682 }
  0xca   : > { %v936_v52 = vsel %vm933_vm9, %v919_v33, %v735_v35  ;;  %v920_v40 = vsel %vm916_vm8, %v903_v62, %v683_v36  ;;  %v309_v35 = vld [vmem:[%s1692_s30 + $0xc0] sm:$0xff] }
  0xcb   : > { %493 = vrot.lane.b32.xlu1 %v461_v20, %s1612_s7  ;;  %406 = vrot.lane.b32.xlu0 %v374_v22, %s1613_s8 }
  0xcd   : > { %v1990_v43 = vpop.permute.xlu1 %581  ;;  %v1992_v46 = vpop.permute.xlu0 %529 }
  0xcf   : > { %696 = vrot.lane.b32.xlu1 %v1986_v41, %s1616_s11  ;;  %648 = vrot.lane.b32.xlu0 %v463_v30, %s1615_s10 }
  0xd1   : > { %v788_v53 = vpop.permute.xlu1 %787  ;;  %v737_v54 = vpop.permute.xlu0 %736 }
  0xd2   : > { %v953_v48 = vsel %vm950_vm10, %v936_v52, %v788_v53  ;;  %v937_v7 = vsel %vm933_vm9, %v920_v40, %v737_v54 }
  0xd3   : > { %543 = vrot.lane.b32.xlu1 %v1986_v41, %s1611_s6  ;;  %495 = vrot.lane.b32.xlu0 %v463_v30, %s1612_s7  ;;  %v853_v30 = vsel %vm848_vm4, %v836_v29, %v1963_v23  ;;  %v568_v23 = vrot.slane %v309_v35, 1 }
  0xd4   : > { %1490 = vmatprep.mubr.msk.f32.mxu0 %vm972_vm11, %v953_v48  ;;  %v870_v36 = vsel %vm865_vm5, %v853_v30, %v1972_v31 }
  0xd5   : > { %v2020_v61 = vpop.permute.xlu1 %583  ;;  %v2022_v3 = vpop.permute.xlu0 %392  ;;  %v887_v1 = vsel %vm882_vm6, %v870_v36, %v1990_v43  ;;  %v837_v43 = vsel %vm831_vm3, %v1742_v27, %v1965_v24  ;;  %v570_v53 = vsel %vm339_vm1, %v568_v23, %v569_v21  ;;  %v779_v36 = vrot.slane %v313_v16, 2 }
  0xd6   : > { %v854_v52 = vsel %vm848_vm4, %v837_v43, %v1974_v32 }
  0xd7   : > { %750 = vrot.lane.b32.xlu1 %v377_v59, %s1617_s26  ;;  %698 = vrot.lane.b32.xlu0 %v1995_v2, %s1616_s11  ;;  %v871_v54 = vsel %vm865_vm5, %v854_v52, %v1992_v46 }
  0xd8   : > { %v888_v27 = vsel %vm882_vm6, %v871_v54, %v2020_v61 }
  0xd9   : > { %v790_v8 = vpop.permute.xlu1 %789  ;;  %v635_v9 = vpop.permute.xlu0 %634 }
  0xda   : > { %v954_v5 = vsel %vm950_vm10, %v937_v7, %v790_v8  ;;  %v904_v25 = vsel %vm899_vm7, %v887_v1, %v635_v9  ;;  %v624_v7 = vrot.slane %v311_v56, 2 }
  0xdb   : > { %597 = vrot.lane.b32.xlu1 %v377_v59, %s1614_s9  ;;  %545 = vrot.lane.b32.xlu0 %v1995_v2, %s1611_s6 }
  0xdc   : > { %1491 = vmatmul.mubr.msk.f32.gmra.mxu0 %vm972_vm11, %v954_v5  ;;  %v625_v5 = vsel %vm428_vm0, %v622_v60, %v624_v7 }
  0xdd   : > { %v2042_v10 = vpop.permute.xlu1 %481  ;;  %v2044_v14 = vpop.permute.xlu0 %394 }
  0xdf   : > { %803 = vrot.lane.b32.xlu1 %v466_v11, %s1618_s29  ;;  %752 = vrot.lane.b32.xlu0 %v379_v13, %s1617_s26 }
  0xe1   : > { %v685_v17 = vpop.permute.xlu1 %684  ;;  %v637_v18 = vpop.permute.xlu0 %636 }
  0xe2   : > { %v921_v6 = vsel %vm916_vm8, %v904_v25, %v685_v17  ;;  %v905_v24 = vsel %vm899_vm7, %v888_v27, %v637_v18  ;;  %v312_v17 = vld [vmem:[%s1692_s30 + $0xd8] sm:$0xff]  ;;  %v314_v18 = vld [vmem:[%s1692_s30 + $0xe8] sm:$0x3]  ;;  %s1431_s30 = sshll.u32 %s1593_s18, 3 }
  0xe3   : > { %599 = vrot.lane.b32.xlu1 %v379_v13, %s1614_s9  ;;  %408 = vrot.lane.b32.xlu0 %v377_v59, %s1613_s8  ;;  %v621_v59 = vrot.slane %v309_v35, 2  ;;  %v781_v23 = vrot.slane %v314_v18, 2  ;;  %p269_p7 = scmp.lt.s32.totalorder %s1431_s30, 15 }
  0xe5   : > { %v2051_v20 = vpop.permute.xlu1 %531  ;;  %v2053_v22 = vpop.permute.xlu0 %483  ;;  %v623_v61 = vsel %vm428_vm0, %v621_v59, %v622_v60  ;;  %s2357_s30 = smov (!%p269_p7, %s1431_s30), 15 }
  0xe6   : > { %s1432_s18 = sshll.u32 %s2357_s30, 1 }
  0xe7   : > { %805 = vrot.lane.b32.xlu1 %v468_v19, %s1618_s29  ;;  %650 = vrot.lane.b32.xlu0 %v466_v11, %s1615_s10 }
  0xe9   : > { %v739_v26 = vpop.permute.xlu1 %738  ;;  %v687_v28 = vpop.permute.xlu0 %686 }
  0xea   : > { %v938_v31 = vsel %vm933_vm9, %v921_v6, %v739_v26  ;;  %v922_v32 = vsel %vm916_vm8, %v905_v24, %v687_v28  ;;  %v725_v26 = vrot.slane %v312_v17, 1  ;;  %v728_v28 = vrot.slane %v314_v18, 1 }
  0xeb   : > { %497 = vrot.lane.b32.xlu1 %v466_v11, %s1612_s7  ;;  %410 = vrot.lane.b32.xlu0 %v379_v13, %s1613_s8 }
  0xed   : > { %v2067_v37 = vpop.permute.xlu1 %585  ;;  %v2069_v38 = vpop.permute.xlu0 %533 }
  0xef   : > { %700 = vrot.lane.b32.xlu1 %v309_v35, %s1616_s11  ;;  %652 = vrot.lane.b32.xlu0 %v468_v19, %s1615_s10 }
  0xf1   : > { %v792_v33 = vpop.permute.xlu1 %791  ;;  %v741_v39 = vpop.permute.xlu0 %740 }
  0xf2   : > { %v955_v51 = vsel %vm950_vm10, %v938_v31, %v792_v33  ;;  %v939_v46 = vsel %vm933_vm9, %v922_v32, %v741_v39  ;;  %v782_v39 = vsel %vm428_vm0, %v779_v36, %v781_v23 }
  0xf3   : > { %547 = vrot.lane.b32.xlu1 %v309_v35, %s1611_s6  ;;  %499 = vrot.lane.b32.xlu0 %v468_v19, %s1612_s7  ;;  %v726_v19 = vrot.slane %v313_v16, 1  ;;  %v838_v35 = vsel %vm831_vm3, %v1789_v44, %v2022_v3 }
  0xf4   : > { %1493 = vmatprep.mubr.msk.f32.mxu0 %vm972_vm11, %v955_v51  ;;  %v855_v1 = vsel %vm848_vm4, %v838_v35, %v2042_v10 }
  0xf5   : > { %v2091_v48 = vpop.permute.xlu1 %587  ;;  %v2093_v55 = vpop.permute.xlu0 %396  ;;  %v729_v25 = vsel %vm339_vm1, %v726_v19, %v728_v28  ;;  %v727_v6 = vsel %vm339_vm1, %v725_v26, %v726_v19  ;;  %v872_v21 = vsel %vm865_vm5, %v855_v1, %v2051_v20 }
  0xf6   : > { %v889_v44 = vsel %vm882_vm6, %v872_v21, %v2067_v37  ;;  %v839_v37 = vsel %vm831_vm3, %v1792_v45, %v2044_v14  ;;  %v840_v7 = vsel %vm831_vm3, %v1824_v57, %v2093_v55 }
  0xf7   : > { %754 = vrot.lane.b32.xlu1 %v570_v53, %s1617_s26  ;;  %702 = vrot.lane.b32.xlu0 %v310_v42, %s1616_s11  ;;  %v856_v54 = vsel %vm848_vm4, %v839_v37, %v2053_v22 }
  0xf8   : > { %v873_v56 = vsel %vm865_vm5, %v856_v54, %v2069_v38 }
  0xf9   : > { %v794_v34 = vpop.permute.xlu1 %793  ;;  %v639_v62 = vpop.permute.xlu0 %638  ;;  %v890_v32 = vsel %vm882_vm6, %v873_v56, %v2091_v48 }
  0xfa   : > { %v956_v40 = vsel %vm950_vm10, %v939_v46, %v794_v34  ;;  %v906_v3 = vsel %vm899_vm7, %v889_v44, %v639_v62 }
  0xfb   : > { %601 = vrot.lane.b32.xlu1 %v570_v53, %s1614_s9  ;;  %549 = vrot.lane.b32.xlu0 %v310_v42, %s1611_s6  ;;  %v778_v42 = vrot.slane %v312_v17, 2  ;;  %s1433_s6 = sshll.u32 %s2355_s19, 5 }
  0xfc   : > { %1494 = vmatmul.mubr.msk.f32.gmra.mxu0 %vm972_vm11, %v956_v40  ;;  %s273_s7 = sadd.s32 %s1433_s6, %s1432_s18 }
  0xfd   : > { %v2109_v49 = vpop.permute.xlu1 %485  ;;  %v2111_v4 = vpop.permute.xlu0 %398  ;;  %v780_v51 = vsel %vm428_vm0, %v778_v42, %v779_v36  ;;  %s1434_s8 = sshll.u32 %s273_s7, 3 }
  0xfe   : > { %v841_v57 = vsel %vm831_vm3, %v1827_v58, %v2111_v4 }
  0xff   : > { %807 = vrot.lane.b32.xlu1 %v623_v61, %s1618_s29  ;;  %756 = vrot.lane.b32.xlu0 %v572_v63, %s1617_s26 }
 0x101   : > { %v689_v8 = vpop.permute.xlu1 %688  ;;  %v641_v9 = vpop.permute.xlu0 %640 }
 0x102   : > { %v923_v10 = vsel %vm916_vm8, %v906_v3, %v689_v8  ;;  %v907_v59 = vsel %vm899_vm7, %v890_v32, %v641_v9  ;;  %v857_v8 = vsel %vm848_vm4, %v840_v7, %v2109_v49 }
 0x103   : > { %654 = vrot.lane.b32.xlu1 %v623_v61, %s1615_s10  ;;  %603 = vrot.lane.b32.xlu0 %v572_v63, %s1614_s9 }
 0x105   : > { %v536_v11 = vpop.permute.xlu1 %535  ;;  %v2118_v13 = vpop.permute.xlu0 %487 }
 0x106   : > { %v874_v9 = vsel %vm865_vm5, %v857_v8, %v536_v11  ;;  %v858_v55 = vsel %vm848_vm4, %v841_v57, %v2118_v13 }
 0x107   : > { %656 = vrot.lane.b32.xlu1 %v625_v5, %s1615_s10  ;;  %809 = vrot.lane.b32.xlu0 %v625_v5, %s1618_s29 }
 0x109   : > { %v743_v29 = vpop.permute.xlu1 %742  ;;  %v691_v30 = vpop.permute.xlu0 %690 }
 0x10a   : > { %v940_v43 = vsel %vm933_vm9, %v923_v10, %v743_v29  ;;  %v924_v45 = vsel %vm916_vm8, %v907_v59, %v691_v30 }
 0x10b   : > { %706 = vrot.lane.b32.xlu1 %v313_v16, %s1616_s11  ;;  %704 = vrot.lane.b32.xlu0 %v312_v17, %s1616_s11  ;;  %s2231_s11 = scalar_lea.vmem %s2342_s4, %s1434_s8 }
 0x10d   : > { %v590_v31 = vpop.permute.xlu1 %589  ;;  %v538_v33 = vpop.permute.xlu0 %537 }
 0x10e   : > { %v891_v17 = vsel %vm882_vm6, %v874_v9, %v590_v31  ;;  %v875_v49 = vsel %vm865_vm5, %v858_v55, %v538_v33 }
 0x10f   : > { %760 = vrot.lane.b32.xlu1 %v729_v25, %s1617_s26  ;;  %758 = vrot.lane.b32.xlu0 %v727_v6, %s1617_s26 }
 0x111   : > { %v796_v20 = vpop.permute.xlu1 %795  ;;  %v745_v52 = vpop.permute.xlu0 %744 }
 0x112   : > { %v957_v53 = vsel %vm950_vm10, %v940_v43, %v796_v20  ;;  %v941_v14 = vsel %vm933_vm9, %v924_v45, %v745_v52 }
 0x113   : > { %813 = vrot.lane.b32.xlu1 %v782_v39, %s1618_s29  ;;  %811 = vrot.lane.b32.xlu0 %v780_v51, %s1618_s29 }
 0x114   : > { %1496 = vmatprep.mubr.msk.f32.mxu0 %vm972_vm11, %v957_v53 }
 0x115   : > { %v592_v27 = vpop.permute.xlu1 %591  ;;  %v401_v24 = vpop.permute.xlu0 %400 }
 0x116   : > { %v892_v36 = vsel %vm882_vm6, %v875_v49, %v592_v27  ;;  %v842_v39 = vsel %vm831_vm3, %v1861_v12, %v401_v24 }
 0x119   : > { %v798_v60 = vpop.permute.xlu1 %797  ;;  %v643_v0 = vpop.permute.xlu0 %642 }
 0x11a   : > { %v958_v22 = vsel %vm950_vm10, %v941_v14, %v798_v60  ;;  %v908_v18 = vsel %vm899_vm7, %v891_v17, %v643_v0 }
 0x11b   : > { %1497 = vmatmul.mubr.msk.f32.gmra.mxu0 %vm972_vm11, %v958_v22 }
 0x11d   : > { %v490_v46 = vpop.permute.xlu1 %489  ;;  %v403_v34 = vpop.permute.xlu0 %402 }
 0x11e   : > { %v859_v51 = vsel %vm848_vm4, %v842_v39, %v490_v46  ;;  %v843_v12 = vsel %vm831_vm3, %v1864_v15, %v403_v34 }
 0x121   : > { %v693_v38 = vpop.permute.xlu1 %692  ;;  %v645_v62 = vpop.permute.xlu0 %644 }
 0x122   : > { %v925_v19 = vsel %vm916_vm8, %v908_v18, %v693_v38  ;;  %v909_v42 = vsel %vm899_vm7, %v892_v36, %v645_v62 }
 0x125   : > { %v540_v40 = vpop.permute.xlu1 %539  ;;  %v492_v61 = vpop.permute.xlu0 %491 }
 0x126   : > { %v876_v43 = vsel %vm865_vm5, %v859_v51, %v540_v40  ;;  %v860_v24 = vsel %vm848_vm4, %v843_v12, %v492_v61 }
 0x129   : > { %v747_v63 = vpop.permute.xlu1 %746  ;;  %v695_v48 = vpop.permute.xlu0 %694 }
 0x12a   : > { %v942_v26 = vsel %vm933_vm9, %v925_v19, %v747_v63  ;;  %v926_v1 = vsel %vm916_vm8, %v909_v42, %v695_v48 }
 0x12d   : > { %v594_v5 = vpop.permute.xlu1 %593  ;;  %v542_v16 = vpop.permute.xlu0 %541 }
 0x12e   : > { %v893_v53 = vsel %vm882_vm6, %v876_v43, %v594_v5  ;;  %v877_v45 = vsel %vm865_vm5, %v860_v24, %v542_v16 }
 0x131   : > { %v800_v28 = vpop.permute.xlu1 %799  ;;  %v749_v29 = vpop.permute.xlu0 %748 }
 0x132   : > { %v959_v30 = vsel %vm950_vm10, %v942_v26, %v800_v28  ;;  %v943_v25 = vsel %vm933_vm9, %v926_v1, %v749_v29 }
 0x133   : > { %1499 = vmatprep.mubr.msk.f32.mxu1 %vm972_vm11, %v959_v30 }
 0x135   : > { %v596_v11 = vpop.permute.xlu1 %595  ;;  %v405_v35 = vpop.permute.xlu0 %404 }
 0x136   : > { %v894_v0 = vsel %vm882_vm6, %v877_v45, %v596_v11  ;;  %v844_v16 = vsel %vm831_vm3, %v1911_v47, %v405_v35 }
 0x139   : > { %v802_v6 = vpop.permute.xlu1 %801  ;;  %v647_v23 = vpop.permute.xlu0 %646 }
 0x13a   : > { %v960_v58 = vsel %vm950_vm10, %v943_v25, %v802_v6  ;;  %v910_v37 = vsel %vm899_vm7, %v893_v53, %v647_v23 }
 0x13b   : > { %1500 = vmatmul.mubr.msk.f32.vlgmr.msra.gmra.mxu1 %vm972_vm11, %v960_v58 }
 0x13d   : > { %v494_v4 = vpop.permute.xlu1 %493  ;;  %v407_v13 = vpop.permute.xlu0 %406 }
 0x13e   : > { %v861_v17 = vsel %vm848_vm4, %v844_v16, %v494_v4  ;;  %v845_v11 = vsel %vm831_vm3, %v1919_v50, %v407_v13 }
 0x141   : > { %v697_v21 = vpop.permute.xlu1 %696  ;;  %v649_v31 = vpop.permute.xlu0 %648 }
 0x142   : > { %v927_v54 = vsel %vm916_vm8, %v910_v37, %v697_v21  ;;  %v911_v22 = vsel %vm899_vm7, %v894_v0, %v649_v31 }
 0x145   : > { %v544_v33 = vpop.permute.xlu1 %543  ;;  %v496_v44 = vpop.permute.xlu0 %495 }
 0x146   : > { %v878_v18 = vsel %vm865_vm5, %v861_v17, %v544_v33  ;;  %v862_v35 = vsel %vm848_vm4, %v845_v11, %v496_v44 }
 0x149   : > { %v751_v3 = vpop.permute.xlu1 %750  ;;  %v699_v10 = vpop.permute.xlu0 %698 }
 0x14a   : > { %v944_v56 = vsel %vm933_vm9, %v927_v54, %v751_v3  ;;  %v928_v46 = vsel %vm916_vm8, %v911_v22, %v699_v10 }
 0x14d   : > { %v598_v20 = vpop.permute.xlu1 %597  ;;  %v546_v52 = vpop.permute.xlu0 %545 }
 0x14e   : > { %v895_v28 = vsel %vm882_vm6, %v878_v18, %v598_v20  ;;  %v879_v36 = vsel %vm865_vm5, %v862_v35, %v546_v52 }
 0x151   : > { %v804_v27 = vpop.permute.xlu1 %803  ;;  %v753_v32 = vpop.permute.xlu0 %752 }
 0x152   : > { %v961_v59 = vsel %vm950_vm10, %v944_v56, %v804_v27  ;;  %v945_v38 = vsel %vm933_vm9, %v928_v46, %v753_v32 }
 0x153   : > { %1502 = vmatprep.mubr.msk.f32.mxu1 %vm972_vm11, %v961_v59 }
 0x155   : > { %v600_v14 = vpop.permute.xlu1 %599  ;;  %v409_v60 = vpop.permute.xlu0 %408 }
 0x156   : > { %v896_v25 = vsel %vm882_vm6, %v879_v36, %v600_v14  ;;  %v846_v3 = vsel %vm831_vm3, %v1986_v41, %v409_v60 }
 0x159   : > { %v806_v62 = vpop.permute.xlu1 %805  ;;  %v651_v40 = vpop.permute.xlu0 %650 }
 0x15a   : > { %v962_v15 = vsel %vm950_vm10, %v945_v38, %v806_v62  ;;  %v912_v29 = vsel %vm899_vm7, %v895_v28, %v651_v40 }
 0x15b   : > { %1503 = vmatmul.mubr.msk.f32.gmra.mxu1 %vm972_vm11, %v962_v15 }
 0x15d   : > { %v498_v34 = vpop.permute.xlu1 %497  ;;  %v411_v61 = vpop.permute.xlu0 %410 }
 0x15e   : > { %v847_v39 = vsel %vm831_vm3, %v1995_v2, %v411_v61  ;;  %v863_v52 = vsel %vm848_vm4, %v846_v3, %v498_v34 }
 0x161   : > { %v701_v63 = vpop.permute.xlu1 %700  ;;  %v653_v48 = vpop.permute.xlu0 %652 }
 0x162   : > { %v929_v30 = vsel %vm916_vm8, %v912_v29, %v701_v63  ;;  %v913_v6 = vsel %vm899_vm7, %v896_v25, %v653_v48 }
 0x165   : > { %v548_v7 = vpop.permute.xlu1 %547  ;;  %v500_v8 = vpop.permute.xlu0 %499 }
 0x166   : > { %v864_v53 = vsel %vm848_vm4, %v847_v39, %v500_v8  ;;  %v880_v54 = vsel %vm865_vm5, %v863_v52, %v548_v7 }
 0x169   : > { %v755_v9 = vpop.permute.xlu1 %754  ;;  %v703_v5 = vpop.permute.xlu0 %702 }
 0x16a   : > { %v946_v57 = vsel %vm933_vm9, %v929_v30, %v755_v9  ;;  %v930_v23 = vsel %vm916_vm8, %v913_v6, %v703_v5 }
 0x16d   : > { %v602_v19 = vpop.permute.xlu1 %601  ;;  %v550_v26 = vpop.permute.xlu0 %549 }
 0x16e   : > { %v881_v41 = vsel %vm865_vm5, %v864_v53, %v550_v26  ;;  %v897_v59 = vsel %vm882_vm6, %v880_v54, %v602_v19 }
 0x171   : > { %v808_v55 = vpop.permute.xlu1 %807  ;;  %v757_v49 = vpop.permute.xlu0 %756 }
 0x172   : > { %v963_v47 = vsel %vm950_vm10, %v946_v57, %v808_v55  ;;  %v947_v58 = vsel %vm933_vm9, %v930_v23, %v757_v49 }
 0x173   : > { %1505 = vmatprep.mubr.msk.f32.mxu1 %vm972_vm11, %v963_v47 }
 0x175   : > { %v655_v42 = vpop.permute.xlu1 %654  ;;  %v604_v1 = vpop.permute.xlu0 %603 }
 0x176   : > { %v898_v12 = vsel %vm882_vm6, %v881_v41, %v604_v1  ;;  %v914_v45 = vsel %vm899_vm7, %v897_v59, %v655_v42 }
 0x179   : > { %v657_v4 = vpop.permute.xlu1 %656  ;;  %v810_v50 = vpop.permute.xlu0 %809 }
 0x17a   : > { %v964_v13 = vsel %vm950_vm10, %v947_v58, %v810_v50  ;;  %v915_v14 = vsel %vm899_vm7, %v898_v12, %v657_v4 }
 0x17b   : > { %1506 = vmatmul.mubr.msk.f32.gmra.mxu1 %vm972_vm11, %v964_v13 }
 0x17c   : > { %v1489_v21 = vpop.f32.mrf.mxu0 }
 0x17d   : > { %1171 = vst.msk [vmem:[%s2231_s11 + $0x8] sm:$0xff] %vm848_vm4, %v1489_v21  ;;  %v1226_v31 = vmul.f32 %v1489_v21, %v1489_v21  ;;  %v707_v33 = vpop.permute.xlu1 %706  ;;  %v705_v44 = vpop.permute.xlu0 %704  ;;  %v1187_v51 = vsel %vm848_vm4, %v1489_v21, 0.0 }
 0x17e   : > { %v1091_v10 = vpop.f32.mrf.mxu0  ;;  %v932_v60 = vsel %vm916_vm8, %v915_v14, %v707_v33  ;;  %v931_v0 = vsel %vm916_vm8, %v914_v45, %v705_v44 }
 0x17f   : > { %1170 = vst.msk [vmem:[%s2231_s11] sm:$0xff] %vm848_vm4, %v1091_v10  ;;  %v1186_v43 = vsel %vm848_vm4, %v1091_v10, 0.0  ;;  %v1225_v20 = vmul.f32 %v1091_v10, %v1091_v10  ;;  %v1242_v56 = vsel %vm848_vm4, %v1226_v31, 0.0 }
 0x180   : > { %v1188_v37 = vadd.f32 %v1187_v51, %v1186_v43 }
 0x181   : > { %v1241_v2 = vsel %vm848_vm4, %v1225_v20, 0.0  ;;  %v761_v27 = vpop.permute.xlu1 %760  ;;  %v759_v32 = vpop.permute.xlu0 %758 }
 0x182   : > { %v1243_v24 = vadd.f32 %v1242_v56, %v1241_v2  ;;  %v949_v22 = vsel %vm933_vm9, %v932_v60, %v761_v27  ;;  %v948_v46 = vsel %vm933_vm9, %v931_v0, %v759_v32 }
 0x185   : > { %v814_v38 = vpop.permute.xlu1 %813  ;;  %v812_v62 = vpop.permute.xlu0 %811 }
 0x186   : > { %v966_v40 = vsel %vm950_vm10, %v949_v22, %v814_v38  ;;  %v965_v15 = vsel %vm950_vm10, %v948_v46, %v812_v62 }
 0x187   : > { %1508 = vmatprep.mubr.msk.f32.mxu1 %vm972_vm11, %v965_v15 }
 0x188   : > { %1509 = vmatmul.mubr.msk.f32.gmra.mxu1 %vm972_vm11, %v966_v40 }
 0x19c   : > { %v1492_v34 = vpop.f32.mrf.mxu0 }
 0x19d   : > { %1173 = vst.msk [vmem:[%s2231_s11 + $0x18] sm:$0xff] %vm848_vm4, %v1492_v34  ;;  %v1228_v63 = vmul.f32 %v1492_v34, %v1492_v34  ;;  %v1191_v9 = vsel %vm848_vm4, %v1492_v34, 0.0 }
 0x19e   : > { %v1101_v61 = vpop.f32.mrf.mxu0 }
 0x19f   : > { %1172 = vst.msk [vmem:[%s2231_s11 + $0x10] sm:$0xff] %vm848_vm4, %v1101_v61  ;;  %v1189_v48 = vsel %vm848_vm4, %v1101_v61, 0.0  ;;  %v1227_v7 = vmul.f32 %v1101_v61, %v1101_v61  ;;  %v1246_v18 = vsel %vm848_vm4, %v1228_v63, 0.0 }
 0x1a0   : > { %v1190_v8 = vadd.f32 %v1189_v48, %v1188_v37 }
 0x1a1   : > { %v1244_v5 = vsel %vm848_vm4, %v1227_v7, 0.0 }
 0x1a2   : > { %v1245_v16 = vadd.f32 %v1244_v5, %v1243_v24  ;;  %v1192_v17 = vadd.f32 %v1191_v9, %v1190_v8 }
 0x1a4   : > { %v1247_v19 = vadd.f32 %v1246_v18, %v1245_v16 }
 0x1bc   : > { %v1495_v26 = vpop.f32.mrf.mxu0 }
 0x1bd   : > { %1175 = vst.msk [vmem:[%s2231_s11 + $0x28] sm:$0xff] %vm848_vm4, %v1495_v26  ;;  %v1230_v29 = vmul.f32 %v1495_v26, %v1495_v26  ;;  %v1195_v49 = vsel %vm848_vm4, %v1495_v26, 0.0 }
 0x1be   : > { %v1111_v28 = vpop.f32.mrf.mxu0 }
 0x1bf   : > { %1174 = vst.msk [vmem:[%s2231_s11 + $0x20] sm:$0xff] %vm848_vm4, %v1111_v28  ;;  %v1193_v30 = vsel %vm848_vm4, %v1111_v28, 0.0  ;;  %v1229_v57 = vmul.f32 %v1111_v28, %v1111_v28  ;;  %v1250_v36 = vsel %vm848_vm4, %v1230_v29, 0.0 }
 0x1c0   : > { %v1194_v55 = vadd.f32 %v1193_v30, %v1192_v17 }
 0x1c1   : > { %v1248_v47 = vsel %vm848_vm4, %v1229_v57, 0.0 }
 0x1c2   : > { %v1249_v11 = vadd.f32 %v1248_v47, %v1247_v19  ;;  %v1196_v35 = vadd.f32 %v1195_v49, %v1194_v55 }
 0x1c4   : > { %v1251_v42 = vadd.f32 %v1250_v36, %v1249_v11 }
 0x1db   : > { %v1498_v1 = vpop.f32.mrf.mxu0 }
 0x1dc   : > { %1177 = vst.msk [vmem:[%s2231_s11 + $0x38] sm:$0xff] %vm848_vm4, %v1498_v1  ;;  %v1232_v6 = vmul.f32 %v1498_v1, %v1498_v1  ;;  %v1199_v50 = vsel %vm848_vm4, %v1498_v1, 0.0 }
 0x1dd   : > { %v1121_v25 = vpop.f32.mrf.mxu0 }
 0x1de   : > { %1176 = vst.msk [vmem:[%s2231_s11 + $0x30] sm:$0xff] %vm848_vm4, %v1121_v25  ;;  %v1197_v23 = vsel %vm848_vm4, %v1121_v25, 0.0  ;;  %v1231_v58 = vmul.f32 %v1121_v25, %v1121_v25  ;;  %v1254_v33 = vsel %vm848_vm4, %v1232_v6, 0.0 }
 0x1df   : > { %v1198_v4 = vadd.f32 %v1197_v23, %v1196_v35 }
 0x1e0   : > { %v1252_v13 = vsel %vm848_vm4, %v1231_v58, 0.0 }
 0x1e1   : > { %v1200_v21 = vadd.f32 %v1199_v50, %v1198_v4  ;;  %v1253_v31 = vadd.f32 %v1252_v13, %v1251_v42 }
 0x1e3   : > { %v1255_v44 = vadd.f32 %v1254_v33, %v1253_v31 }
 0x1fb   : > { %v1501_v3 = vpop.f32.mrf.mxu1 }
 0x1fc   : > { %1179 = vst.msk [vmem:[%s2231_s11 + $0x48] sm:$0xff] %vm848_vm4, %v1501_v3  ;;  %v1234_v39 = vmul.f32 %v1501_v3, %v1501_v3  ;;  %v1203_v52 = vsel %vm848_vm4, %v1501_v3, 0.0 }
 0x1fd   : > { %v1131_v10 = vpop.f32.mrf.mxu1 }
 0x1fe   : > { %1178 = vst.msk [vmem:[%s2231_s11 + $0x40] sm:$0xff] %vm848_vm4, %v1131_v10  ;;  %v1201_v51 = vsel %vm848_vm4, %v1131_v10, 0.0  ;;  %v1233_v43 = vmul.f32 %v1131_v10, %v1131_v10  ;;  %v1258_v41 = vsel %vm848_vm4, %v1234_v39, 0.0 }
 0x1ff   : > { %v1202_v20 = vadd.f32 %v1201_v51, %v1200_v21 }
 0x200   : > { %v1256_v53 = vsel %vm848_vm4, %v1233_v43, 0.0 }
 0x201   : > { %v1257_v37 = vadd.f32 %v1256_v53, %v1255_v44  ;;  %v1204_v54 = vadd.f32 %v1203_v52, %v1202_v20 }
 0x203   : > { %v1259_v56 = vadd.f32 %v1258_v41, %v1257_v37 }
 0x21b   : > { %v1504_v2 = vpop.f32.mrf.mxu1 }
 0x21c   : > { %1181 = vst.msk [vmem:[%s2231_s11 + $0x58] sm:$0xff] %vm848_vm4, %v1504_v2  ;;  %v1236_v60 = vmul.f32 %v1504_v2, %v1504_v2  ;;  %v1207_v46 = vsel %vm848_vm4, %v1504_v2, 0.0 }
 0x21d   : > { %v1141_v27 = vpop.f32.mrf.mxu1 }
 0x21e   : > { %1180 = vst.msk [vmem:[%s2231_s11 + $0x50] sm:$0xff] %vm848_vm4, %v1141_v27  ;;  %v1235_v32 = vmul.f32 %v1141_v27, %v1141_v27  ;;  %v1205_v12 = vsel %vm848_vm4, %v1141_v27, 0.0  ;;  %v1262_v40 = vsel %vm848_vm4, %v1236_v60, 0.0 }
 0x21f   : > { %v1206_v14 = vadd.f32 %v1205_v12, %v1204_v54 }
 0x220   : > { %v1260_v45 = vsel %vm848_vm4, %v1235_v32, 0.0 }
 0x221   : > { %v1261_v22 = vadd.f32 %v1260_v45, %v1259_v56  ;;  %v1208_v62 = vadd.f32 %v1207_v46, %v1206_v14 }
 0x223   : > { %v1263_v61 = vadd.f32 %v1262_v40, %v1261_v22 }
 0x23b   : > { %v1507_v59 = vpop.f32.mrf.mxu1 }
 0x23c   : > { %1183 = vst.msk [vmem:[%s2231_s11 + $0x68] sm:$0xff] %vm848_vm4, %v1507_v59  ;;  %v1238_v63 = vmul.f32 %v1507_v59, %v1507_v59  ;;  %v1211_v8 = vsel %vm848_vm4, %v1507_v59, 0.0 }
 0x23d   : > { %v1151_v24 = vpop.f32.mrf.mxu1 }
 0x23e   : > { %1182 = vst.msk [vmem:[%s2231_s11 + $0x60] sm:$0xff] %vm848_vm4, %v1151_v24  ;;  %v1237_v0 = vmul.f32 %v1151_v24, %v1151_v24  ;;  %v1209_v38 = vsel %vm848_vm4, %v1151_v24, 0.0  ;;  %v1266_v16 = vsel %vm848_vm4, %v1238_v63, 0.0 }
 0x23f   : > { %v1210_v34 = vadd.f32 %v1209_v38, %v1208_v62 }
 0x240   : > { %v1264_v15 = vsel %vm848_vm4, %v1237_v0, 0.0 }
 0x241   : > { %v1265_v48 = vadd.f32 %v1264_v15, %v1263_v61  ;;  %v1212_v5 = vadd.f32 %v1211_v8, %v1210_v34 }
 0x243   : > { %v1267_v28 = vadd.f32 %v1266_v16, %v1265_v48 }
 0x248   : > { %v1510_v7 = vpop.f32.mrf.mxu1 }
 0x249   : > { %1185 = vst.msk [vmem:[%s2231_s11 + $0x78] sm:$0xff] %vm848_vm4, %v1510_v7  ;;  %v1240_v17 = vmul.f32 %v1510_v7, %v1510_v7  ;;  %v1215_v29 = vsel %vm848_vm4, %v1510_v7, 0.0 }
 0x24a   : > { %v1161_v9 = vpop.f32.mrf.mxu1 }
 0x24b   : > { %1184 = vst.msk [vmem:[%s2231_s11 + $0x70] sm:$0xff] %vm848_vm4, %v1161_v9  ;;  %v1213_v18 = vsel %vm848_vm4, %v1161_v9, 0.0  ;;  %v1239_v19 = vmul.f32 %v1161_v9, %v1161_v9  ;;  %v1270_v49 = vsel %vm848_vm4, %v1240_v17, 0.0 }
 0x24c   : > { %v1214_v26 = vadd.f32 %v1213_v18, %v1212_v5 }
 0x24d   : > { %v1268_v30 = vsel %vm848_vm4, %v1239_v19, 0.0 }
 0x24e   : > { %v1216_v57 = vadd.f32 %v1215_v29, %v1214_v26  ;;  %v1269_v55 = vadd.f32 %v1268_v30, %v1267_v28 }
 0x250   : > { %v1217_v47 = vrot.slane %v1216_v57, 4  ;;  %v1271_v11 = vadd.f32 %v1270_v49, %v1269_v55 }
 0x252   : > { %v1218_v35 = vadd.f32 %v1217_v47, %v1216_v57  ;;  %v1272_v36 = vrot.slane %v1271_v11, 4 }
 0x254   : > { %v1219_v42 = vrot.slane %v1218_v35, 2  ;;  %v1273_v1 = vadd.f32 %v1272_v36, %v1271_v11 }
 0x256   : > { %v1220_v25 = vadd.f32 %v1219_v42, %v1218_v35  ;;  %v1274_v6 = vrot.slane %v1273_v1, 2 }
 0x258   : > { %v1221_v23 = vrot.slane %v1220_v25, 1  ;;  %v1275_v58 = vadd.f32 %v1274_v6, %v1273_v1 }
 0x25a   : > { %v1222_v4 = vadd.f32 %v1221_v23, %v1220_v25  ;;  %v1276_v50 = vrot.slane %v1275_v58, 1 }
 0x25c   : > { %1224 = vst.msk [vmem:[%s284_s17] sm:$0x1] %vm1223_vm12, %v1222_v4  ;;  %v1277_v13 = vadd.f32 %v1276_v50, %v1275_v58 }
 0x25e   : > { %1278 = vst.msk [vmem:[%s284_s17 + $0x1] sm:$0x1] %vm1223_vm12, %v1277_v13 }
 0x25f PF: > { %s16_s22 = sadd.s32 1, %s1609_s22   ;;  %s2344_s18 = smov %s1601_s20 }
 0x260   : > { %p13_p8 = scmp.ge.s32.totalorder %s16_s22, 6   ;;  %s2345_s19 = smov %s1605_s21 }
 0x261   : > { %s2346_s20 = smov %s2349_s2  ;;  %s2347_s21 = smov %s2353_s3 }
 0x262   :  { %15 = sbr.rel (!%p13_p8) target bundleno = 3 (0x3), region = 78 }

// kernel: double_conv.4
= control target key start
LH: loop header
LB: loop body
LE: loop exit
PB: predicated region body
PF: predicated region fallthrough
CT: control target
= control target key end

     0   :  { %s1978_s18 = smov 0   ;;  %s1980_s19 = smov 0   ;;  %s2928_s0 = inlined_call_operand.vmem [shape: f32[2,2,10,18,8], index: 0, kind: input, shape index: {}]   ;;  %s2929_s1 = inlined_call_operand.vmem [shape: f32[72,8], index: 1, kind: input, shape index: {}]   ;;  %s2930_s2 = inlined_call_operand.vmem [shape: f32[1,8], index: 2, kind: input, shape index: {}]   ;;  %s2931_s3 = inlined_call_operand.vmem [shape: f32[1,8], index: 3, kind: input, shape index: {}]   ;;  %s2932_s4 = inlined_call_operand.vmem [shape: f32[2,16,16,8], index: 4, kind: output, shape index: {0}]   ;;  %s2933_s5 = inlined_call_operand.vmem [shape: f32[2,2,2,8], index: 5, kind: output, shape index: {1}]  }
   0x1   :  { %s1982_s20 = smov 0   ;;  %s1984_s21 = smov 0  }
   0x2   :  { %s1986_s22 = smov 0  }
   0x3 LB: > { %s25_s23 = sadd.s32 1, %s1930_s20  ;;  %s28_s24 = sadd.s32 1, %s1934_s21  ;;  %s1938_s22 = sphi %s1986_s22, %s16_s22   ;;  %s1934_s21 = sphi %s1984_s21, %s2964_s21   ;;  %s1930_s20 = sphi %s1982_s20, %s2963_s20   ;;  %s1926_s19 = sphi %s1980_s19, %s2962_s19   ;;  %s1922_s18 = sphi %s1978_s18, %s2961_s18  }
   0x4   : > { %p26_p0 = scmp.ge.s32.totalorder %s25_s23, 2  ;;  %p1734_p1 = scmp.ge.s32.totalorder %s1938_s22, 1 }
   0x5   : > { %p212_p2 = scmp.lt.s32.totalorder %s1938_s22, 5 }
   0x6   : > { %s2966_s23 = smov (%p26_p0, %s25_s23), 0  ;;  %s2968_s24 = smov (!%p26_p0, %s28_s24), %s1934_s21 }
   0x7   : > { %p213_p3 = pnand %p1734_p1, %p212_p2  ;;  %p30_p4 = scmp.ge.s32.totalorder %s2968_s24, 2 }
   0x8   : > { %p257_p5 = scmp.lt.s32.totalorder (!%p213_p3), %s1926_s19, 1  ;;  %p259_p6 = scmp.lt.s32.totalorder (!%p213_p3), %s1922_s18, 1 }
   0x9   : > { %s2970_s24 = smov (%p30_p4, %s2968_s24), 0  ;;  %216 = sbr.rel (%p213_p3) target bundleno = 613 (0x265), region = 36 }
   0xa   : > { %s2008_s25 = sshll.u32 (!%p213_p3), %s1922_s18, 3  ;;  %s1940_s12 = smov (!%p213_p3), 24  }
   0xb   : > { %s1941_s13 = smov (!%p213_p3), 16   ;;  %s1942_s14 = smov (!%p213_p3), 8  }
   0xc   : > { %s1943_s15 = smov (!%p213_p3), 32   ;;  %s1944_s16 = smov (!%p213_p3), 40  }
   0xd   : > { %s1945_s8 = smov (!%p213_p3), 48   ;;  %s1947_s11 = smov (!%p213_p3), 64  }
   0xe   : > { %s2972_s19 = smov (!%p257_p5, %s1926_s19), 1  ;;  %v2013_v0 = vstv %s2008_s25  ;;  %v430_v1 = vlaneseq  ;;  %s2974_s18 = smov (!%p259_p6, %s1922_s18), 1  ;;  %v2027_v4 = vld [vmem:[%s2930_s2] ss:$0 sm:$0xff]  ;;  %vm2934_vm11 = vcmask 1045504   ;;  %vm644_vm12 = vcmask 1046528  }
   0xf   : > { %v421_v2 = vadd.s32 1, %v2013_v0  ;;  %s1849_s26 = smul.u32 60, %s2972_s19  ;;  %vm434_vm0 = vcmp.ge.s32.totalorder %v2013_v0, 1  ;;  %vm444_vm1 = vcmp.le.s32.totalorder %v2013_v0, 16  ;;  %v2044_v7 = vld [vmem:[%s2931_s3] ss:$0 sm:$0xff] }
  0x10   : > { %s1848_s27 = smul.u32 30, %s2974_s18  ;;  %v2022_v3 = vshrl.u32 %v430_v1, 7  ;;  %vm2032_vm4 = vmand %vm434_vm0, %vm444_vm1  ;;  %v422_v54 = vadd.s32 2, %v2013_v0  ;;  %v1280_v6 = vld [vmem:[%s2929_s1 + $0x40] sm:$0xff]  ;;  %p269_p7 = scmp.lt.s32.totalorder %s2008_s25, 15 }
  0x11   : > { %vm435_vm2 = vcmp.ge.s32.totalorder %v421_v2, 1  ;;  %vm445_vm3 = vcmp.le.s32.totalorder %v421_v2, 16  ;;  %1788 = vmatprep.subr.mxu0 %v1280_v6  ;;  %1830 = vmatprep.subr.mxu1 %v1280_v6 }
  0x12   : > { %s263_s28 = sadd.s32 %s1849_s26, %s1848_s27  ;;  %v2030_v5 = vadd.s32 16, %v2022_v3  ;;  %vm2046_vm5 = vmand %vm435_vm2, %vm445_vm3  ;;  %vm464_vm6 = vcmp.ge.s32.totalorder %v2022_v3, 1  ;;  %vm436_vm14 = vcmp.ge.s32.totalorder %v422_v54, 1  ;;  %vm446_vm15 = vcmp.le.s32.totalorder %v422_v54, 16  ;;  %1789 = vmatpush3.msra.mxu0 %v1280_v6  ;;  %1839 = vmatpush3.msra.mxu1 %v1280_v6  ;;  %s2976_s25 = smov (!%p269_p7, %s2008_s25), 15 }
  0x13   : > { %s1735_s29 = sshll.u32 %s263_s28, 3  ;;  %vm467_vm8 = vmand %vm2032_vm4, %vm464_vm6 }
  0x14   : > { %s2039_s9 = scalar_lea.vmem %s2928_s0, %s1735_s29  ;;  %vm499_vm7 = vcmp.le.s32.totalorder %v2030_v5, 16  ;;  %vm470_vm9 = vmand %vm2046_vm5, %vm464_vm6  ;;  %s1946_s29 = smov 56  }
  0x15   : > { %v289_v9 = vld [vmem:[%s2039_s9 + $0x20] sm:$0xff]  ;;  %v288_v10 = vld [vmem:[%s2039_s9 + $0x18] sm:$0xff]  ;;  %v286_v14 = vld [vmem:[%s2039_s9 + $0x8] sm:$0xff] }
  0x16   : > { %v285_v11 = vld [vmem:[%s2039_s9] sm:$0xff]  ;;  %v326_v12 = vmul.f32 %v2027_v4, %v289_v9  ;;  %v325_v13 = vmul.f32 %v2027_v4, %v288_v10  ;;  %v287_v16 = vld [vmem:[%s2039_s9 + $0x10] sm:$0x3]  ;;  %v290_v17 = vld [vmem:[%s2039_s9 + $0x28] sm:$0x3]  ;;  %v323_v18 = vmul.f32 %v2027_v4, %v286_v14 }
  0x17   : > { %v322_v15 = vmul.f32 %v2027_v4, %v285_v11  ;;  %v324_v19 = vmul.f32 %v2027_v4, %v287_v16  ;;  %v327_v20 = vmul.f32 %v2027_v4, %v290_v17  ;;  %vm502_vm10 = vmand %vm2032_vm4, %vm499_vm7  ;;  %v291_v50 = vld [vmem:[%s2039_s9 + $0x30] sm:$0xff]  ;;  %v292_v52 = vld [vmem:[%s2039_s9 + $0x38] sm:$0xff] }
  0x18   : > { %v363_v21 = vadd.f32 %v2044_v7, %v326_v12  ;;  %v362_v22 = vadd.f32 %v2044_v7, %v325_v13  ;;  %v360_v24 = vadd.f32 %v2044_v7, %v323_v18  ;;  %vm505_vm13 = vmand %vm2046_vm5, %vm499_vm7  ;;  %v328_v53 = vmul.f32 %v2027_v4, %v291_v50  ;;  %v293_v2 = vld [vmem:[%s2039_s9 + $0x40] sm:$0x3]  ;;  %v1279_v12 = vld [vmem:[%s2929_s1 + $0x38] sm:$0xff] }
  0x19   : > { %v359_v23 = vadd.f32 %v2044_v7, %v322_v15  ;;  %v361_v25 = vadd.f32 %v2044_v7, %v324_v19  ;;  %v364_v31 = vadd.f32 %v2044_v7, %v327_v20  ;;  %v329_v59 = vmul.f32 %v2027_v4, %v292_v52  ;;  %vm2130_vm0 = vmand %vm436_vm14, %vm446_vm15  ;;  %v1278_v13 = vld [vmem:[%s2929_s1 + $0x30] sm:$0xff]  ;;  %1790 = vmatprep.subr.mxu0 %v1279_v12  ;;  %v1277_v18 = vld [vmem:[%s2929_s1 + $0x28] sm:$0xff] }
  0x1a   : > { %v393_v26 = vmax.f32 %v363_v21, 0.0  ;;  %v392_v27 = vmax.f32 %v362_v22, 0.0  ;;  %v390_v29 = vmax.f32 %v360_v24, 0.0  ;;  %v365_v62 = vadd.f32 %v2044_v7, %v328_v53  ;;  %vm473_vm1 = vmand %vm2130_vm0, %vm464_vm6  ;;  %1831 = vmatprep.subr.mxu1 %v1279_v12  ;;  %1791 = vmatpush3.msra.mxu0 %v1279_v12  ;;  %v1276_v22 = vld [vmem:[%s2929_s1 + $0x20] sm:$0xff]  ;;  %v298_v6 = vld [vmem:[%s2039_s9 + $0x68] sm:$0xff] }
  0x1b   : > { %v389_v28 = vmax.f32 %v359_v23, 0.0  ;;  %v391_v30 = vmax.f32 %v361_v25, 0.0  ;;  %v394_v43 = vmax.f32 %v364_v31, 0.0  ;;  %v366_v63 = vadd.f32 %v2044_v7, %v329_v59  ;;  %1840 = vmatpush3.msra.mxu1 %v1279_v12  ;;  %1792 = vmatprep.subr.mxu0 %v1278_v13  ;;  %vm508_vm2 = vmand %vm2130_vm0, %vm499_vm7  ;;  %v1275_v23 = vld [vmem:[%s2929_s1 + $0x18] sm:$0xff]  ;;  %v1272_v31 = vld [vmem:[%s2929_s1] sm:$0xff] }
  0x1c   : > { %v2084_v32 = vsel %vm2046_vm5, %v393_v26, 0.0  ;;  %v2086_v33 = vsel %vm470_vm9, %v392_v27, 0.0  ;;  %v2096_v35 = vsel %vm2032_vm4, %v390_v29, 0.0  ;;  %v395_v8 = vmax.f32 %v365_v62, 0.0  ;;  %1832 = vmatprep.subr.mxu1 %v1278_v13  ;;  %1793 = vmatpush3.msra.mxu0 %v1278_v13  ;;  %v1274_v26 = vld [vmem:[%s2929_s1 + $0x10] sm:$0xff] }
  0x1d   : > { %v2088_v34 = vsel %vm467_vm8, %v389_v28, 0.0  ;;  %826 = vrot.lane.b32.xlu1 %v2084_v32, %s1940_s12  ;;  %824 = vrot.lane.b32.xlu0 %v2086_v33, %s1940_s12  ;;  %v592_v38 = vsel %vm502_vm10, %v391_v30, 0.0  ;;  %v735_v39 = vrot.slane %v2096_v35, 2  ;;  %v646_v40 = vrot.slane %v2096_v35, 1  ;;  %v1273_v30 = vld [vmem:[%s2929_s1 + $0x8] sm:$0xff] }
  0x1e   : > { %v734_v36 = vrot.slane %v2088_v34, 2  ;;  %v645_v37 = vrot.slane %v2088_v34, 1  ;;  %v737_v41 = vrot.slane %v592_v38, 2  ;;  %v648_v42 = vrot.slane %v592_v38, 1  ;;  %1841 = vmatpush3.msra.mxu1 %v1278_v13  ;;  %1794 = vmatprep.subr.mxu0 %v1277_v18  ;;  %v294_v38 = vld [vmem:[%s2039_s9 + $0x48] sm:$0xff] }
  0x1f   : > { %v650_v48 = vrot.slane %v2086_v33, 1  ;;  %v651_v49 = vrot.slane %v2084_v32, 1  ;;  %v595_v51 = vsel %vm505_vm13, %v394_v43, 0.0  ;;  %v739_v56 = vrot.slane %v2086_v33, 2  ;;  %1833 = vmatprep.subr.mxu1 %v1277_v18  ;;  %1795 = vmatpush3.msra.mxu0 %v1277_v18 }
  0x20   : > { %v736_v44 = vsel %vm2934_vm11, %v734_v36, %v735_v39  ;;  %v647_v45 = vsel %vm644_vm12, %v645_v37, %v646_v40  ;;  %v738_v46 = vsel %vm2934_vm11, %v735_v39, %v737_v41  ;;  %v649_v47 = vsel %vm644_vm12, %v646_v40, %v648_v42  ;;  %1842 = vmatpush3.msra.mxu1 %v1277_v18  ;;  %v295_v39 = vld [vmem:[%s2039_s9 + $0x50] sm:$0xff] }
  0x21   : > { %774 = vrot.lane.b32.xlu1 %v736_v44, %s1941_s13  ;;  %685 = vrot.lane.b32.xlu0 %v647_v45, %s1942_s14  ;;  %v652_v55 = vsel %vm644_vm12, %v650_v48, %v651_v49  ;;  %v740_v57 = vrot.slane %v2084_v32, 2  ;;  %v653_v58 = vrot.slane %v595_v51, 1  ;;  %v742_v9 = vrot.slane %v595_v51, 2  ;;  %v296_v48 = vld [vmem:[%s2039_s9 + $0x58] sm:$0x3] }
  0x22   : > { %v396_v10 = vmax.f32 %v366_v63, 0.0  ;;  %v330_v11 = vmul.f32 %v2027_v4, %v293_v2  ;;  %v2153_v14 = vsel %vm473_vm1, %v395_v8, 0.0  ;;  %1796 = vmatprep.subr.mxu0 %v1276_v22  ;;  %1834 = vmatprep.subr.mxu1 %v1276_v22  ;;  %v423_v40 = vadd.s32 3, %v2013_v0  ;;  %v297_v2 = vld [vmem:[%s2039_s9 + $0x60] sm:$0xff]  ;;  %v299_v18 = vld [vmem:[%s2039_s9 + $0x70] sm:$0x3] }
  0x23   : > { %v741_v60 = vsel %vm2934_vm11, %v739_v56, %v740_v57  ;;  %v654_v61 = vsel %vm644_vm12, %v651_v49, %v653_v58  ;;  %v743_v15 = vsel %vm2934_vm11, %v740_v57, %v742_v9  ;;  %v655_v19 = vrot.slane %v2153_v14, 1  ;;  %1797 = vmatpush3.msra.mxu0 %v1276_v22  ;;  %1843 = vmatpush3.msra.mxu1 %v1276_v22 }
  0x24   : > { %v2158_v16 = vsel %vm2130_vm0, %v396_v10, 0.0  ;;  %v367_v17 = vadd.f32 %v2044_v7, %v330_v11  ;;  %1798 = vmatprep.subr.mxu0 %v1275_v23  ;;  %1835 = vmatprep.subr.mxu1 %v1275_v23  ;;  %v744_v27 = vrot.slane %v2153_v14, 2  ;;  %v331_v42 = vmul.f32 %v2027_v4, %v294_v38 }
  0x25   : > { %776 = vrot.lane.b32.xlu1 %v738_v46, %s1941_s13  ;;  %687 = vrot.lane.b32.xlu0 %v649_v47, %s1942_s14  ;;  %v656_v20 = vrot.slane %v2158_v16, 1  ;;  %v745_v28 = vrot.slane %v2158_v16, 2  ;;  %v332_v43 = vmul.f32 %v2027_v4, %v295_v39  ;;  %vm437_vm3 = vcmp.ge.s32.totalorder %v423_v40, 1  ;;  %v300_v39 = vld [vmem:[%s2039_s9 + $0x78] sm:$0xff] }
  0x26   : > { %v397_v21 = vmax.f32 %v367_v17, 0.0  ;;  %1799 = vmatpush3.msra.mxu0 %v1275_v23  ;;  %1844 = vmatpush3.msra.mxu1 %v1275_v23  ;;  %vm447_vm4 = vcmp.le.s32.totalorder %v423_v40, 16  ;;  %v368_v45 = vadd.f32 %v2044_v7, %v331_v42  ;;  %v333_v51 = vmul.f32 %v2027_v4, %v296_v48  ;;  %v301_v40 = vld [vmem:[%s2039_s9 + $0x80] sm:$0xff] }
  0x27   : > { %v657_v24 = vsel %vm644_vm12, %v655_v19, %v656_v20  ;;  %1800 = vmatprep.subr.mxu0 %v1274_v26  ;;  %1836 = vmatprep.subr.mxu1 %v1274_v26  ;;  %v746_v36 = vsel %vm2934_vm11, %v744_v27, %v745_v28  ;;  %v369_v46 = vadd.f32 %v2044_v7, %v332_v43  ;;  %vm2214_vm5 = vmand %vm437_vm3, %vm447_vm4  ;;  %v424_v8 = vadd.s32 4, %v2013_v0 }
  0x28   : > { %v598_v25 = vsel %vm508_vm2, %v397_v21, 0.0  ;;  %1801 = vmatpush3.msra.mxu0 %v1274_v26  ;;  %1845 = vmatpush3.msra.mxu1 %v1274_v26  ;;  %v398_v49 = vmax.f32 %v368_v45, 0.0  ;;  %vm476_vm8 = vmand %vm2214_vm5, %vm464_vm6  ;;  %v370_v54 = vadd.f32 %v2044_v7, %v333_v51  ;;  %v334_v10 = vmul.f32 %v2027_v4, %v297_v2 }
  0x29   : > { %689 = vrot.lane.b32.xlu1 %v652_v55, %s1942_s14  ;;  %878 = vrot.lane.b32.xlu0 %v652_v55, %s1943_s15  ;;  %v658_v29 = vrot.slane %v598_v25, 1  ;;  %v747_v41 = vrot.slane %v598_v25, 2  ;;  %v399_v50 = vmax.f32 %v369_v46, 0.0  ;;  %vm511_vm9 = vmand %vm2214_vm5, %vm499_vm7  ;;  %v335_v11 = vmul.f32 %v2027_v4, %v298_v6 }
  0x2a   : > { %1802 = vmatprep.subr.mxu0 %v1273_v30  ;;  %1837 = vmatprep.subr.mxu1 %v1273_v30  ;;  %v2228_v52 = vsel %vm476_vm8, %v398_v49, 0.0  ;;  %v400_v57 = vmax.f32 %v370_v54, 0.0  ;;  %vm438_vm10 = vcmp.ge.s32.totalorder %v424_v8, 1  ;;  %vm448_vm13 = vcmp.le.s32.totalorder %v424_v8, 16  ;;  %v302_v49 = vld [vmem:[%s2039_s9 + $0x88] sm:$0x3] }
  0x2b   : > { %v659_v37 = vsel %vm644_vm12, %v656_v20, %v658_v29  ;;  %1803 = vmatpush3.msra.mxu0 %v1273_v30  ;;  %1846 = vmatpush3.msra.mxu1 %v1273_v30  ;;  %v748_v44 = vsel %vm2934_vm11, %v745_v28, %v747_v41  ;;  %v2232_v53 = vsel %vm2214_vm5, %v399_v50, 0.0  ;;  %v660_v55 = vrot.slane %v2228_v52, 1  ;;  %vm2270_vm14 = vmand %vm438_vm10, %vm448_vm13 }
  0x2c   : > { %1804 = vmatprep.subr.mxu0 %v1272_v31  ;;  %1838 = vmatprep.subr.mxu1 %v1272_v31  ;;  %v661_v56 = vrot.slane %v2232_v53, 1  ;;  %v601_v59 = vsel %vm511_vm9, %v400_v57, 0.0  ;;  %v371_v13 = vadd.f32 %v2044_v7, %v334_v10  ;;  %vm479_vm15 = vmand %vm2270_vm14, %vm464_vm6  ;;  %v336_v21 = vmul.f32 %v2027_v4, %v299_v18 }
  0x2d   : > { %931 = vrot.lane.b32.xlu1 %v741_v60, %s1944_s16  ;;  %880 = vrot.lane.b32.xlu0 %v654_v61, %s1943_s15  ;;  %v663_v62 = vrot.slane %v601_v59, 1  ;;  %v752_v9 = vrot.slane %v601_v59, 2  ;;  %vm514_vm0 = vmand %vm2270_vm14, %vm499_vm7  ;;  %v425_v41 = vadd.s32 5, %v2013_v0  ;;  %v337_v43 = vmul.f32 %v2027_v4, %v300_v39 }
  0x2e   : > { %1805 = vmatpush3.msra.mxu0 %v1272_v31  ;;  %1847 = vmatpush3.msra.mxu1 %v1272_v31  ;;  %v662_v58 = vsel %vm644_vm12, %v660_v55, %v661_v56  ;;  %v401_v19 = vmax.f32 %v371_v13, 0.0  ;;  %vm1136_vm10 = vcmask 64512  }
  0x2f   : > { %v664_v1 = vsel %vm644_vm12, %v661_v56, %v663_v62  ;;  %vm439_vm1 = vcmp.ge.s32.totalorder %v425_v41, 1  ;;  %vm449_vm2 = vcmp.le.s32.totalorder %v425_v41, 16  ;;  %v374_v46 = vadd.f32 %v2044_v7, %v337_v43  ;;  %v305_v43 = vld [vmem:[%s2039_s9 + $0xa0] sm:$0x3] }
  0x30   : > { %v2284_v22 = vsel %vm479_vm15, %v401_v19, 0.0  ;;  %vm2326_vm3 = vmand %vm439_vm1, %vm449_vm2  ;;  %v339_v56 = vmul.f32 %v2027_v4, %v302_v49  ;;  %v342_v49 = vmul.f32 %v2027_v4, %v305_v43  ;;  %vm1187_vm1 = vcmask 261120  }
  0x31   : > { %778 = vrot.lane.b32.xlu1 %v741_v60, %s1941_s13  ;;  %691 = vrot.lane.b32.xlu0 %v654_v61, %s1942_s14  ;;  %v749_v60 = vrot.slane %v2228_v52, 2  ;;  %v750_v61 = vrot.slane %v2232_v53, 2  ;;  %v665_v25 = vrot.slane %v2284_v22, 1  ;;  %v754_v30 = vrot.slane %v2284_v22, 2  ;;  %vm482_vm4 = vmand %vm2326_vm3, %vm464_vm6 }
  0x32   : > { %v404_v50 = vmax.f32 %v374_v46, 0.0  ;;  %vm517_vm5 = vmand %vm2326_vm3, %vm499_vm7  ;;  %vm1204_vm2 = vcmask 326656  }
  0x33   : > { %v751_v63 = vsel %vm2934_vm11, %v749_v60, %v750_v61  ;;  %v753_v12 = vsel %vm2934_vm11, %v750_v61, %v752_v9  ;;  %v376_v61 = vadd.f32 %v2044_v7, %v339_v56 }
  0x34   : > { %v2344_v57 = vsel %vm482_vm4, %v404_v50, 0.0  ;;  %vm1238_vm4 = vcmask 457728  }
  0x35   : > { %981 = vrot.lane.b32.xlu1 %v2153_v14, %s1945_s8  ;;  %933 = vrot.lane.b32.xlu0 %v743_v15, %s1944_s16  ;;  %v670_v62 = vrot.slane %v2344_v57, 1  ;;  %v406_v6 = vmax.f32 %v376_v61, 0.0  ;;  %v379_v61 = vadd.f32 %v2044_v7, %v342_v49 }
  0x39   : > { %828 = vrot.lane.b32.xlu1 %v2153_v14, %s1940_s12  ;;  %780 = vrot.lane.b32.xlu0 %v743_v15, %s1941_s13  ;;  %v372_v15 = vadd.f32 %v2044_v7, %v335_v11  ;;  %v607_v11 = vsel %vm517_vm5, %v406_v6, 0.0  ;;  %vm1255_vm5 = vcmask 523264  }
  0x3b   : > { %v402_v20 = vmax.f32 %v372_v15, 0.0  ;;  %v673_v15 = vrot.slane %v607_v11, 1 }
  0x3d   : > { %1035 = vrot.lane.b32.xlu1 %v657_v24, %s1946_s29  ;;  %983 = vrot.lane.b32.xlu0 %v2158_v16, %s1945_s8  ;;  %v2288_v23 = vsel %vm2270_vm14, %v402_v20, 0.0  ;;  %vm1153_vm14 = vcmask 130048  }
  0x3e   : > { %v666_v26 = vrot.slane %v2288_v23, 1  ;;  %v755_v31 = vrot.slane %v2288_v23, 2 }
  0x40   : > { %v667_v28 = vsel %vm644_vm12, %v665_v25, %v666_v26  ;;  %v303_v25 = vld [vmem:[%s2039_s9 + $0x90] sm:$0xff] }
  0x41   : > { %882 = vrot.lane.b32.xlu1 %v657_v24, %s1943_s15  ;;  %830 = vrot.lane.b32.xlu0 %v2158_v16, %s1940_s12 }
  0x45   : > { %1088 = vrot.lane.b32.xlu1 %v746_v36, %s1947_s11  ;;  %1037 = vrot.lane.b32.xlu0 %v659_v37, %s1946_s29 }
  0x49   : > { %884 = vrot.lane.b32.xlu1 %v659_v37, %s1943_s15  ;;  %693 = vrot.lane.b32.xlu0 %v657_v24, %s1942_s14  ;;  %v373_v24 = vadd.f32 %v2044_v7, %v336_v21 }
  0x4b   : > { %v403_v27 = vmax.f32 %v373_v24, 0.0 }
  0x4d   : > { %1090 = vrot.lane.b32.xlu1 %v748_v44, %s1947_s11  ;;  %935 = vrot.lane.b32.xlu0 %v746_v36, %s1944_s16  ;;  %v604_v29 = vsel %vm514_vm0, %v403_v27, 0.0  ;;  %v426_v27 = vadd.s32 6, %v2013_v0  ;;  %vm1170_vm0 = vcmask 195584  }
  0x4e   : > { %v757_v42 = vrot.slane %v604_v29, 2 }
  0x4f   : > { %vm440_vm8 = vcmp.ge.s32.totalorder %v426_v27, 1  ;;  %vm450_vm9 = vcmp.le.s32.totalorder %v426_v27, 16 }
  0x50   : > { %v758_v45 = vsel %vm2934_vm11, %v755_v31, %v757_v42  ;;  %vm2406_vm13 = vmand %vm440_vm8, %vm450_vm9  ;;  %vm1281_vm8 = vcmask 588800  }
  0x51   : > { %782 = vrot.lane.b32.xlu1 %v746_v36, %s1941_s13  ;;  %695 = vrot.lane.b32.xlu0 %v659_v37, %s1942_s14  ;;  %v668_v36 = vrot.slane %v604_v29, 1  ;;  %v756_v37 = vsel %vm2934_vm11, %v754_v30, %v755_v31  ;;  %v340_v29 = vmul.f32 %v2027_v4, %v303_v25  ;;  %vm485_vm15 = vmand %vm2406_vm13, %vm464_vm6 }
  0x52   : > { %vm520_vm9 = vmand %vm2406_vm13, %vm499_vm7 }
  0x53   : > { %v669_v38 = vsel %vm644_vm12, %v666_v26, %v668_v36  ;;  %v304_v26 = vld [vmem:[%s2039_s9 + $0x98] sm:$0xff] }
  0x54   : > { %v341_v36 = vmul.f32 %v2027_v4, %v304_v26 }
  0x55   : > { %985 = vrot.lane.b32.xlu1 %v2228_v52, %s1945_s8  ;;  %937 = vrot.lane.b32.xlu0 %v748_v44, %s1944_s16 }
  0x56   : > { %v378_v41 = vadd.f32 %v2044_v7, %v341_v36 }
  0x58   : > { %v408_v48 = vmax.f32 %v378_v41, 0.0 }
  0x59   : > { %832 = vrot.lane.b32.xlu1 %v2228_v52, %s1940_s12  ;;  %784 = vrot.lane.b32.xlu0 %v748_v44, %s1941_s13  ;;  %v338_v44 = vmul.f32 %v2027_v4, %v301_v40 }
  0x5b   : > { %v375_v47 = vadd.f32 %v2044_v7, %v338_v44 }
  0x5d   : > { %1039 = vrot.lane.b32.xlu1 %v662_v58, %s1946_s29  ;;  %987 = vrot.lane.b32.xlu0 %v2232_v53, %s1945_s8  ;;  %v405_v55 = vmax.f32 %v375_v47, 0.0 }
  0x5f   : > { %v2350_v60 = vsel %vm2326_vm3, %v405_v55, 0.0  ;;  %vm1221_vm3 = vcmask 392192  }
  0x60   : > { %v760_v13 = vrot.slane %v2350_v60, 2 }
  0x61   : > { %886 = vrot.lane.b32.xlu1 %v662_v58, %s1943_s15  ;;  %834 = vrot.lane.b32.xlu0 %v2232_v53, %s1940_s12 }
  0x65   : > { %1092 = vrot.lane.b32.xlu1 %v751_v63, %s1947_s11  ;;  %1041 = vrot.lane.b32.xlu0 %v664_v1, %s1946_s29 }
  0x69   : > { %888 = vrot.lane.b32.xlu1 %v664_v1, %s1943_s15  ;;  %697 = vrot.lane.b32.xlu0 %v662_v58, %s1942_s14 }
  0x6d   : > { %1094 = vrot.lane.b32.xlu1 %v753_v12, %s1947_s11  ;;  %939 = vrot.lane.b32.xlu0 %v751_v63, %s1944_s16 }
  0x71   : > { %786 = vrot.lane.b32.xlu1 %v751_v63, %s1941_s13  ;;  %699 = vrot.lane.b32.xlu0 %v664_v1, %s1942_s14  ;;  %v671_v63 = vrot.slane %v2350_v60, 1 }
  0x73   : > { %v672_v8 = vsel %vm644_vm12, %v670_v62, %v671_v63  ;;  %v674_v20 = vsel %vm644_vm12, %v671_v63, %v673_v15 }
  0x75   : > { %989 = vrot.lane.b32.xlu1 %v2284_v22, %s1945_s8  ;;  %941 = vrot.lane.b32.xlu0 %v753_v12, %s1944_s16 }
  0x79   : > { %836 = vrot.lane.b32.xlu1 %v2284_v22, %s1940_s12  ;;  %788 = vrot.lane.b32.xlu0 %v753_v12, %s1941_s13  ;;  %v759_v12 = vrot.slane %v2344_v57, 2 }
  0x7b   : > { %v761_v19 = vsel %vm2934_vm11, %v759_v12, %v760_v13 }
  0x7d   : > { %1043 = vrot.lane.b32.xlu1 %v667_v28, %s1946_s29  ;;  %991 = vrot.lane.b32.xlu0 %v2288_v23, %s1945_s8 }
  0x81   : > { %890 = vrot.lane.b32.xlu1 %v667_v28, %s1943_s15  ;;  %838 = vrot.lane.b32.xlu0 %v2288_v23, %s1940_s12 }
  0x85   : > { %1096 = vrot.lane.b32.xlu1 %v756_v37, %s1947_s11  ;;  %1045 = vrot.lane.b32.xlu0 %v669_v38, %s1946_s29 }
  0x89   : > { %892 = vrot.lane.b32.xlu1 %v669_v38, %s1943_s15  ;;  %701 = vrot.lane.b32.xlu0 %v667_v28, %s1942_s14  ;;  %v762_v28 = vrot.slane %v607_v11, 2 }
  0x8d   : > { %1098 = vrot.lane.b32.xlu1 %v758_v45, %s1947_s11  ;;  %943 = vrot.lane.b32.xlu0 %v756_v37, %s1944_s16 }
  0x8f   : > { %v2333_v51 = vpop.permute.xlu1 %826  ;;  %v2335_v54 = vpop.permute.xlu0 %824 }
  0x91   : > { %790 = vrot.lane.b32.xlu1 %v756_v37, %s1941_s13  ;;  %703 = vrot.lane.b32.xlu0 %v669_v38, %s1942_s14  ;;  %v763_v37 = vsel %vm2934_vm11, %v760_v13, %v762_v28  ;;  %v377_v38 = vadd.f32 %v2044_v7, %v340_v29 }
  0x93   : > { %v2346_v58 = vpop.permute.xlu1 %774  ;;  %v686_v59 = vpop.permute.xlu0 %685 }
  0x94   : > { %v1137_v44 = vsel %vm1136_vm10, %v2088_v34, %v686_v59 }
  0x95   : > { %993 = vrot.lane.b32.xlu1 %v2344_v57, %s1945_s8  ;;  %945 = vrot.lane.b32.xlu0 %v758_v45, %s1944_s16  ;;  %v1154_v50 = vsel %vm1153_vm14, %v1137_v44, %v2346_v58  ;;  %v2434_v58 = vsel %vm2406_vm13, %v408_v48, 0.0  ;;  %v306_v44 = vld [vmem:[%s2039_s9 + $0xa8] sm:$0xff] }
  0x96   : > { %v1171_v55 = vsel %vm1170_vm0, %v1154_v50, %v2335_v54  ;;  %v676_v11 = vrot.slane %v2434_v58, 1  ;;  %v765_v29 = vrot.slane %v2434_v58, 2  ;;  %v343_v48 = vmul.f32 %v2027_v4, %v306_v44 }
  0x97   : > { %v2358_v1 = vpop.permute.xlu1 %776  ;;  %v2360_v2 = vpop.permute.xlu0 %687 }
  0x98   : > { %v1138_v63 = vsel %vm1136_vm10, %v2096_v35, %v2360_v2  ;;  %v409_v35 = vmax.f32 %v379_v61, 0.0 }
  0x99   : > { %840 = vrot.lane.b32.xlu1 %v2344_v57, %s1940_s12  ;;  %792 = vrot.lane.b32.xlu0 %v758_v45, %s1941_s13  ;;  %v407_v45 = vmax.f32 %v377_v38, 0.0  ;;  %v1155_v2 = vsel %vm1153_vm14, %v1138_v63, %v2358_v1 }
  0x9a   : > { %v610_v25 = vsel %vm520_vm9, %v409_v35, 0.0 }
  0x9b   : > { %v2370_v9 = vpop.permute.xlu1 %689  ;;  %v879_v10 = vpop.permute.xlu0 %878  ;;  %v2424_v34 = vsel %vm485_vm15, %v407_v45, 0.0  ;;  %v307_v45 = vld [vmem:[%s2039_s9 + $0xb0] sm:$0xff] }
  0x9c   : > { %v1188_v62 = vsel %vm1187_vm1, %v1171_v55, %v879_v10  ;;  %v344_v55 = vmul.f32 %v2027_v4, %v307_v45 }
  0x9d   : > { %1047 = vrot.lane.b32.xlu1 %v672_v8, %s1946_s29  ;;  %995 = vrot.lane.b32.xlu0 %v2350_v60, %s1945_s8 }
  0x9f   : > { %v932_v17 = vpop.permute.xlu1 %931  ;;  %v2377_v18 = vpop.permute.xlu0 %880 }
  0xa0   : > { %v1205_v54 = vsel %vm1204_vm2, %v1188_v62, %v932_v17  ;;  %v380_v62 = vadd.f32 %v2044_v7, %v343_v48 }
  0xa1   : > { %894 = vrot.lane.b32.xlu1 %v672_v8, %s1943_s15  ;;  %842 = vrot.lane.b32.xlu0 %v2350_v60, %s1940_s12 }
  0xa3   : > { %v2384_v21 = vpop.permute.xlu1 %778  ;;  %v2386_v24 = vpop.permute.xlu0 %691 }
  0xa5   : > { %1100 = vrot.lane.b32.xlu1 %v761_v19, %s1947_s11  ;;  %1049 = vrot.lane.b32.xlu0 %v674_v20, %s1946_s29 }
  0xa7   : > { %v982_v30 = vpop.permute.xlu1 %981  ;;  %v2394_v31 = vpop.permute.xlu0 %933 }
  0xa8   : > { %v1222_v6 = vsel %vm1221_vm3, %v1205_v54, %v982_v30  ;;  %v678_v30 = vrot.slane %v610_v25, 1 }
  0xa9   : > { %896 = vrot.lane.b32.xlu1 %v674_v20, %s1943_s15  ;;  %705 = vrot.lane.b32.xlu0 %v672_v8, %s1942_s14  ;;  %v675_v8 = vrot.slane %v2424_v34, 1 }
  0xaa   : > { %v679_v41 = vsel %vm644_vm12, %v676_v11, %v678_v30 }
  0xab   : > { %v2401_v39 = vpop.permute.xlu1 %828  ;;  %v2403_v40 = vpop.permute.xlu0 %780  ;;  %v677_v17 = vsel %vm644_vm12, %v675_v8, %v676_v11  ;;  %v308_v11 = vld [vmem:[%s2039_s9 + $0xb8] sm:$0x3] }
  0xad   : > { %1102 = vrot.lane.b32.xlu1 %v763_v37, %s1947_s11  ;;  %947 = vrot.lane.b32.xlu0 %v761_v19, %s1944_s16 }
  0xaf   : > { %v1036_v46 = vpop.permute.xlu1 %1035  ;;  %v984_v47 = vpop.permute.xlu0 %983 }
  0xb0   : > { %v1239_v10 = vsel %vm1238_vm4, %v1222_v6, %v1036_v46  ;;  %v427_v46 = vadd.s32 7, %v2013_v0  ;;  %v381_v6 = vadd.f32 %v2044_v7, %v344_v55 }
  0xb1   : > { %794 = vrot.lane.b32.xlu1 %v761_v19, %s1941_s13  ;;  %707 = vrot.lane.b32.xlu0 %v674_v20, %s1942_s14  ;;  %v1172_v19 = vsel %vm1170_vm0, %v1155_v2, %v2333_v51  ;;  %v764_v51 = vrot.slane %v2424_v34, 2  ;;  %v345_v2 = vmul.f32 %v2027_v4, %v308_v11 }
  0xb2   : > { %v1189_v26 = vsel %vm1187_vm1, %v1172_v19, %v2377_v18  ;;  %vm441_vm13 = vcmp.ge.s32.totalorder %v427_v46, 1  ;;  %vm451_vm15 = vcmp.le.s32.totalorder %v427_v46, 16  ;;  %v411_v35 = vmax.f32 %v381_v6, 0.0 }
  0xb3   : > { %v2428_v56 = vpop.permute.xlu1 %882  ;;  %v2430_v59 = vpop.permute.xlu0 %830  ;;  %v1206_v27 = vsel %vm1204_vm2, %v1189_v26, %v2394_v31  ;;  %v766_v38 = vsel %vm2934_vm11, %v764_v51, %v765_v29  ;;  %vm2505_vm9 = vmand %vm441_vm13, %vm451_vm15  ;;  %vm2951_vm13 = vcmask 1045504  }
  0xb4   : > { %v1223_v28 = vsel %vm1221_vm3, %v1206_v27, %v984_v47  ;;  %v767_v47 = vrot.slane %v610_v25, 2 }
  0xb5   : > { %997 = vrot.lane.b32.xlu1 %v2424_v34, %s1945_s8  ;;  %949 = vrot.lane.b32.xlu0 %v763_v37, %s1944_s16 }
  0xb6   : > { %v768_v61 = vsel %vm2934_vm11, %v765_v29, %v767_v47  ;;  %vm488_vm11 = vmand %vm2505_vm9, %vm464_vm6 }
  0xb7   : > { %v1089_v12 = vpop.permute.xlu1 %1088  ;;  %v1038_v13 = vpop.permute.xlu0 %1037 }
  0xb8   : > { %v1256_v15 = vsel %vm1255_vm5, %v1239_v10, %v1089_v12  ;;  %v1240_v36 = vsel %vm1238_vm4, %v1223_v28, %v1038_v13  ;;  %v410_v10 = vmax.f32 %v380_v62, 0.0  ;;  %v2534_v28 = vsel %vm2505_vm9, %v411_v35, 0.0 }
  0xb9   : > { %844 = vrot.lane.b32.xlu1 %v2424_v34, %s1940_s12  ;;  %796 = vrot.lane.b32.xlu0 %v763_v37, %s1941_s13  ;;  %v681_v29 = vrot.slane %v2534_v28, 1  ;;  %v770_v48 = vrot.slane %v2534_v28, 2 }
  0xba   : > { %1806 = vmatprep.mubr.msk.f32.mxu0 %vm1281_vm8, %v1256_v15  ;;  %v1139_v15 = vsel %vm1136_vm10, %v2086_v33, %v2370_v9  ;;  %v2524_v19 = vsel %vm488_vm11, %v410_v10, 0.0  ;;  %v382_v33 = vadd.f32 %v2044_v7, %v345_v2  ;;  %vm523_vm11 = vmand %vm2505_vm9, %vm499_vm7  ;;  %v309_v10 = vld [vmem:[%s2039_s9 + $0xc0] sm:$0xff] }
  0xbb   : > { %v2463_v1 = vpop.permute.xlu1 %884  ;;  %v2465_v20 = vpop.permute.xlu0 %693  ;;  %v680_v51 = vrot.slane %v2524_v19, 1  ;;  %v346_v2 = vmul.f32 %v2027_v4, %v309_v10 }
  0xbd   : > { %1051 = vrot.lane.b32.xlu1 %v677_v17, %s1946_s29  ;;  %999 = vrot.lane.b32.xlu0 %v2434_v58, %s1945_s8 }
  0xbf   : > { %v1091_v18 = vpop.permute.xlu1 %1090  ;;  %v936_v37 = vpop.permute.xlu0 %935 }
  0xc0   : > { %v1257_v31 = vsel %vm1255_vm5, %v1240_v36, %v1091_v18 }
  0xc1   : > { %898 = vrot.lane.b32.xlu1 %v677_v17, %s1943_s15  ;;  %846 = vrot.lane.b32.xlu0 %v2434_v58, %s1940_s12 }
  0xc2   : > { %1807 = vmatmul.mubr.msk.f32.vlgmr.msra.gmra.mxu0 %vm1281_vm8, %v1257_v31  ;;  %v412_v31 = vmax.f32 %v382_v33, 0.0 }
  0xc3   : > { %v2485_v42 = vpop.permute.xlu1 %782  ;;  %v2487_v43 = vpop.permute.xlu0 %695 }
  0xc5   : > { %1104 = vrot.lane.b32.xlu1 %v766_v38, %s1947_s11  ;;  %1053 = vrot.lane.b32.xlu0 %v679_v41, %s1946_s29 }
  0xc7   : > { %v986_v49 = vpop.permute.xlu1 %985  ;;  %v938_v50 = vpop.permute.xlu0 %937 }
  0xc9   : > { %900 = vrot.lane.b32.xlu1 %v679_v41, %s1943_s15  ;;  %709 = vrot.lane.b32.xlu0 %v677_v17, %s1942_s14  ;;  %v1156_v17 = vsel %vm1153_vm14, %v1139_v15, %v2384_v21 }
  0xca   : > { %v1173_v25 = vsel %vm1170_vm0, %v1156_v17, %v2401_v39 }
  0xcb   : > { %v2500_v63 = vpop.permute.xlu1 %832  ;;  %v2502_v54 = vpop.permute.xlu0 %784  ;;  %v1190_v9 = vsel %vm1187_vm1, %v1173_v25, %v2428_v56 }
  0xcc   : > { %v1207_v21 = vsel %vm1204_vm2, %v1190_v9, %v936_v37  ;;  %v1140_v37 = vsel %vm1136_vm10, %v2084_v32, %v2386_v24  ;;  %v613_v32 = vsel %vm523_vm11, %v412_v31, 0.0  ;;  %vm2952_vm11 = vmmov %vm2951_vm13  ;;  %v383_v9 = vadd.f32 %v2044_v7, %v346_v2  ;;  %v312_v2 = vld [vmem:[%s2039_s9 + $0xd8] sm:$0xff] }
  0xcd   : > { %1106 = vrot.lane.b32.xlu1 %v768_v61, %s1947_s11  ;;  %951 = vrot.lane.b32.xlu0 %v766_v38, %s1944_s16  ;;  %v1224_v39 = vsel %vm1221_vm3, %v1207_v21, %v986_v49  ;;  %v683_v49 = vrot.slane %v613_v32, 1  ;;  %v772_v35 = vrot.slane %v613_v32, 2 }
  0xcf   : > { %v1040_v12 = vpop.permute.xlu1 %1039  ;;  %v988_v13 = vpop.permute.xlu0 %987  ;;  %v684_v6 = vsel %vm644_vm12, %v681_v29, %v683_v49  ;;  %v773_v33 = vsel %vm2952_vm11, %v770_v48, %v772_v35 }
  0xd0   : > { %v1241_v30 = vsel %vm1238_vm4, %v1224_v39, %v1040_v12  ;;  %v310_v12 = vld [vmem:[%s2039_s9 + $0xc8] sm:$0xff] }
  0xd1   : > { %798 = vrot.lane.b32.xlu1 %v766_v38, %s1941_s13  ;;  %711 = vrot.lane.b32.xlu0 %v679_v41, %s1942_s14  ;;  %v1157_v38 = vsel %vm1153_vm14, %v1140_v37, %v2403_v40  ;;  %v682_v41 = vsel %vm644_vm12, %v680_v51, %v681_v29  ;;  %v347_v25 = vmul.f32 %v2027_v4, %v310_v12  ;;  %v311_v4 = vld [vmem:[%s2039_s9 + $0xd0] sm:$0x3] }
  0xd2   : > { %v1174_v44 = vsel %vm1170_vm0, %v1157_v38, %v2430_v59  ;;  %v769_v59 = vrot.slane %v2524_v19, 2  ;;  %v1141_v37 = vsel %vm1136_vm10, %v2153_v14, %v2465_v20  ;;  %v1899_v14 = vld [vmem:[%s2931_s3] ss:$0 sm:$0xff] }
  0xd3   : > { %v2528_v26 = vpop.permute.xlu1 %886  ;;  %v2530_v27 = vpop.permute.xlu0 %834  ;;  %v1191_v24 = vsel %vm1187_vm1, %v1174_v44, %v2463_v1  ;;  %v384_v51 = vadd.f32 %v2044_v7, %v347_v25  ;;  %v1898_v7 = vld [vmem:[%s2930_s2] ss:$0 sm:$0xff]  ;;  %v1158_v38 = vsel %vm1153_vm14, %v1141_v37, %v2485_v42 }
  0xd4   : > { %v1208_v47 = vsel %vm1204_vm2, %v1191_v24, %v938_v50  ;;  %v771_v62 = vsel %vm2951_vm13, %v769_v59, %v770_v48  ;;  %v1175_v44 = vsel %vm1170_vm0, %v1158_v38, %v2500_v63 }
  0xd5   : > { %1001 = vrot.lane.b32.xlu1 %v2524_v19, %s1945_s8  ;;  %953 = vrot.lane.b32.xlu0 %v768_v61, %s1944_s16  ;;  %v1225_v40 = vsel %vm1221_vm3, %v1208_v47, %v988_v13  ;;  %v428_v13 = vadd.s32 8, %v2013_v0  ;;  %v414_v31 = vmax.f32 %v384_v51, 0.0  ;;  %v1192_v42 = vsel %vm1187_vm1, %v1175_v44, %v2528_v26 }
  0xd7   : > { %v1093_v36 = vpop.permute.xlu1 %1092  ;;  %v1042_v18 = vpop.permute.xlu0 %1041  ;;  %vm442_vm15 = vcmp.ge.s32.totalorder %v428_v13, 1  ;;  %vm452_vm9 = vcmp.le.s32.totalorder %v428_v13, 16 }
  0xd8   : > { %v1258_v56 = vsel %vm1255_vm5, %v1241_v30, %v1093_v36  ;;  %v1242_v55 = vsel %vm1238_vm4, %v1225_v40, %v1042_v18  ;;  %vm2605_vm13 = vmand %vm442_vm15, %vm452_vm9  ;;  %v413_v30 = vmax.f32 %v383_v9, 0.0 }
  0xd9   : > { %848 = vrot.lane.b32.xlu1 %v2524_v19, %s1940_s12  ;;  %800 = vrot.lane.b32.xlu0 %v768_v61, %s1941_s13  ;;  %vm491_vm11 = vmand %vm2605_vm13, %vm464_vm6  ;;  %v2634_v47 = vsel %vm2605_vm13, %v414_v31, 0.0 }
  0xda   : > { %1809 = vmatprep.mubr.msk.f32.mxu0 %vm1281_vm8, %v1258_v56  ;;  %v348_v56 = vmul.f32 %v1898_v7, %v311_v4  ;;  %v874_v48 = vrot.slane %v2634_v47, 1  ;;  %vm526_vm15 = vmand %vm2605_vm13, %vm499_vm7  ;;  %v927_v9 = vrot.slane %v2634_v47, 2 }
  0xdb   : > { %v2564_v45 = vpop.permute.xlu1 %888  ;;  %v2566_v46 = vpop.permute.xlu0 %697 }
  0xdc   : > { %v385_v20 = vadd.f32 %v1899_v14, %v348_v56 }
  0xdd   : > { %1055 = vrot.lane.b32.xlu1 %v682_v41, %s1946_s29  ;;  %1003 = vrot.lane.b32.xlu0 %v2534_v28, %s1945_s8 }
  0xdf   : > { %v1095_v61 = vpop.permute.xlu1 %1094  ;;  %v940_v1 = vpop.permute.xlu0 %939 }
  0xe0   : > { %v1259_v50 = vsel %vm1255_vm5, %v1242_v55, %v1095_v61  ;;  %v1209_v40 = vsel %vm1204_vm2, %v1192_v42, %v940_v1  ;;  %v1142_v1 = vsel %vm1136_vm10, %v2158_v16, %v2487_v43  ;;  %v313_v43 = vld [vmem:[%s2039_s9 + $0xe0] sm:$0xff] }
  0xe1   : > { %902 = vrot.lane.b32.xlu1 %v682_v41, %s1943_s15  ;;  %850 = vrot.lane.b32.xlu0 %v2534_v28, %s1940_s12 }
  0xe2   : > { %1810 = vmatmul.mubr.msk.f32.gmra.mxu0 %vm1281_vm8, %v1259_v50  ;;  %v415_v50 = vmax.f32 %v385_v20, 0.0 }
  0xe3   : > { %v2585_v8 = vpop.permute.xlu1 %786  ;;  %v2587_v11 = vpop.permute.xlu0 %699 }
  0xe4   : > { %v616_v35 = vsel %vm526_vm15, %v415_v50, 0.0 }
  0xe5   : > { %1108 = vrot.lane.b32.xlu1 %v771_v62, %s1947_s11  ;;  %1057 = vrot.lane.b32.xlu0 %v684_v6, %s1946_s29  ;;  %v876_v51 = vrot.slane %v616_v35, 1 }
  0xe7   : > { %v990_v15 = vpop.permute.xlu1 %989  ;;  %v942_v17 = vpop.permute.xlu0 %941 }
  0xe8   : > { %v1226_v63 = vsel %vm1221_vm3, %v1209_v40, %v990_v15  ;;  %v314_v15 = vld [vmem:[%s2039_s9 + $0xe8] sm:$0x3]  ;;  %s1737_s9 = sshll.u32 %s2976_s25, 1 }
  0xe9   : > { %904 = vrot.lane.b32.xlu1 %v684_v6, %s1943_s15  ;;  %713 = vrot.lane.b32.xlu0 %v682_v41, %s1942_s14  ;;  %v614_v41 = vsel %vm491_vm11, %v413_v30, 0.0  ;;  %v350_v30 = vmul.f32 %v1898_v7, %v313_v43  ;;  %vm2955_vm11 = vcmask 1045504  }
  0xea   : > { %v873_v59 = vrot.slane %v614_v41, 1 }
  0xeb   : > { %v2600_v21 = vpop.permute.xlu1 %836  ;;  %v2602_v39 = vpop.permute.xlu0 %788 }
  0xed   : > { %1110 = vrot.lane.b32.xlu1 %v773_v33, %s1947_s11  ;;  %955 = vrot.lane.b32.xlu0 %v771_v62, %s1944_s16 }
  0xef   : > { %v1044_v36 = vpop.permute.xlu1 %1043  ;;  %v992_v18 = vpop.permute.xlu0 %991 }
  0xf0   : > { %v1243_v49 = vsel %vm1238_vm4, %v1226_v63, %v1044_v36  ;;  %v349_v36 = vmul.f32 %v1898_v7, %v312_v2 }
  0xf1   : > { %802 = vrot.lane.b32.xlu1 %v771_v62, %s1941_s13  ;;  %715 = vrot.lane.b32.xlu0 %v684_v6, %s1942_s14  ;;  %v1159_v62 = vsel %vm1153_vm14, %v1142_v1, %v2502_v54  ;;  %v875_v6 = vsel %vm644_vm12, %v873_v59, %v874_v48 }
  0xf2   : > { %v1176_v10 = vsel %vm1170_vm0, %v1159_v62, %v2530_v27  ;;  %v429_v27 = vadd.s32 9, %v2013_v0  ;;  %v386_v38 = vadd.f32 %v1899_v14, %v349_v36 }
  0xf3   : > { %v2628_v32 = vpop.permute.xlu1 %890  ;;  %v2630_v24 = vpop.permute.xlu0 %838  ;;  %v1193_v16 = vsel %vm1187_vm1, %v1176_v10, %v2564_v45 }
  0xf4   : > { %v1210_v54 = vsel %vm1204_vm2, %v1193_v16, %v942_v17  ;;  %v351_v17 = vmul.f32 %v1898_v7, %v314_v15  ;;  %vm443_vm9 = vcmp.ge.s32.totalorder %v429_v27, 1  ;;  %vm453_vm13 = vcmp.le.s32.totalorder %v429_v27, 16 }
  0xf5   : > { %1005 = vrot.lane.b32.xlu1 %v614_v41, %s1945_s8  ;;  %957 = vrot.lane.b32.xlu0 %v773_v33, %s1944_s16  ;;  %v1227_v25 = vsel %vm1221_vm3, %v1210_v54, %v992_v18  ;;  %v877_v18 = vsel %vm644_vm12, %v874_v48, %v876_v51  ;;  %v387_v7 = vadd.f32 %v1899_v14, %v350_v30  ;;  %vm2691_vm15 = vmand %vm443_vm9, %vm453_vm13  ;;  %v416_v63 = vmax.f32 %v386_v38, 0.0 }
  0xf6   : > { %vm494_vm9 = vmand %vm2691_vm15, %vm464_vm6  ;;  %vm2958_vm13 = vcmask 1045504  }
  0xf7   : > { %v1097_v55 = vpop.permute.xlu1 %1096  ;;  %v1046_v61 = vpop.permute.xlu0 %1045  ;;  %v417_v40 = vmax.f32 %v387_v7, 0.0  ;;  %vm2959_vm6 = vmmov %vm2958_vm13 }
  0xf8   : > { %v1260_v26 = vsel %vm1255_vm5, %v1243_v49, %v1097_v55  ;;  %v1244_v45 = vsel %vm1238_vm4, %v1227_v25, %v1046_v61  ;;  %v617_v55 = vsel %vm494_vm9, %v416_v63, 0.0 }
  0xf9   : > { %852 = vrot.lane.b32.xlu1 %v614_v41, %s1940_s12  ;;  %804 = vrot.lane.b32.xlu0 %v773_v33, %s1941_s13  ;;  %v926_v33 = vrot.slane %v614_v41, 2  ;;  %v388_v41 = vadd.f32 %v1899_v14, %v351_v17  ;;  %v618_v5 = vsel %vm2691_vm15, %v417_v40, 0.0  ;;  %v1030_v50 = vrot.slane %v617_v55, 1 }
  0xfa   : > { %1812 = vmatprep.mubr.msk.f32.mxu0 %vm1281_vm8, %v1260_v26  ;;  %v1031_v3 = vrot.slane %v618_v5, 1  ;;  %v1084_v10 = vrot.slane %v618_v5, 2 }
  0xfb   : > { %v2663_v12 = vpop.permute.xlu1 %892  ;;  %v2665_v13 = vpop.permute.xlu0 %701  ;;  %v928_v0 = vsel %vm2955_vm11, %v926_v33, %v927_v9  ;;  %vm529_vm11 = vmand %vm2691_vm15, %vm499_vm7  ;;  %v418_v59 = vmax.f32 %v388_v41, 0.0 }
  0xfc   : > { %v1032_v2 = vsel %vm644_vm12, %v1030_v50, %v1031_v3  ;;  %vm2960_vm7 = vmmov %vm2959_vm6 }
  0xfd   : > { %1059 = vrot.lane.b32.xlu1 %v875_v6, %s1946_s29  ;;  %1007 = vrot.lane.b32.xlu0 %v2634_v47, %s1945_s8  ;;  %v619_v61 = vsel %vm529_vm11, %v418_v59, 0.0 }
  0xfe   : > { %v1033_v26 = vrot.slane %v619_v61, 1  ;;  %v1086_v15 = vrot.slane %v619_v61, 2 }
  0xff   : > { %v1099_v29 = vpop.permute.xlu1 %1098  ;;  %v944_v4 = vpop.permute.xlu0 %943 }
 0x100   : > { %v1261_v31 = vsel %vm1255_vm5, %v1244_v45, %v1099_v29  ;;  %v1034_v43 = vsel %vm644_vm12, %v1031_v3, %v1033_v26  ;;  %v1087_v33 = vsel %vm2959_vm6, %v1084_v10, %v1086_v15  ;;  %vm1528_vm12 = vcmask 57344  }
 0x101   : > { %906 = vrot.lane.b32.xlu1 %v875_v6, %s1943_s15  ;;  %854 = vrot.lane.b32.xlu0 %v2634_v47, %s1940_s12  ;;  %v929_v47 = vrot.slane %v616_v35, 2  ;;  %v1143_v6 = vsel %vm1136_vm10, %v2228_v52, %v2566_v46  ;;  %v1083_v35 = vrot.slane %v617_v55, 2  ;;  %s1738_s12 = sshll.u32 %s2972_s19, 5 }
 0x102   : > { %1813 = vmatmul.mubr.msk.f32.gmra.mxu0 %vm1281_vm8, %v1261_v31  ;;  %v1160_v16 = vsel %vm1153_vm14, %v1143_v6, %v2585_v8  ;;  %s273_s13 = sadd.s32 %s1738_s12, %s1737_s9 }
 0x103   : > { %v2687_v56 = vpop.permute.xlu1 %790  ;;  %v2689_v37 = vpop.permute.xlu0 %703  ;;  %v930_v14 = vsel %vm2958_vm13, %v927_v9, %v929_v47  ;;  %v1177_v54 = vsel %vm1170_vm0, %v1160_v16, %v2600_v21  ;;  %v1085_v9 = vsel %vm2960_vm7, %v1083_v35, %v1084_v10  ;;  %s1739_s25 = sshll.u32 %s273_s13, 3 }
 0x104   : > { %v1194_v52 = vsel %vm1187_vm1, %v1177_v54, %v2628_v32  ;;  %v1144_v32 = vsel %vm1136_vm10, %v2232_v53, %v2587_v11 }
 0x105   : > { %1112 = vrot.lane.b32.xlu1 %v928_v0, %s1947_s11  ;;  %1061 = vrot.lane.b32.xlu0 %v877_v18, %s1946_s29  ;;  %v1211_v46 = vsel %vm1204_vm2, %v1194_v52, %v944_v4  ;;  %v1161_v4 = vsel %vm1153_vm14, %v1144_v32, %v2602_v39 }
 0x106   : > { %v1178_v30 = vsel %vm1170_vm0, %v1161_v4, %v2630_v24 }
 0x107   : > { %v994_v20 = vpop.permute.xlu1 %993  ;;  %v946_v42 = vpop.permute.xlu0 %945  ;;  %v1195_v31 = vsel %vm1187_vm1, %v1178_v30, %v2663_v12 }
 0x108   : > { %v1228_v8 = vsel %vm1221_vm3, %v1211_v46, %v994_v20 }
 0x109   : > { %959 = vrot.lane.b32.xlu1 %v928_v0, %s1944_s16  ;;  %908 = vrot.lane.b32.xlu0 %v877_v18, %s1943_s15  ;;  %v1212_v0 = vsel %vm1204_vm2, %v1195_v31, %v946_v42  ;;  %v1145_v42 = vsel %vm1136_vm10, %v2284_v22, %v2665_v13  ;;  %v1146_v22 = vsel %vm1136_vm10, %v2288_v23, %v2689_v37 }
 0x10a   : > { %v1162_v63 = vsel %vm1153_vm14, %v1145_v42, %v2687_v56 }
 0x10b   : > { %v841_v48 = vpop.permute.xlu1 %840  ;;  %v2708_v49 = vpop.permute.xlu0 %792 }
 0x10c   : > { %v1179_v59 = vsel %vm1170_vm0, %v1162_v63, %v841_v48  ;;  %v1163_v13 = vsel %vm1153_vm14, %v1146_v22, %v2708_v49 }
 0x10d   : > { %961 = vrot.lane.b32.xlu1 %v930_v14, %s1944_s16  ;;  %1114 = vrot.lane.b32.xlu0 %v930_v14, %s1947_s11  ;;  %s2820_s16 = scalar_lea.vmem %s2932_s4, %s1739_s25 }
 0x10f   : > { %v1048_v1 = vpop.permute.xlu1 %1047  ;;  %v996_v62 = vpop.permute.xlu0 %995 }
 0x110   : > { %v1245_v51 = vsel %vm1238_vm4, %v1228_v8, %v1048_v1  ;;  %v1229_v53 = vsel %vm1221_vm3, %v1212_v0, %v996_v62 }
 0x111   : > { %1011 = vrot.lane.b32.xlu1 %v618_v5, %s1945_s8  ;;  %1009 = vrot.lane.b32.xlu0 %v617_v55, %s1945_s8  ;;  %s1740_s8 = sshll.u32 %s2972_s19, 1 }
 0x113   : > { %v895_v27 = vpop.permute.xlu1 %894  ;;  %v843_v25 = vpop.permute.xlu0 %842 }
 0x114   : > { %v1196_v55 = vsel %vm1187_vm1, %v1179_v59, %v895_v27  ;;  %v1180_v56 = vsel %vm1170_vm0, %v1163_v13, %v843_v25 }
 0x115   : > { %1065 = vrot.lane.b32.xlu1 %v1034_v43, %s1946_s29  ;;  %1063 = vrot.lane.b32.xlu0 %v1032_v2, %s1946_s29  ;;  %s282_s29 = sadd.s32 %s1740_s8, %s2974_s18 }
 0x116   : > { %s1741_s30 = sshll.u32 %s282_s29, 1 }
 0x117   : > { %v1101_v21 = vpop.permute.xlu1 %1100  ;;  %v1050_v45 = vpop.permute.xlu0 %1049  ;;  %s284_s10 = scalar_lea.vmem %s2933_s5, %s1741_s30 }
 0x118   : > { %v1262_v29 = vsel %vm1255_vm5, %v1245_v51, %v1101_v21  ;;  %v1246_v11 = vsel %vm1238_vm4, %v1229_v53, %v1050_v45 }
 0x119   : > { %1118 = vrot.lane.b32.xlu1 %v1087_v33, %s1947_s11  ;;  %1116 = vrot.lane.b32.xlu0 %v1085_v9, %s1947_s11 }
 0x11a   : > { %1815 = vmatprep.mubr.msk.f32.mxu0 %vm1281_vm8, %v1262_v29 }
 0x11b   : > { %v897_v36 = vpop.permute.xlu1 %896  ;;  %v706_v17 = vpop.permute.xlu0 %705 }
 0x11c   : > { %v1197_v10 = vsel %vm1187_vm1, %v1180_v56, %v897_v36  ;;  %v1147_v33 = vsel %vm1136_vm10, %v2344_v57, %v706_v17 }
 0x11f   : > { %v1103_v18 = vpop.permute.xlu1 %1102  ;;  %v948_v7 = vpop.permute.xlu0 %947 }
 0x120   : > { %v1263_v39 = vsel %vm1255_vm5, %v1246_v11, %v1103_v18  ;;  %v1213_v61 = vsel %vm1204_vm2, %v1196_v55, %v948_v7 }
 0x121   : > { %1816 = vmatmul.mubr.msk.f32.gmra.mxu0 %vm1281_vm8, %v1263_v39 }
 0x123   : > { %v795_v38 = vpop.permute.xlu1 %794  ;;  %v708_v41 = vpop.permute.xlu0 %707 }
 0x124   : > { %v1164_v9 = vsel %vm1153_vm14, %v1147_v33, %v795_v38  ;;  %v1148_v57 = vsel %vm1136_vm10, %v2350_v60, %v708_v41 }
 0x127   : > { %v998_v24 = vpop.permute.xlu1 %997  ;;  %v950_v44 = vpop.permute.xlu0 %949 }
 0x128   : > { %v1230_v3 = vsel %vm1221_vm3, %v1213_v61, %v998_v24  ;;  %v1214_v35 = vsel %vm1204_vm2, %v1197_v10, %v950_v44 }
 0x12b   : > { %v845_v47 = vpop.permute.xlu1 %844  ;;  %v797_v20 = vpop.permute.xlu0 %796 }
 0x12c   : > { %v1181_v51 = vsel %vm1170_vm0, %v1164_v9, %v845_v47  ;;  %v1165_v17 = vsel %vm1153_vm14, %v1148_v57, %v797_v20 }
 0x12f   : > { %v1052_v40 = vpop.permute.xlu1 %1051  ;;  %v1000_v12 = vpop.permute.xlu0 %999 }
 0x130   : > { %v1247_v50 = vsel %vm1238_vm4, %v1230_v3, %v1052_v40  ;;  %v1231_v16 = vsel %vm1221_vm3, %v1214_v35, %v1000_v12 }
 0x133   : > { %v899_v14 = vpop.permute.xlu1 %898  ;;  %v847_v5 = vpop.permute.xlu0 %846 }
 0x134   : > { %v1198_v29 = vsel %vm1187_vm1, %v1181_v51, %v899_v14  ;;  %v1182_v53 = vsel %vm1170_vm0, %v1165_v17, %v847_v5 }
 0x137   : > { %v1105_v26 = vpop.permute.xlu1 %1104  ;;  %v1054_v1 = vpop.permute.xlu0 %1053 }
 0x138   : > { %v1264_v62 = vsel %vm1255_vm5, %v1247_v50, %v1105_v26  ;;  %v1248_v43 = vsel %vm1238_vm4, %v1231_v16, %v1054_v1 }
 0x139   : > { %1818 = vmatprep.mubr.msk.f32.mxu1 %vm1281_vm8, %v1264_v62 }
 0x13b   : > { %v901_v48 = vpop.permute.xlu1 %900  ;;  %v710_v6 = vpop.permute.xlu0 %709 }
 0x13c   : > { %v1199_v7 = vsel %vm1187_vm1, %v1182_v53, %v901_v48  ;;  %v1149_v5 = vsel %vm1136_vm10, %v2424_v34, %v710_v6 }
 0x13f   : > { %v1107_v2 = vpop.permute.xlu1 %1106  ;;  %v952_v15 = vpop.permute.xlu0 %951 }
 0x140   : > { %v1265_v23 = vsel %vm1255_vm5, %v1248_v43, %v1107_v2  ;;  %v1215_v32 = vsel %vm1204_vm2, %v1198_v29, %v952_v15 }
 0x141   : > { %1819 = vmatmul.mubr.msk.f32.vlgmr.msra.gmra.mxu1 %vm1281_vm8, %v1265_v23 }
 0x143   : > { %v799_v37 = vpop.permute.xlu1 %798  ;;  %v712_v49 = vpop.permute.xlu0 %711 }
 0x144   : > { %v1166_v55 = vsel %vm1153_vm14, %v1149_v5, %v799_v37  ;;  %v1150_v48 = vsel %vm1136_vm10, %v2434_v58, %v712_v49 }
 0x147   : > { %v1002_v54 = vpop.permute.xlu1 %1001  ;;  %v954_v27 = vpop.permute.xlu0 %953 }
 0x148   : > { %v1232_v4 = vsel %vm1221_vm3, %v1215_v32, %v1002_v54  ;;  %v1216_v39 = vsel %vm1204_vm2, %v1199_v7, %v954_v27 }
 0x14b   : > { %v849_v25 = vpop.permute.xlu1 %848  ;;  %v801_v52 = vpop.permute.xlu0 %800 }
 0x14c   : > { %v1183_v61 = vsel %vm1170_vm0, %v1166_v55, %v849_v25  ;;  %v1167_v6 = vsel %vm1153_vm14, %v1150_v48, %v801_v52 }
 0x14f   : > { %v1056_v46 = vpop.permute.xlu1 %1055  ;;  %v1004_v8 = vpop.permute.xlu0 %1003 }
 0x150   : > { %v1249_v30 = vsel %vm1238_vm4, %v1232_v4, %v1056_v46  ;;  %v1233_v38 = vsel %vm1221_vm3, %v1216_v39, %v1004_v8 }
 0x153   : > { %v903_v21 = vpop.permute.xlu1 %902  ;;  %v851_v45 = vpop.permute.xlu0 %850 }
 0x154   : > { %v1200_v26 = vsel %vm1187_vm1, %v1183_v61, %v903_v21  ;;  %v1184_v10 = vsel %vm1170_vm0, %v1167_v6, %v851_v45 }
 0x157   : > { %v1109_v36 = vpop.permute.xlu1 %1108  ;;  %v1058_v31 = vpop.permute.xlu0 %1057 }
 0x158   : > { %v1266_v0 = vsel %vm1255_vm5, %v1249_v30, %v1109_v36  ;;  %v1250_v24 = vsel %vm1238_vm4, %v1233_v38, %v1058_v31 }
 0x159   : > { %1821 = vmatprep.mubr.msk.f32.mxu1 %vm1281_vm8, %v1266_v0 }
 0x15b   : > { %v905_v11 = vpop.permute.xlu1 %904  ;;  %v714_v18 = vpop.permute.xlu0 %713 }
 0x15c   : > { %v1201_v43 = vsel %vm1187_vm1, %v1184_v10, %v905_v11  ;;  %v1151_v46 = vsel %vm1136_vm10, %v2524_v19, %v714_v18 }
 0x15f   : > { %v1111_v44 = vpop.permute.xlu1 %1110  ;;  %v956_v60 = vpop.permute.xlu0 %955 }
 0x160   : > { %v1267_v41 = vsel %vm1255_vm5, %v1250_v24, %v1111_v44  ;;  %v1217_v1 = vsel %vm1204_vm2, %v1200_v26, %v956_v60 }
 0x161   : > { %1822 = vmatmul.mubr.msk.f32.gmra.mxu1 %vm1281_vm8, %v1267_v41 }
 0x163   : > { %v803_v47 = vpop.permute.xlu1 %802  ;;  %v716_v20 = vpop.permute.xlu0 %715 }
 0x164   : > { %v1152_v33 = vsel %vm1136_vm10, %v2534_v28, %v716_v20  ;;  %v1168_v45 = vsel %vm1153_vm14, %v1151_v46, %v803_v47 }
 0x167   : > { %v1006_v40 = vpop.permute.xlu1 %1005  ;;  %v958_v12 = vpop.permute.xlu0 %957 }
 0x168   : > { %v1234_v62 = vsel %vm1221_vm3, %v1217_v1, %v1006_v40  ;;  %v1218_v2 = vsel %vm1204_vm2, %v1201_v43, %v958_v12 }
 0x16b   : > { %v853_v42 = vpop.permute.xlu1 %852  ;;  %v805_v63 = vpop.permute.xlu0 %804 }
 0x16c   : > { %v1169_v29 = vsel %vm1153_vm14, %v1152_v33, %v805_v63  ;;  %v1185_v4 = vsel %vm1170_vm0, %v1168_v45, %v853_v42 }
 0x16f   : > { %v1060_v59 = vpop.permute.xlu1 %1059  ;;  %v1008_v14 = vpop.permute.xlu0 %1007 }
 0x170   : > { %v1251_v22 = vsel %vm1238_vm4, %v1234_v62, %v1060_v59  ;;  %v1235_v15 = vsel %vm1221_vm3, %v1218_v2, %v1008_v14 }
 0x173   : > { %v907_v3 = vpop.permute.xlu1 %906  ;;  %v855_v50 = vpop.permute.xlu0 %854 }
 0x174   : > { %v1186_v19 = vsel %vm1170_vm0, %v1169_v29, %v855_v50  ;;  %v1202_v0 = vsel %vm1187_vm1, %v1185_v4, %v907_v3 }
 0x177   : > { %v1113_v13 = vpop.permute.xlu1 %1112  ;;  %v1062_v56 = vpop.permute.xlu0 %1061 }
 0x178   : > { %v1268_v34 = vsel %vm1255_vm5, %v1251_v22, %v1113_v13  ;;  %v1252_v23 = vsel %vm1238_vm4, %v1235_v15, %v1062_v56 }
 0x179   : > { %1824 = vmatprep.mubr.msk.f32.mxu1 %vm1281_vm8, %v1268_v34 }
 0x17b   : > { %v960_v35 = vpop.permute.xlu1 %959  ;;  %v909_v16 = vpop.permute.xlu0 %908 }
 0x17c   : > { %v1203_v57 = vsel %vm1187_vm1, %v1186_v19, %v909_v16  ;;  %v1219_v53 = vsel %vm1204_vm2, %v1202_v0, %v960_v35 }
 0x17f   : > { %v962_v37 = vpop.permute.xlu1 %961  ;;  %v1115_v58 = vpop.permute.xlu0 %1114 }
 0x180   : > { %v1269_v49 = vsel %vm1255_vm5, %v1252_v23, %v1115_v58  ;;  %v1220_v11 = vsel %vm1204_vm2, %v1203_v57, %v962_v37 }
 0x181   : > { %1825 = vmatmul.mubr.msk.f32.gmra.mxu1 %vm1281_vm8, %v1269_v49 }
 0x182   : > { %v1808_v54 = vpop.f32.mrf.mxu0 }
 0x183   : > { %1476 = vst.msk [vmem:[%s2820_s16 + $0x8] sm:$0xff] %vm1136_vm10, %v1808_v54  ;;  %v1531_v27 = vmul.f32 %v1808_v54, %v1808_v54  ;;  %v1012_v25 = vpop.permute.xlu1 %1011  ;;  %v1010_v52 = vpop.permute.xlu0 %1009  ;;  %v1492_v9 = vsel %vm1136_vm10, %v1808_v54, 0.0 }
 0x184   : > { %v1396_v8 = vpop.f32.mrf.mxu0  ;;  %v1237_v18 = vsel %vm1221_vm3, %v1220_v11, %v1012_v25  ;;  %v1236_v7 = vsel %vm1221_vm3, %v1219_v53, %v1010_v52 }
 0x185   : > { %1475 = vst.msk [vmem:[%s2820_s16] sm:$0xff] %vm1136_vm10, %v1396_v8  ;;  %v1491_v51 = vsel %vm1136_vm10, %v1396_v8, 0.0  ;;  %v1530_v21 = vmul.f32 %v1396_v8, %v1396_v8  ;;  %v1547_v30 = vsel %vm1136_vm10, %v1531_v27, 0.0 }
 0x186   : > { %v1493_v32 = vadd.f32 %v1492_v9, %v1491_v51 }
 0x187   : > { %v1546_v28 = vsel %vm1136_vm10, %v1530_v21, 0.0  ;;  %v1066_v36 = vpop.permute.xlu1 %1065  ;;  %v1064_v31 = vpop.permute.xlu0 %1063 }
 0x188   : > { %v1548_v17 = vadd.f32 %v1547_v30, %v1546_v28  ;;  %v1254_v39 = vsel %vm1238_vm4, %v1237_v18, %v1066_v36  ;;  %v1253_v38 = vsel %vm1238_vm4, %v1236_v7, %v1064_v31 }
 0x18b   : > { %v1119_v24 = vpop.permute.xlu1 %1118  ;;  %v1117_v44 = vpop.permute.xlu0 %1116 }
 0x18c   : > { %v1271_v60 = vsel %vm1255_vm5, %v1254_v39, %v1119_v24  ;;  %v1270_v41 = vsel %vm1255_vm5, %v1253_v38, %v1117_v44 }
 0x18d   : > { %1827 = vmatprep.mubr.msk.f32.mxu1 %vm1281_vm8, %v1270_v41 }
 0x18e   : > { %1828 = vmatmul.mubr.msk.f32.gmra.mxu1 %vm1281_vm8, %v1271_v60 }
 0x1a2   : > { %v1811_v47 = vpop.f32.mrf.mxu0 }
 0x1a3   : > { %1478 = vst.msk [vmem:[%s2820_s16 + $0x18] sm:$0xff] %vm1136_vm10, %v1811_v47  ;;  %v1533_v40 = vmul.f32 %v1811_v47, %v1811_v47  ;;  %v1496_v59 = vsel %vm1136_vm10, %v1811_v47, 0.0 }
 0x1a4   : > { %v1406_v20 = vpop.f32.mrf.mxu0 }
 0x1a5   : > { %1477 = vst.msk [vmem:[%s2820_s16 + $0x10] sm:$0xff] %vm1136_vm10, %v1406_v20  ;;  %v1494_v12 = vsel %vm1136_vm10, %v1406_v20, 0.0  ;;  %v1532_v42 = vmul.f32 %v1406_v20, %v1406_v20  ;;  %v1551_v61 = vsel %vm1136_vm10, %v1533_v40, 0.0 }
 0x1a6   : > { %v1495_v63 = vadd.f32 %v1494_v12, %v1493_v32 }
 0x1a7   : > { %v1549_v14 = vsel %vm1136_vm10, %v1532_v42, 0.0 }
 0x1a8   : > { %v1550_v5 = vadd.f32 %v1549_v14, %v1548_v17  ;;  %v1497_v55 = vadd.f32 %v1496_v59, %v1495_v63 }
 0x1aa   : > { %v1552_v3 = vadd.f32 %v1551_v61, %v1550_v5 }
 0x1c2   : > { %v1814_v50 = vpop.f32.mrf.mxu0 }
 0x1c3   : > { %1480 = vst.msk [vmem:[%s2820_s16 + $0x28] sm:$0xff] %vm1136_vm10, %v1814_v50  ;;  %v1535_v1 = vmul.f32 %v1814_v50, %v1814_v50  ;;  %v1500_v56 = vsel %vm1136_vm10, %v1814_v50, 0.0 }
 0x1c4   : > { %v1416_v26 = vpop.f32.mrf.mxu0 }
 0x1c5   : > { %1479 = vst.msk [vmem:[%s2820_s16 + $0x20] sm:$0xff] %vm1136_vm10, %v1416_v26  ;;  %v1498_v62 = vsel %vm1136_vm10, %v1416_v26, 0.0  ;;  %v1534_v22 = vmul.f32 %v1416_v26, %v1416_v26  ;;  %v1555_v10 = vsel %vm1136_vm10, %v1535_v1, 0.0 }
 0x1c6   : > { %v1499_v13 = vadd.f32 %v1498_v62, %v1497_v55 }
 0x1c7   : > { %v1553_v34 = vsel %vm1136_vm10, %v1534_v22, 0.0 }
 0x1c8   : > { %v1554_v48 = vadd.f32 %v1553_v34, %v1552_v3  ;;  %v1501_v6 = vadd.f32 %v1500_v56, %v1499_v13 }
 0x1ca   : > { %v1556_v35 = vadd.f32 %v1555_v10, %v1554_v48 }
 0x1e1   : > { %v1817_v16 = vpop.f32.mrf.mxu0 }
 0x1e2   : > { %1482 = vst.msk [vmem:[%s2820_s16 + $0x38] sm:$0xff] %vm1136_vm10, %v1817_v16  ;;  %v1537_v2 = vmul.f32 %v1817_v16, %v1817_v16  ;;  %v1504_v58 = vsel %vm1136_vm10, %v1817_v16, 0.0 }
 0x1e3   : > { %v1426_v43 = vpop.f32.mrf.mxu0 }
 0x1e4   : > { %1481 = vst.msk [vmem:[%s2820_s16 + $0x30] sm:$0xff] %vm1136_vm10, %v1426_v43  ;;  %v1502_v15 = vsel %vm1136_vm10, %v1426_v43, 0.0  ;;  %v1536_v23 = vmul.f32 %v1426_v43, %v1426_v43  ;;  %v1559_v25 = vsel %vm1136_vm10, %v1537_v2, 0.0 }
 0x1e5   : > { %v1503_v37 = vadd.f32 %v1502_v15, %v1501_v6 }
 0x1e6   : > { %v1557_v49 = vsel %vm1136_vm10, %v1536_v23, 0.0 }
 0x1e7   : > { %v1505_v54 = vadd.f32 %v1504_v58, %v1503_v37  ;;  %v1558_v27 = vadd.f32 %v1557_v49, %v1556_v35 }
 0x1e9   : > { %v1560_v52 = vadd.f32 %v1559_v25, %v1558_v27 }
 0x201   : > { %v1820_v46 = vpop.f32.mrf.mxu1 }
 0x202   : > { %1484 = vst.msk [vmem:[%s2820_s16 + $0x48] sm:$0xff] %vm1136_vm10, %v1820_v46  ;;  %v1539_v33 = vmul.f32 %v1820_v46, %v1820_v46  ;;  %v1508_v45 = vsel %vm1136_vm10, %v1820_v46, 0.0 }
 0x203   : > { %v1436_v8 = vpop.f32.mrf.mxu1 }
 0x204   : > { %1483 = vst.msk [vmem:[%s2820_s16 + $0x40] sm:$0xff] %vm1136_vm10, %v1436_v8  ;;  %v1506_v9 = vsel %vm1136_vm10, %v1436_v8, 0.0  ;;  %v1538_v51 = vmul.f32 %v1436_v8, %v1436_v8  ;;  %v1563_v19 = vsel %vm1136_vm10, %v1539_v33, 0.0 }
 0x205   : > { %v1507_v21 = vadd.f32 %v1506_v9, %v1505_v54 }
 0x206   : > { %v1561_v29 = vsel %vm1136_vm10, %v1538_v51, 0.0 }
 0x207   : > { %v1562_v32 = vadd.f32 %v1561_v29, %v1560_v52  ;;  %v1509_v4 = vadd.f32 %v1508_v45, %v1507_v21 }
 0x209   : > { %v1564_v30 = vadd.f32 %v1563_v19, %v1562_v32 }
 0x221   : > { %v1823_v28 = vpop.f32.mrf.mxu1 }
 0x222   : > { %1486 = vst.msk [vmem:[%s2820_s16 + $0x58] sm:$0xff] %vm1136_vm10, %v1823_v28  ;;  %v1541_v18 = vmul.f32 %v1823_v28, %v1823_v28  ;;  %v1512_v38 = vsel %vm1136_vm10, %v1823_v28, 0.0 }
 0x223   : > { %v1446_v36 = vpop.f32.mrf.mxu1 }
 0x224   : > { %1485 = vst.msk [vmem:[%s2820_s16 + $0x50] sm:$0xff] %vm1136_vm10, %v1446_v36  ;;  %v1540_v31 = vmul.f32 %v1446_v36, %v1446_v36  ;;  %v1510_v57 = vsel %vm1136_vm10, %v1446_v36, 0.0  ;;  %v1567_v60 = vsel %vm1136_vm10, %v1541_v18, 0.0 }
 0x225   : > { %v1511_v11 = vadd.f32 %v1510_v57, %v1509_v4 }
 0x226   : > { %v1565_v53 = vsel %vm1136_vm10, %v1540_v31, 0.0 }
 0x227   : > { %v1566_v39 = vadd.f32 %v1565_v53, %v1564_v30  ;;  %v1513_v44 = vadd.f32 %v1512_v38, %v1511_v11 }
 0x229   : > { %v1568_v20 = vadd.f32 %v1567_v60, %v1566_v39 }
 0x241   : > { %v1826_v0 = vpop.f32.mrf.mxu1 }
 0x242   : > { %1488 = vst.msk [vmem:[%s2820_s16 + $0x68] sm:$0xff] %vm1136_vm10, %v1826_v0  ;;  %v1543_v40 = vmul.f32 %v1826_v0, %v1826_v0  ;;  %v1516_v63 = vsel %vm1136_vm10, %v1826_v0, 0.0 }
 0x243   : > { %v1456_v17 = vpop.f32.mrf.mxu1 }
 0x244   : > { %1487 = vst.msk [vmem:[%s2820_s16 + $0x60] sm:$0xff] %vm1136_vm10, %v1456_v17  ;;  %v1542_v7 = vmul.f32 %v1456_v17, %v1456_v17  ;;  %v1514_v24 = vsel %vm1136_vm10, %v1456_v17, 0.0  ;;  %v1571_v5 = vsel %vm1136_vm10, %v1543_v40, 0.0 }
 0x245   : > { %v1515_v47 = vadd.f32 %v1514_v24, %v1513_v44 }
 0x246   : > { %v1569_v41 = vsel %vm1136_vm10, %v1542_v7, 0.0 }
 0x247   : > { %v1570_v12 = vadd.f32 %v1569_v41, %v1568_v20  ;;  %v1517_v14 = vadd.f32 %v1516_v63, %v1515_v47 }
 0x249   : > { %v1572_v26 = vadd.f32 %v1571_v5, %v1570_v12 }
 0x24e   : > { %v1829_v42 = vpop.f32.mrf.mxu1 }
 0x24f   : > { %1490 = vst.msk [vmem:[%s2820_s16 + $0x78] sm:$0xff] %vm1136_vm10, %v1829_v42  ;;  %v1545_v55 = vmul.f32 %v1829_v42, %v1829_v42  ;;  %v1520_v1 = vsel %vm1136_vm10, %v1829_v42, 0.0 }
 0x250   : > { %v1466_v59 = vpop.f32.mrf.mxu1 }
 0x251   : > { %1489 = vst.msk [vmem:[%s2820_s16 + $0x70] sm:$0xff] %vm1136_vm10, %v1466_v59  ;;  %v1518_v61 = vsel %vm1136_vm10, %v1466_v59, 0.0  ;;  %v1544_v3 = vmul.f32 %v1466_v59, %v1466_v59  ;;  %v1575_v56 = vsel %vm1136_vm10, %v1545_v55, 0.0 }
 0x252   : > { %v1519_v50 = vadd.f32 %v1518_v61, %v1517_v14 }
 0x253   : > { %v1573_v62 = vsel %vm1136_vm10, %v1544_v3, 0.0 }
 0x254   : > { %v1521_v22 = vadd.f32 %v1520_v1, %v1519_v50  ;;  %v1574_v13 = vadd.f32 %v1573_v62, %v1572_v26 }
 0x256   : > { %v1522_v34 = vrot.slane %v1521_v22, 4  ;;  %v1576_v48 = vadd.f32 %v1575_v56, %v1574_v13 }
 0x258   : > { %v1523_v6 = vadd.f32 %v1522_v34, %v1521_v22  ;;  %v1577_v10 = vrot.slane %v1576_v48, 4 }
 0x25a   : > { %v1524_v35 = vrot.slane %v1523_v6, 2  ;;  %v1578_v16 = vadd.f32 %v1577_v10, %v1576_v48 }
 0x25c   : > { %v1525_v43 = vadd.f32 %v1524_v35, %v1523_v6  ;;  %v1579_v2 = vrot.slane %v1578_v16, 2 }
 0x25e   : > { %v1526_v15 = vrot.slane %v1525_v43, 1  ;;  %v1580_v23 = vadd.f32 %v1579_v2, %v1578_v16 }
 0x260   : > { %v1527_v37 = vadd.f32 %v1526_v15, %v1525_v43  ;;  %v1581_v58 = vrot.slane %v1580_v23, 1 }
 0x262   : > { %1529 = vst.msk [vmem:[%s284_s10] sm:$0x1] %vm1528_vm12, %v1527_v37  ;;  %v1582_v49 = vadd.f32 %v1581_v58, %v1580_v23 }
 0x264   : > { %1583 = vst.msk [vmem:[%s284_s10 + $0x1] sm:$0x1] %vm1528_vm12, %v1582_v49 }
 0x265 PF: > { %s16_s22 = sadd.s32 1, %s1938_s22   ;;  %s2961_s18 = smov %s1930_s20 }
 0x266   : > { %p13_p8 = scmp.ge.s32.totalorder %s16_s22, 6   ;;  %s2962_s19 = smov %s1934_s21 }
 0x267   : > { %s2963_s20 = smov %s2966_s23  ;;  %s2964_s21 = smov %s2970_s24 }
 0x268   :  { %15 = sbr.rel (!%p13_p8) target bundleno = 3 (0x3), region = 78 }

</bundles_post_ra>
